<compile_context>
chip_gen: v5e
topology: v5e:2x2
jax: 0.10.0
libtpu: 0.0.40
codegen_flags: <defaults>
</compile_context>

<pallas_src>
import jax
import jax.numpy as jnp
from jax.experimental import pallas as pl
from jax.experimental.pallas import tpu as pltpu

FEAT_CHANNELS = (16, 32, 64, 128, 2048)   # level-4 has 2048 channels (PALayer(2048))
FEAT_STRIDES = (1, 2, 2, 4, 4)

_VMEM_LIMIT_BYTES = 48 * 1024 * 1024      # headroom under v7x's 64 MiB physical VMEM
_PA_ROW_TILE = 512                        # 2048-ch in+out tiles + 2 MB weights, dbl-buffered
_STREAM_ROW_TILE = 1024                   # pure-streaming kernels (cal_dist / masked avg)
_ENC_ROW_TILE = 1024


# ----------------------------------------------------------------------------
# Row-tiling helpers (tiles are multiples of 128 rows; rows padded with zeros)
# ----------------------------------------------------------------------------
def _choose_tile(rows, target):
    """Row tile: `target` (multiple of 128) if rows exceed it, else rows rounded up to 128."""
    if rows <= target:
        return ((rows + 127) // 128) * 128
    return target


def _pad_rows(x2d, tile):
    rows = x2d.shape[0]
    rows_p = ((rows + tile - 1) // tile) * tile
    if rows_p != rows:
        x2d = jnp.pad(x2d, ((0, rows_p - rows), (0, 0)))
    return x2d, rows_p


# ----------------------------------------------------------------------------
# Pallas kernels
# ----------------------------------------------------------------------------
def _pa_kernel(x_ref, w1_ref, b1_ref, w2_ref, b2_ref, o_ref):
    # x: (TR, C); w1: (C, C//8); b1: (1, C//8); w2: (1, C//8); b2: (1, 1)
    x = x_ref[...]
    h = jnp.dot(x, w1_ref[...], preferred_element_type=jnp.float32) + b1_ref[...]
    h = jnp.maximum(h, 0.0)                                             # ReLU
    y = jnp.sum(h * w2_ref[...], axis=-1, keepdims=True) + b2_ref[...]  # 1x1 conv -> (TR, 1)
    y = 1.0 / (1.0 + jnp.exp(-y))                                       # Sigmoid
    o_ref[...] = x * y


def _masked_sum_kernel(fts_ref, mask_ref, o_ref, acc_ref):
    # fts: (TR, C); mask: (M, TR); acc/out: (M, C).  Row axis is a reduction.
    i = pl.program_id(0)

    @pl.when(i == 0)
    def _():
        acc_ref[...] = jnp.zeros_like(acc_ref)

    acc_ref[...] += jnp.dot(mask_ref[...], fts_ref[...],
                            preferred_element_type=jnp.float32)

    @pl.when(i == pl.num_programs(0) - 1)
    def _():
        o_ref[...] = acc_ref[...]


def _cos_dist_kernel(f_ref, pn_ref, o_ref):
    # f: (TR, C); pn: (P, C) pre-normalized prototypes; out: (TR, P) = cos_sim * 20
    f = f_ref[...]
    sim = jax.lax.dot_general(f, pn_ref[...], (((1,), (1,)), ((), ())),
                              preferred_element_type=jnp.float32)        # (TR, P)
    s = jnp.sum(f * f, axis=-1, keepdims=True)                           # (TR, 1)
    # 1/max(||f||, 1e-8) == rsqrt(max(||f||^2, 1e-16))  (eps as in F.cosine_similarity)
    scale = 20.0 * jax.lax.rsqrt(jnp.maximum(s, 1e-16))
    o_ref[...] = sim * scale


def _enc_proj_kernel(x_ref, w_ref, b_ref, o_ref):
    # x: (TR, 3) raw image channels; w: (3, Cout); b: (1, Cout).  3 broadcast FMAs (VPU),
    # tanh fused in-kernel.  Avoids materializing a 3->128 lane-padded slab in HBM.
    x = x_ref[...]
    w = w_ref[...]
    acc = b_ref[...] + x[:, 0:1] * w[0:1, :]
    acc = acc + x[:, 1:2] * w[1:2, :]
    acc = acc + x[:, 2:3] * w[2:3, :]
    o_ref[...] = jnp.tanh(acc)


# ----------------------------------------------------------------------------
# Op wrappers (Pallas path + pure-JAX reference path)
# ----------------------------------------------------------------------------
def pa_layer(x_nchw, params, use_pallas=True):
    N, C, H, W = x_nchw.shape
    R = N * H * W
    x2d = jnp.transpose(x_nchw, (0, 2, 3, 1)).reshape(R, C)
    w1, b1, w2, b2 = params["pa_w1"], params["pa_b1"], params["pa_w2"], params["pa_b2"]
    if use_pallas:
        C8 = w1.shape[1]
        tile = _choose_tile(R, _PA_ROW_TILE)
        x_p, Rp = _pad_rows(x2d, tile)
        out2d = pl.pallas_call(
            _pa_kernel,
            out_shape=jax.ShapeDtypeStruct((Rp, C), jnp.float32),
            grid=(Rp // tile,),
            in_specs=[pl.BlockSpec((tile, C), lambda i: (i, 0)),
                      pl.BlockSpec((C, C8), lambda i: (0, 0)),
                      pl.BlockSpec((1, C8), lambda i: (0, 0)),
                      pl.BlockSpec((1, C8), lambda i: (0, 0)),
                      pl.BlockSpec((1, 1), lambda i: (0, 0))],
            out_specs=pl.BlockSpec((tile, C), lambda i: (i, 0)),
            compiler_params=pltpu.CompilerParams(
                dimension_semantics=("parallel",),
                vmem_limit_bytes=_VMEM_LIMIT_BYTES),
        )(x_p, w1, b1, w2, b2)[:R]
    else:
        h = jnp.maximum(jnp.dot(x2d, w1, precision=jax.lax.Precision.HIGHEST) + b1, 0.0)
        y = jax.nn.sigmoid(jnp.sum(h * w2, axis=-1, keepdims=True) + b2)
        out2d = x2d * y
    return jnp.transpose(out2d.reshape(N, H, W, C), (0, 3, 1, 2))


def masked_avg_pool_multi(fts_nchw, masks_hw, use_pallas=True):
    """getFeatures fused over all masks of an episode.

    fts (1,C,H,W) already at mask resolution, masks = list of (H,W) -> (M, C).
    The 2048-ch feature map is streamed from HBM exactly once for all masks.
    """
    _, C, H, W = fts_nchw.shape
    R = H * W
    M = len(masks_hw)
    fts2d = jnp.transpose(fts_nchw, (0, 2, 3, 1)).reshape(R, C)
    masks2d = jnp.stack([m.reshape(R) for m in masks_hw], axis=0).astype(jnp.float32)  # (M, R)
    if use_pallas:
        tile = _choose_tile(R, _STREAM_ROW_TILE)
        fts_p, Rp = _pad_rows(fts2d, tile)
        if Rp != R:
            masks_p = jnp.pad(masks2d, ((0, 0), (0, Rp - R)))
        else:
            masks_p = masks2d
        sums = pl.pallas_call(
            _masked_sum_kernel,
            out_shape=jax.ShapeDtypeStruct((M, C), jnp.float32),
            grid=(Rp // tile,),
            in_specs=[pl.BlockSpec((tile, C), lambda i: (i, 0)),
                      pl.BlockSpec((M, tile), lambda i: (0, i))],
            out_specs=pl.BlockSpec((M, C), lambda i: (0, 0)),
            scratch_shapes=[pltpu.VMEM((M, C), jnp.float32)],
            compiler_params=pltpu.CompilerParams(
                dimension_semantics=("arbitrary",),
                vmem_limit_bytes=_VMEM_LIMIT_BYTES),
        )(fts_p, masks_p)
    else:
        sums = jnp.dot(masks2d, fts2d, precision=jax.lax.Precision.HIGHEST)
    msum = jnp.sum(masks2d, axis=1, keepdims=True)            # (M, 1)
    return sums / (msum + 1e-5)                               # (M, C)


def cal_dist(qry_fts_nchw, protos, use_pallas=True):
    """calDist for all prototypes at once. qry (N,C,H,W), protos (P,C) -> (N,P,H,W)."""
    N, C, H, W = qry_fts_nchw.shape
    R = N * H * W
    P = protos.shape[0]
    f2d = jnp.transpose(qry_fts_nchw, (0, 2, 3, 1)).reshape(R, C)
    eps = 1e-8
    if use_pallas:
        # Normalize the (tiny) prototypes once in the wrapper; rows scaled in-kernel.
        pn = protos / jnp.maximum(
            jnp.sqrt(jnp.sum(protos * protos, axis=-1, keepdims=True)), eps)
        tile = _choose_tile(R, _STREAM_ROW_TILE)
        f_p, Rp = _pad_rows(f2d, tile)
        out2d = pl.pallas_call(
            _cos_dist_kernel,
            out_shape=jax.ShapeDtypeStruct((Rp, P), jnp.float32),
            grid=(Rp // tile,),
            in_specs=[pl.BlockSpec((tile, C), lambda i: (i, 0)),
                      pl.BlockSpec((P, C), lambda i: (0, 0))],
            out_specs=pl.BlockSpec((tile, P), lambda i: (i, 0)),
            compiler_params=pltpu.CompilerParams(
                dimension_semantics=("parallel",),
                vmem_limit_bytes=_VMEM_LIMIT_BYTES),
        )(f_p, pn)[:R]
    else:
        fn = f2d / jnp.maximum(jnp.linalg.norm(f2d, axis=-1, keepdims=True), eps)
        pnr = protos / jnp.maximum(jnp.linalg.norm(protos, axis=-1, keepdims=True), eps)
        out2d = jnp.dot(fn, pnr.T, precision=jax.lax.Precision.HIGHEST) * 20.0
    return jnp.transpose(out2d.reshape(N, H, W, P), (0, 3, 1, 2))


def enc_project(rows, w, b):
    """3-channel 1x1 projection + tanh. rows (R, 3), w (3, Cout), b (1, Cout) -> (R, Cout)."""
    R, Cin = rows.shape
    Cout = w.shape[1]
    tile = _choose_tile(R, _ENC_ROW_TILE)
    rows_p, Rp = _pad_rows(rows, tile)
    out = pl.pallas_call(
        _enc_proj_kernel,
        out_shape=jax.ShapeDtypeStruct((Rp, Cout), jnp.float32),
        grid=(Rp // tile,),
        in_specs=[pl.BlockSpec((tile, Cin), lambda i: (i, 0)),
                  pl.BlockSpec((Cin, Cout), lambda i: (0, 0)),
                  pl.BlockSpec((1, Cout), lambda i: (0, 0))],
        out_specs=pl.BlockSpec((tile, Cout), lambda i: (i, 0)),
        compiler_params=pltpu.CompilerParams(
            dimension_semantics=("parallel",),
            vmem_limit_bytes=_VMEM_LIMIT_BYTES),
    )(rows_p, w, b)
    return out[:R]


# ----------------------------------------------------------------------------
# Synthetic encoder (Encoder() undefined in reference) + model forward
# ----------------------------------------------------------------------------
def encoder_forward(enc_params, imgs_nchw, use_pallas=True):
    TB, Cin, H, W = imgs_nchw.shape
    feats = []
    for (w, b), s in zip(enc_params, FEAT_STRIDES):
        if s > 1:
            x = imgs_nchw.reshape(TB, Cin, H // s, s, W // s, s).mean(axis=(3, 5))
        else:
            x = imgs_nchw
        h, wd = x.shape[-2:]
        rows = jnp.transpose(x, (0, 2, 3, 1)).reshape(TB * h * wd, Cin)
        cout = w.shape[1]
        if use_pallas:
            y = enc_project(rows, w, b)                       # tanh fused in-kernel
        else:
            y = jnp.tanh(jnp.dot(rows, w, precision=jax.lax.Precision.HIGHEST) + b)
        feats.append(jnp.transpose(y.reshape(TB, h, wd, cout), (0, 3, 1, 2)))
    return feats


def get_prototype(fg_fts, bg_fts):
    n_shots = len(fg_fts[0])
    fg_prototypes = [sum(way) / n_shots for way in fg_fts]
    bg_prototype = sum([sum(way) / n_shots for way in bg_fts])
    return fg_prototypes, bg_prototype


def few_shot_seg_forward(params, supp_imgs, fore_mask, back_mask, qry_imgs, pre_mask,
                         use_pallas=True):
    n_ways = len(supp_imgs)
    n_shots = len(supp_imgs[0])
    n_queries = len(qry_imgs)
    batch_size = supp_imgs[0][0].shape[0]
    img_size = supp_imgs[0][0].shape[-2:]
    obj_nums = len(fore_mask)

    imgs_concat = jnp.concatenate(
        [jnp.concatenate(way, axis=0) for way in supp_imgs]
        + [jnp.concatenate(qry_imgs, axis=0)], axis=0)

    all_img_fts = encoder_forward(params["enc"], imgs_concat, use_pallas=use_pallas)
    img_fts = all_img_fts[4]

    ns_b = n_ways * n_shots * batch_size
    # (built for semantic fidelity; unused by the output, as in the reference)
    qurey_feature, all_feature_size, all_support_feature = [], [], []
    for i in range(5):
        fts_size_i = all_img_fts[i].shape[-2:]
        all_feature_size.append(fts_size_i)
        qurey_feature.append(all_img_fts[i][ns_b:].reshape(n_queries, batch_size, -1, *fts_size_i))
        all_support_feature.append(
            all_img_fts[i][:ns_b].reshape(n_ways, n_shots, batch_size, -1, *fts_size_i))

    fts_size = img_fts.shape[-2:]
    supp_fts = img_fts[:ns_b].reshape(n_ways, n_shots, batch_size, -1, *fts_size)
    qry_fts = img_fts[ns_b:].reshape(n_queries, batch_size, -1, *fts_size)

    fore_mask_t = jnp.stack([jnp.stack(way, axis=0) for way in fore_mask], axis=0)
    back_mask_t = jnp.stack([jnp.stack(way, axis=0) for way in back_mask], axis=0)

    align_loss = 0.0
    outputs = []
    for epi in range(batch_size):
        att_feature = pa_layer(supp_fts[0, 0, epi:epi + 1], params, use_pallas=use_pallas)
        # getFeatures resizes features to mask resolution; masks all share img_size,
        # so resize once and fuse ALL fg+bg masked averages into a single Pallas pass.
        att_up = jax.image.resize(
            att_feature, (1, att_feature.shape[1], *img_size), method="bilinear")
        fg_masks = [fore_mask_t[way, shot, epi]
                    for way in range(obj_nums) for shot in range(n_shots)]
        bg_masks = [back_mask_t[0, shot, epi] for shot in range(n_shots)]
        pooled = masked_avg_pool_multi(att_up, fg_masks + bg_masks, use_pallas=use_pallas)
        n_fg = obj_nums * n_shots
        supp_fg_fts = [[pooled[way * n_shots + shot][None] for shot in range(n_shots)]
                       for way in range(obj_nums)]
        supp_bg_fts = [[pooled[n_fg + shot][None] for shot in range(n_shots)]
                       for _ in range(1)]
        fg_prototypes, bg_prototype = get_prototype(supp_fg_fts, supp_bg_fts)
        protos = jnp.concatenate([bg_prototype] + fg_prototypes, axis=0)   # (1+Wa, C)
        pred = cal_dist(qry_fts[:, epi], protos, use_pallas=use_pallas)    # (N, 1+Wa, h, w)
        outputs.append(jax.image.resize(
            pred, (pred.shape[0], pred.shape[1], *img_size), method="bilinear"))
        # TODO(synk): alignLoss skipped — config['align'] is False (default) / eval mode.

    output = jnp.stack(outputs, axis=1)                 # (N, B, 1+Wa, H, W)
    output = output.reshape(-1, *output.shape[2:])      # (N*B, 1+Wa, H, W)
    return output, align_loss / batch_size


# ----------------------------------------------------------------------------
# Deterministic parameter init (synthetic; no checkpoint load)
# ----------------------------------------------------------------------------
def init_params(key):
    keys = jax.random.split(key, 2 * len(FEAT_CHANNELS) + 4)
    enc = []
    for i, c in enumerate(FEAT_CHANNELS):
        w = jax.random.normal(keys[2 * i], (3, c), jnp.float32) * 0.2
        b = jax.random.normal(keys[2 * i + 1], (1, c), jnp.float32) * 0.01
        enc.append((w, b))
    C = FEAT_CHANNELS[-1]
    C8 = C // 8
    params = {
        "enc": enc,
        "pa_w1": jax.random.normal(keys[-4], (C, C8), jnp.float32) * (1.0 / jnp.sqrt(C)),
        "pa_b1": jax.random.normal(keys[-3], (1, C8), jnp.float32) * 0.01,
        "pa_w2": jax.random.normal(keys[-2], (1, C8), jnp.float32) * 0.05,
        "pa_b2": jax.random.normal(keys[-1], (1, 1), jnp.float32) * 0.01,
    }
    return params


if __name__ == "__main__":
    key = jax.random.PRNGKey(0)
    B, H, W = 2, 32, 32
    n_ways, n_shots, n_queries = 1, 1, 1

    keys = jax.random.split(key, 8)
    params = init_params(keys[0])

    supp_imgs = [[jax.random.normal(keys[1], (B, 3, H, W), jnp.float32)]]
    qry_imgs = [jax.random.normal(keys[2], (B, 3, H, W), jnp.float32)]
    fore = (jax.random.uniform(keys[3], (B, H, W)) > 0.5).astype(jnp.float32)
    fore_mask = [[fore]]
    back_mask = [[1.0 - fore]]
    pre_mask = [jnp.zeros((B, H, W), jnp.float32)]   # unused by forward (as in reference)

    out, loss = few_shot_seg_forward(params, supp_imgs, fore_mask, back_mask,
                                     qry_imgs, pre_mask, use_pallas=True)
    out = jax.block_until_ready(out)

    ref_out, _ = few_shot_seg_forward(params, supp_imgs, fore_mask, back_mask,
                                      qry_imgs, pre_mask, use_pallas=False)
    ref_out = jax.block_until_ready(ref_out)

    assert out.shape == (n_queries * B, 1 + n_ways, H, W), out.shape
    assert bool(jnp.isfinite(out).all())
    assert bool(jnp.allclose(out, ref_out, atol=1e-2, rtol=1e-2)), (
        float(jnp.max(jnp.abs(out - ref_out))))
    assert float(loss) == 0.0

    print("KERNEL_OK")
</pallas_src>

<mosaic_0001>
module attributes {stable_mosaic.version = 11 : i64} {
  func.func @_enc_proj_kernel(%arg0: i32, %arg1: memref<1024x3xf32, #tpu.memory_space<vmem>>, %arg2: memref<3x16xf32, #tpu.memory_space<vmem>>, %arg3: memref<1x16xf32, #tpu.memory_space<vmem>>, %arg4: memref<1024x16xf32, #tpu.memory_space<vmem>>) attributes {dimension_semantics = [#tpu.dimension_semantics<parallel>], iteration_bounds = array<i64: 4>, scalar_prefetch = 0 : i64, scratch_operands = 0 : i64, tpu.core_type = #tpu.core_type<tc>, window_params = [{transform_indices = @transform_0, window_bounds = array<i64: 1024, 3>}, {pipeline_mode = #tpu.pipeline_mode<synchronous>, transform_indices = @transform_1, window_bounds = array<i64: 3, 16>}, {pipeline_mode = #tpu.pipeline_mode<synchronous>, transform_indices = @transform_2, window_bounds = array<i64: 1, 16>}, {transform_indices = @transform_3, window_bounds = array<i64: 1024, 16>}]} {
    %c0 = arith.constant 0 : index
    %c0_0 = arith.constant 0 : index
    %0 = vector.load %arg1[%c0, %c0_0] : memref<1024x3xf32, #tpu.memory_space<vmem>>, vector<1024x3xf32>
    %c0_1 = arith.constant 0 : index
    %c0_2 = arith.constant 0 : index
    %1 = vector.load %arg2[%c0_1, %c0_2] : memref<3x16xf32, #tpu.memory_space<vmem>>, vector<3x16xf32>
    %c0_3 = arith.constant 0 : index
    %c0_4 = arith.constant 0 : index
    %2 = vector.load %arg3[%c0_3, %c0_4] : memref<1x16xf32, #tpu.memory_space<vmem>>, vector<1x16xf32>
    %3 = vector.extract_strided_slice %0 {offsets = [0, 0], sizes = [1024, 1], strides = [1, 1]} : vector<1024x3xf32> to vector<1024x1xf32>
    %4 = vector.extract_strided_slice %1 {offsets = [0, 0], sizes = [1, 16], strides = [1, 1]} : vector<3x16xf32> to vector<1x16xf32>
    %5 = vector.broadcast %3 : vector<1024x1xf32> to vector<1024x16xf32>
    %6 = vector.broadcast %4 : vector<1x16xf32> to vector<1024x16xf32>
    %7 = arith.mulf %5, %6 : vector<1024x16xf32>
    %8 = vector.broadcast %2 : vector<1x16xf32> to vector<1024x16xf32>
    %9 = arith.addf %8, %7 : vector<1024x16xf32>
    %10 = vector.extract_strided_slice %0 {offsets = [0, 1], sizes = [1024, 1], strides = [1, 1]} : vector<1024x3xf32> to vector<1024x1xf32>
    %11 = vector.extract_strided_slice %1 {offsets = [1, 0], sizes = [1, 16], strides = [1, 1]} : vector<3x16xf32> to vector<1x16xf32>
    %12 = vector.broadcast %10 : vector<1024x1xf32> to vector<1024x16xf32>
    %13 = vector.broadcast %11 : vector<1x16xf32> to vector<1024x16xf32>
    %14 = arith.mulf %12, %13 : vector<1024x16xf32>
    %15 = arith.addf %9, %14 : vector<1024x16xf32>
    %16 = vector.extract_strided_slice %0 {offsets = [0, 2], sizes = [1024, 1], strides = [1, 1]} : vector<1024x3xf32> to vector<1024x1xf32>
    %17 = vector.extract_strided_slice %1 {offsets = [2, 0], sizes = [1, 16], strides = [1, 1]} : vector<3x16xf32> to vector<1x16xf32>
    %18 = vector.broadcast %16 : vector<1024x1xf32> to vector<1024x16xf32>
    %19 = vector.broadcast %17 : vector<1x16xf32> to vector<1024x16xf32>
    %20 = arith.mulf %18, %19 : vector<1024x16xf32>
    %21 = arith.addf %15, %20 : vector<1024x16xf32>
    %22 = math.tanh %21 : vector<1024x16xf32>
    %c0_5 = arith.constant 0 : index
    %c0_6 = arith.constant 0 : index
    %23 = vector.load %arg4[%c0_5, %c0_6] : memref<1024x16xf32, #tpu.memory_space<vmem>>, vector<1024x16xf32>
    tpu.vector_store %arg4[%c0_5, %c0_6], %22 {strides = array<i32>} : memref<1024x16xf32, #tpu.memory_space<vmem>>, vector<1024x16xf32>,
    return
  }
  func.func @transform_0(%arg0: i32) -> (i32, i32) {
    %c0_i32 = arith.constant 0 : i32
    %c0_i32_0 = arith.constant 0 : i32
    return %arg0, %c0_i32 : i32, i32
  }
  func.func @transform_1(%arg0: i32) -> (i32, i32) {
    %c0_i32 = arith.constant 0 : i32
    %c0_i32_0 = arith.constant 0 : i32
    %c0_i32_1 = arith.constant 0 : i32
    return %c0_i32, %c0_i32_0 : i32, i32
  }
  func.func @transform_2(%arg0: i32) -> (i32, i32) {
    %c0_i32 = arith.constant 0 : i32
    %c0_i32_0 = arith.constant 0 : i32
    %c0_i32_1 = arith.constant 0 : i32
    return %c0_i32, %c0_i32_0 : i32, i32
  }
  func.func @transform_3(%arg0: i32) -> (i32, i32) {
    %c0_i32 = arith.constant 0 : i32
    %c0_i32_0 = arith.constant 0 : i32
    return %arg0, %c0_i32 : i32, i32
  }
}

</mosaic_0001>

<bundles_post_ra>
// kernel: tpu_custom_call.1
= control target key start
LH: loop header
LB: loop body
LE: loop exit
PB: predicated region body
PF: predicated region fallthrough
CT: control target
= control target key end

     0   :  { %s3504_s12 = smov 0   ;;  %s5860_s0 = inlined_call_operand.vmem [shape: f32[4096,3], index: 0, kind: input, shape index: {}]   ;;  %s5861_s1 = inlined_call_operand.vmem [shape: f32[3,16], index: 1, kind: input, shape index: {}]   ;;  %s5862_s2 = inlined_call_operand.vmem [shape: f32[1,16], index: 2, kind: input, shape index: {}]   ;;  %s5863_s3 = inlined_call_operand.vmem [shape: f32[4096,16], index: 3, kind: output, shape index: {}]  }
   0x1 LB: > { %s3055_s13 = sadd.s32 4294967295, %s3479_s12   ;;  %p3059_p0 = scmp.ge.s32.totalorder %s3479_s12, 1  ;;  %s3479_s12 = sphi %s3504_s12, %s13_s12  }
   0x2   : > { %p138_p1 = scmp.lt.s32.totalorder %s3479_s12, 5 }
   0x4   : > { %p139_p2 = pnand %p3059_p0, %p138_p1 }
   0x6   : > { %142 = sbr.rel (%p139_p2) target bundleno = 1171 (0x493), region = 32 }
   0xb   : > { %s3060_s14 = sshll.u32 %s3055_s13, 7  ;;  %v3481_v0 = vmov 0   ;;  %vm2870_vm0 = vcmask 130048  }
   0xc   : > { %3079 = vset.pattern.permute.xlu2 %v3481_v0  ;;  %3078 = vset.pattern.permute.xlu1 %v3481_v0  ;;  %p163_p3 = scmp.lt.s32.totalorder %s3060_s14, 511 }
   0xd   : > { %3077 = vset.pattern.permute.xlu0 %v3481_v0 }
   0xe   : > { %s6498_s14 = smov (!%p163_p3, %s3060_s14), 511 }
   0xf   : > { %s3061_s15 = sshll.u32 %s6498_s14, 3 }
  0x10   : > { %s3520_s18 = scalar_lea.vmem %s5860_s0, %s3061_s15  ;;  %s4736_s25 = scalar_lea.vmem %s5863_s3, %s3061_s15 }
  0x11   : > { %v3523_v1 = vld [vmem:[%s3520_s18 + $0x20] sm:$0xff]  ;;  %v3526_v2 = vld [vmem:[%s3520_s18 + $0x10] sm:$0xff]  ;;  %v3535_v4 = vld [vmem:[%s3520_s18 + $0x28] sm:$0xff] }
  0x12   : > { %v3529_v3 = vld [vmem:[%s3520_s18] sm:$0xff]  ;;  %326 = vperm.xlu2 %3079, %v3523_v1   ;;  %316 = vperm.xlu1 %3078, %v3526_v2   ;;  %v3538_v5 = vld [vmem:[%s3520_s18 + $0x18] sm:$0xff]  ;;  %v3541_v6 = vld [vmem:[%s3520_s18 + $0x8] sm:$0xff] }
  0x13   : > { %306 = vperm.xlu0 %3077, %v3529_v3   ;;  %v3547_v7 = vld [vmem:[%s3520_s18 + $0x40] sm:$0xff]  ;;  %v3550_v8 = vld [vmem:[%s3520_s18 + $0x38] sm:$0xff]  ;;  %v3553_v9 = vld [vmem:[%s3520_s18 + $0x30] sm:$0xff] }
  0x14   : > { %v3559_v10 = vld [vmem:[%s3520_s18 + $0x58] sm:$0xff]  ;;  %v3562_v11 = vld [vmem:[%s3520_s18 + $0x50] sm:$0xff]  ;;  %v3565_v12 = vld [vmem:[%s3520_s18 + $0x48] sm:$0xff] }
  0x15   : > { %v3571_v13 = vld [vmem:[%s3520_s18 + $0x70] sm:$0xff]  ;;  %v3574_v14 = vld [vmem:[%s3520_s18 + $0x68] sm:$0xff]  ;;  %v3577_v15 = vld [vmem:[%s3520_s18 + $0x60] sm:$0xff] }
  0x16   : > { %v3583_v16 = vld [vmem:[%s3520_s18 + $0x88] sm:$0xff]  ;;  %v3586_v17 = vld [vmem:[%s3520_s18 + $0x80] sm:$0xff]  ;;  %v3589_v18 = vld [vmem:[%s3520_s18 + $0x78] sm:$0xff] }
  0x17   : > { %v3595_v19 = vld [vmem:[%s3520_s18 + $0xa0] sm:$0xff]  ;;  %v3598_v20 = vld [vmem:[%s3520_s18 + $0x98] sm:$0xff]  ;;  %v3601_v21 = vld [vmem:[%s3520_s18 + $0x90] sm:$0xff] }
  0x18   : > { %v3607_v22 = vld [vmem:[%s3520_s18 + $0xb8] sm:$0xff]  ;;  %v3610_v23 = vld [vmem:[%s3520_s18 + $0xb0] sm:$0xff]  ;;  %v3613_v24 = vld [vmem:[%s3520_s18 + $0xa8] sm:$0xff] }
  0x19   : > { %v3619_v25 = vld [vmem:[%s3520_s18 + $0xd0] sm:$0xff]  ;;  %v3622_v26 = vld [vmem:[%s3520_s18 + $0xc8] sm:$0xff]  ;;  %v3625_v27 = vld [vmem:[%s3520_s18 + $0xc0] sm:$0xff] }
  0x1a   : > { %331 = vperm.xlu2 %3079, %v3535_v4   ;;  %321 = vperm.xlu1 %3078, %v3538_v5   ;;  %v3631_v28 = vld [vmem:[%s3520_s18 + $0xe8] sm:$0xff]  ;;  %v3634_v29 = vld [vmem:[%s3520_s18 + $0xe0] sm:$0xff]  ;;  %v3637_v30 = vld [vmem:[%s3520_s18 + $0xd8] sm:$0xff] }
  0x1b   : > { %311 = vperm.xlu0 %3077, %v3541_v6   ;;  %v3643_v31 = vld [vmem:[%s3520_s18 + $0x100] sm:$0xff]  ;;  %v3646_v32 = vld [vmem:[%s3520_s18 + $0xf8] sm:$0xff]  ;;  %v3649_v33 = vld [vmem:[%s3520_s18 + $0xf0] sm:$0xff] }
  0x1c   : > { %v3655_v34 = vld [vmem:[%s3520_s18 + $0x118] sm:$0xff]  ;;  %v3658_v35 = vld [vmem:[%s3520_s18 + $0x110] sm:$0xff]  ;;  %v3661_v36 = vld [vmem:[%s3520_s18 + $0x108] sm:$0xff] }
  0x1d   : > { %v3669_v38 = vld [vmem:[%s3520_s18 + $0x130] sm:$0xff]  ;;  %v3672_v39 = vld [vmem:[%s3520_s18 + $0x128] sm:$0xff]  ;;  %v3675_v40 = vld [vmem:[%s3520_s18 + $0x120] sm:$0xff] }
  0x1e   : > { %v3683_v42 = vld [vmem:[%s3520_s18 + $0x148] sm:$0xff]  ;;  %v3686_v43 = vld [vmem:[%s3520_s18 + $0x140] sm:$0xff]  ;;  %v3689_v44 = vld [vmem:[%s3520_s18 + $0x138] sm:$0xff] }
  0x1f   : > { %v3697_v46 = vld [vmem:[%s3520_s18 + $0x160] sm:$0xff]  ;;  %v3700_v47 = vld [vmem:[%s3520_s18 + $0x158] sm:$0xff]  ;;  %v3703_v48 = vld [vmem:[%s3520_s18 + $0x150] sm:$0xff] }
  0x20   : > { %v3715_v52 = vld [vmem:[%s3520_s18 + $0x178] sm:$0xff]  ;;  %v3718_v53 = vld [vmem:[%s3520_s18 + $0x170] sm:$0xff]  ;;  %v3721_v54 = vld [vmem:[%s3520_s18 + $0x168] sm:$0xff] }
  0x21   : > { %v3733_v58 = vld [vmem:[%s3520_s18 + $0x190] sm:$0xff]  ;;  %v3736_v59 = vld [vmem:[%s3520_s18 + $0x188] sm:$0xff]  ;;  %v3739_v60 = vld [vmem:[%s3520_s18 + $0x180] sm:$0xff] }
  0x22   : > { %346 = vperm.xlu2 %3079, %v3547_v7   ;;  %341 = vperm.xlu1 %3078, %v3550_v8   ;;  %v3751_v0 = vld [vmem:[%s3520_s18 + $0x1a8] sm:$0xff] }
  0x23   : > { %336 = vperm.xlu0 %3077, %v3553_v9  }
  0x2a   : > { %361 = vperm.xlu2 %3079, %v3559_v10   ;;  %356 = vperm.xlu1 %3078, %v3562_v11  }
  0x2b   : > { %351 = vperm.xlu0 %3077, %v3565_v12  }
  0x32   : > { %376 = vperm.xlu2 %3079, %v3571_v13   ;;  %371 = vperm.xlu1 %3078, %v3574_v14  }
  0x33   : > { %366 = vperm.xlu0 %3077, %v3577_v15  }
  0x3a   : > { %391 = vperm.xlu2 %3079, %v3583_v16   ;;  %386 = vperm.xlu1 %3078, %v3586_v17  }
  0x3b   : > { %381 = vperm.xlu0 %3077, %v3589_v18  }
  0x42   : > { %406 = vperm.xlu2 %3079, %v3595_v19   ;;  %401 = vperm.xlu1 %3078, %v3598_v20  }
  0x43   : > { %396 = vperm.xlu0 %3077, %v3601_v21  }
  0x4a   : > { %421 = vperm.xlu2 %3079, %v3607_v22   ;;  %416 = vperm.xlu1 %3078, %v3610_v23  }
  0x4b   : > { %411 = vperm.xlu0 %3077, %v3613_v24  }
  0x52   : > { %436 = vperm.xlu2 %3079, %v3619_v25   ;;  %431 = vperm.xlu1 %3078, %v3622_v26  }
  0x53   : > { %426 = vperm.xlu0 %3077, %v3625_v27  }
  0x5a   : > { %451 = vperm.xlu2 %3079, %v3631_v28   ;;  %446 = vperm.xlu1 %3078, %v3634_v29  }
  0x5b   : > { %441 = vperm.xlu0 %3077, %v3637_v30  }
  0x62   : > { %466 = vperm.xlu2 %3079, %v3643_v31   ;;  %461 = vperm.xlu1 %3078, %v3646_v32  }
  0x63   : > { %456 = vperm.xlu0 %3077, %v3649_v33  }
  0x6a   : > { %481 = vperm.xlu2 %3079, %v3655_v34   ;;  %476 = vperm.xlu1 %3078, %v3658_v35  }
  0x6b   : > { %471 = vperm.xlu0 %3077, %v3661_v36  }
  0x6c   : > { %v3666_v37 = vpop.permute.xlu2 %326 }
  0x6d   : > { %5935 = vst [vmem:[#allocation2_spill] sm:$0xff] %v3666_v37  ;;  %v3757_v37 = vld [vmem:[%s3520_s18 + $0x198] sm:$0xff] }
  0x72   : > { %496 = vperm.xlu2 %3079, %v3669_v38   ;;  %491 = vperm.xlu1 %3078, %v3672_v39  }
  0x73   : > { %486 = vperm.xlu0 %3077, %v3675_v40  }
  0x74   : > { %v3680_v41 = vpop.permute.xlu2 %331 }
  0x75   : > { %5936 = vst [vmem:[#allocation3_spill] sm:$0xff] %v3680_v41  ;;  %v3790_v41 = vld [vmem:[%s3520_s18 + $0x1d0] sm:$0xff] }
  0x76   : > { %5956 = vst [vmem:[#allocation23_spill] sm:$0xff] %v3790_v41 }
  0x7a   : > { %511 = vperm.xlu2 %3079, %v3683_v42   ;;  %506 = vperm.xlu1 %3078, %v3686_v43  }
  0x7b   : > { %501 = vperm.xlu0 %3077, %v3689_v44  }
  0x7c   : > { %v3694_v45 = vpop.permute.xlu2 %346 }
  0x7d   : > { %5937 = vst [vmem:[#allocation4_spill] sm:$0xff] %v3694_v45  ;;  %v3787_v45 = vld [vmem:[%s3520_s18 + $0x1d8] sm:$0xff] }
  0x7e   : > { %5955 = vst [vmem:[#allocation22_spill] sm:$0xff] %v3787_v45 }
  0x82   : > { %526 = vperm.xlu2 %3079, %v3697_v46   ;;  %521 = vperm.xlu1 %3078, %v3700_v47  }
  0x83   : > { %516 = vperm.xlu0 %3077, %v3703_v48  }
  0x84   : > { %v3708_v49 = vpop.permute.xlu2 %361  ;;  %v3710_v50 = vpop.permute.xlu1 %316 }
  0x85   : > { %5938 = vst [vmem:[#allocation5_spill] sm:$0xff] %v3708_v49  ;;  %v3712_v51 = vpop.permute.xlu0 %306  ;;  %v3769_v49 = vld [vmem:[%s3520_s18 + $0x1c0] sm:$0xff] }
  0x86   : > { %5939 = vst [vmem:[#allocation6_spill] sm:$0xff] %v3710_v50  ;;  %v3772_v50 = vld [vmem:[%s3520_s18 + $0x1b8] sm:$0xff] }
  0x87   : > { %5940 = vst [vmem:[#allocation7_spill] sm:$0xff] %v3712_v51  ;;  %v3805_v51 = vld [vmem:[%s3520_s18 + $0x1f0] sm:$0xff] }
  0x88   : > { %5950 = vst [vmem:[#allocation17_spill] sm:$0xff] %v3769_v49 }
  0x89   : > { %5951 = vst [vmem:[#allocation18_spill] sm:$0xff] %v3772_v50 }
  0x8a   : > { %541 = vperm.xlu2 %3079, %v3715_v52   ;;  %536 = vperm.xlu1 %3078, %v3718_v53   ;;  %5961 = vst [vmem:[#allocation28_spill] sm:$0xff] %v3805_v51 }
  0x8b   : > { %531 = vperm.xlu0 %3077, %v3721_v54  }
  0x8c   : > { %v3726_v55 = vpop.permute.xlu2 %376  ;;  %v3728_v56 = vpop.permute.xlu1 %321 }
  0x8d   : > { %5941 = vst [vmem:[#allocation8_spill] sm:$0xff] %v3726_v55  ;;  %v3730_v57 = vpop.permute.xlu0 %311  ;;  %v3754_v55 = vld [vmem:[%s3520_s18 + $0x1a0] sm:$0xff] }
  0x8e   : > { %5942 = vst [vmem:[#allocation9_spill] sm:$0xff] %v3728_v56  ;;  %v3793_v56 = vld [vmem:[%s3520_s18 + $0x1c8] sm:$0xff] }
  0x8f   : > { %5943 = vst [vmem:[#allocation10_spill] sm:$0xff] %v3730_v57  ;;  %v3775_v57 = vld [vmem:[%s3520_s18 + $0x1b0] sm:$0xff] }
  0x90   : > { %5957 = vst [vmem:[#allocation24_spill] sm:$0xff] %v3793_v56 }
  0x92   : > { %556 = vperm.xlu2 %3079, %v3733_v58   ;;  %551 = vperm.xlu1 %3078, %v3736_v59  }
  0x93   : > { %546 = vperm.xlu0 %3077, %v3739_v60  }
  0x94   : > { %v3744_v61 = vpop.permute.xlu2 %391  ;;  %v3746_v62 = vpop.permute.xlu1 %341 }
  0x95   : > { %5944 = vst [vmem:[#allocation11_spill] sm:$0xff] %v3744_v61  ;;  %v3748_v63 = vpop.permute.xlu0 %336 }
  0x96   : > { %5945 = vst [vmem:[#allocation12_spill] sm:$0xff] %v3746_v62 }
  0x97   : > { %5946 = vst [vmem:[#allocation13_spill] sm:$0xff] %v3748_v63 }
  0x9a   : > { %571 = vperm.xlu2 %3079, %v3751_v0   ;;  %566 = vperm.xlu1 %3078, %v3754_v55  }
  0x9b   : > { %561 = vperm.xlu0 %3077, %v3757_v37  }
  0x9c   : > { %v3762_v61 = vpop.permute.xlu2 %406  ;;  %v3764_v62 = vpop.permute.xlu1 %356 }
  0x9d   : > { %5947 = vst [vmem:[#allocation14_spill] sm:$0xff] %v3762_v61  ;;  %v3766_v63 = vpop.permute.xlu0 %351 }
  0x9e   : > { %5948 = vst [vmem:[#allocation15_spill] sm:$0xff] %v3764_v62 }
  0x9f   : > { %5949 = vst [vmem:[#allocation16_spill] sm:$0xff] %v3766_v63 }
  0xa2   : > { %586 = vperm.xlu2 %3079, %v3769_v49   ;;  %581 = vperm.xlu1 %3078, %v3772_v50   ;;  %v3808_v49 = vld [vmem:[%s3520_s18 + $0x1e8] sm:$0xff]  ;;  %v3811_v50 = vld [vmem:[%s3520_s18 + $0x1e0] sm:$0xff] }
  0xa3   : > { %576 = vperm.xlu0 %3077, %v3775_v57   ;;  %5962 = vst [vmem:[#allocation29_spill] sm:$0xff] %v3808_v49 }
  0xa4   : > { %v3780_v61 = vpop.permute.xlu2 %421  ;;  %v3782_v62 = vpop.permute.xlu1 %371  ;;  %5963 = vst [vmem:[#allocation30_spill] sm:$0xff] %v3811_v50 }
  0xa5   : > { %5952 = vst [vmem:[#allocation19_spill] sm:$0xff] %v3780_v61  ;;  %v3784_v63 = vpop.permute.xlu0 %366 }
  0xa6   : > { %5953 = vst [vmem:[#allocation20_spill] sm:$0xff] %v3782_v62 }
  0xa7   : > { %5954 = vst [vmem:[#allocation21_spill] sm:$0xff] %v3784_v63 }
  0xaa   : > { %601 = vperm.xlu2 %3079, %v3787_v45   ;;  %596 = vperm.xlu1 %3078, %v3790_v41   ;;  %v3823_v45 = vld [vmem:[%s3520_s18 + $0x208] sm:$0xff]  ;;  %v3826_v41 = vld [vmem:[%s3520_s18 + $0x200] sm:$0xff] }
  0xab   : > { %591 = vperm.xlu0 %3077, %v3793_v56   ;;  %5967 = vst [vmem:[#allocation34_spill] sm:$0xff] %v3823_v45  ;;  %v3829_v56 = vld [vmem:[%s3520_s18 + $0x1f8] sm:$0xff] }
  0xac   : > { %v3798_v61 = vpop.permute.xlu2 %436  ;;  %v3800_v62 = vpop.permute.xlu1 %386  ;;  %5968 = vst [vmem:[#allocation35_spill] sm:$0xff] %v3826_v41 }
  0xad   : > { %5958 = vst [vmem:[#allocation25_spill] sm:$0xff] %v3798_v61  ;;  %v3802_v63 = vpop.permute.xlu0 %381 }
  0xae   : > { %5959 = vst [vmem:[#allocation26_spill] sm:$0xff] %v3800_v62 }
  0xaf   : > { %5960 = vst [vmem:[#allocation27_spill] sm:$0xff] %v3802_v63 }
  0xb0   : > { %5969 = vst [vmem:[#allocation36_spill] sm:$0xff] %v3829_v56 }
  0xb2   : > { %616 = vperm.xlu2 %3079, %v3805_v51   ;;  %611 = vperm.xlu1 %3078, %v3808_v49   ;;  %v3841_v51 = vld [vmem:[%s3520_s18 + $0x220] sm:$0xff]  ;;  %v3844_v49 = vld [vmem:[%s3520_s18 + $0x218] sm:$0xff] }
  0xb3   : > { %606 = vperm.xlu0 %3077, %v3811_v50   ;;  %5973 = vst [vmem:[#allocation40_spill] sm:$0xff] %v3841_v51  ;;  %v3847_v50 = vld [vmem:[%s3520_s18 + $0x210] sm:$0xff] }
  0xb4   : > { %v3816_v61 = vpop.permute.xlu2 %451  ;;  %v3818_v62 = vpop.permute.xlu1 %401  ;;  %5974 = vst [vmem:[#allocation41_spill] sm:$0xff] %v3844_v49 }
  0xb5   : > { %5964 = vst [vmem:[#allocation31_spill] sm:$0xff] %v3816_v61  ;;  %v3820_v63 = vpop.permute.xlu0 %396 }
  0xb6   : > { %5965 = vst [vmem:[#allocation32_spill] sm:$0xff] %v3818_v62 }
  0xb7   : > { %5966 = vst [vmem:[#allocation33_spill] sm:$0xff] %v3820_v63 }
  0xb8   : > { %5975 = vst [vmem:[#allocation42_spill] sm:$0xff] %v3847_v50 }
  0xba   : > { %631 = vperm.xlu2 %3079, %v3823_v45   ;;  %626 = vperm.xlu1 %3078, %v3826_v41   ;;  %v3859_v45 = vld [vmem:[%s3520_s18 + $0x238] sm:$0xff]  ;;  %v3862_v41 = vld [vmem:[%s3520_s18 + $0x230] sm:$0xff] }
  0xbb   : > { %621 = vperm.xlu0 %3077, %v3829_v56   ;;  %5979 = vst [vmem:[#allocation46_spill] sm:$0xff] %v3859_v45  ;;  %v3865_v56 = vld [vmem:[%s3520_s18 + $0x228] sm:$0xff] }
  0xbc   : > { %v3834_v61 = vpop.permute.xlu2 %466  ;;  %v3836_v62 = vpop.permute.xlu1 %416  ;;  %5980 = vst [vmem:[#allocation47_spill] sm:$0xff] %v3862_v41 }
  0xbd   : > { %5970 = vst [vmem:[#allocation37_spill] sm:$0xff] %v3834_v61  ;;  %v3838_v63 = vpop.permute.xlu0 %411 }
  0xbe   : > { %5971 = vst [vmem:[#allocation38_spill] sm:$0xff] %v3836_v62 }
  0xbf   : > { %5972 = vst [vmem:[#allocation39_spill] sm:$0xff] %v3838_v63 }
  0xc0   : > { %5981 = vst [vmem:[#allocation48_spill] sm:$0xff] %v3865_v56 }
  0xc2   : > { %646 = vperm.xlu2 %3079, %v3841_v51   ;;  %641 = vperm.xlu1 %3078, %v3844_v49   ;;  %v3877_v51 = vld [vmem:[%s3520_s18 + $0x250] sm:$0xff]  ;;  %v3880_v49 = vld [vmem:[%s3520_s18 + $0x248] sm:$0xff] }
  0xc3   : > { %636 = vperm.xlu0 %3077, %v3847_v50   ;;  %5985 = vst [vmem:[#allocation52_spill] sm:$0xff] %v3877_v51  ;;  %v3883_v50 = vld [vmem:[%s3520_s18 + $0x240] sm:$0xff] }
  0xc4   : > { %v3852_v61 = vpop.permute.xlu2 %481  ;;  %v3854_v62 = vpop.permute.xlu1 %431  ;;  %5986 = vst [vmem:[#allocation53_spill] sm:$0xff] %v3880_v49 }
  0xc5   : > { %5976 = vst [vmem:[#allocation43_spill] sm:$0xff] %v3852_v61  ;;  %v3856_v63 = vpop.permute.xlu0 %426 }
  0xc6   : > { %5977 = vst [vmem:[#allocation44_spill] sm:$0xff] %v3854_v62 }
  0xc7   : > { %5978 = vst [vmem:[#allocation45_spill] sm:$0xff] %v3856_v63 }
  0xc8   : > { %5987 = vst [vmem:[#allocation54_spill] sm:$0xff] %v3883_v50 }
  0xca   : > { %661 = vperm.xlu2 %3079, %v3859_v45   ;;  %656 = vperm.xlu1 %3078, %v3862_v41   ;;  %v3895_v45 = vld [vmem:[%s3520_s18 + $0x268] sm:$0xff]  ;;  %v3898_v41 = vld [vmem:[%s3520_s18 + $0x260] sm:$0xff] }
  0xcb   : > { %651 = vperm.xlu0 %3077, %v3865_v56   ;;  %5991 = vst [vmem:[#allocation58_spill] sm:$0xff] %v3895_v45  ;;  %v3901_v56 = vld [vmem:[%s3520_s18 + $0x258] sm:$0xff] }
  0xcc   : > { %v3870_v61 = vpop.permute.xlu2 %496  ;;  %v3872_v62 = vpop.permute.xlu1 %446  ;;  %5992 = vst [vmem:[#allocation59_spill] sm:$0xff] %v3898_v41 }
  0xcd   : > { %5982 = vst [vmem:[#allocation49_spill] sm:$0xff] %v3870_v61  ;;  %v3874_v63 = vpop.permute.xlu0 %441 }
  0xce   : > { %5983 = vst [vmem:[#allocation50_spill] sm:$0xff] %v3872_v62 }
  0xcf   : > { %5984 = vst [vmem:[#allocation51_spill] sm:$0xff] %v3874_v63 }
  0xd0   : > { %5993 = vst [vmem:[#allocation60_spill] sm:$0xff] %v3901_v56 }
  0xd2   : > { %676 = vperm.xlu2 %3079, %v3877_v51   ;;  %671 = vperm.xlu1 %3078, %v3880_v49   ;;  %v3913_v51 = vld [vmem:[%s3520_s18 + $0x280] sm:$0xff]  ;;  %v3916_v49 = vld [vmem:[%s3520_s18 + $0x278] sm:$0xff] }
  0xd3   : > { %666 = vperm.xlu0 %3077, %v3883_v50   ;;  %5997 = vst [vmem:[#allocation64_spill] sm:$0xff] %v3913_v51  ;;  %v3919_v50 = vld [vmem:[%s3520_s18 + $0x270] sm:$0xff] }
  0xd4   : > { %v3888_v61 = vpop.permute.xlu2 %511  ;;  %v3890_v62 = vpop.permute.xlu1 %461  ;;  %5998 = vst [vmem:[#allocation65_spill] sm:$0xff] %v3916_v49 }
  0xd5   : > { %5988 = vst [vmem:[#allocation55_spill] sm:$0xff] %v3888_v61  ;;  %v3892_v63 = vpop.permute.xlu0 %456 }
  0xd6   : > { %5989 = vst [vmem:[#allocation56_spill] sm:$0xff] %v3890_v62 }
  0xd7   : > { %5990 = vst [vmem:[#allocation57_spill] sm:$0xff] %v3892_v63 }
  0xd8   : > { %5999 = vst [vmem:[#allocation66_spill] sm:$0xff] %v3919_v50 }
  0xda   : > { %691 = vperm.xlu2 %3079, %v3895_v45   ;;  %686 = vperm.xlu1 %3078, %v3898_v41   ;;  %v3931_v45 = vld [vmem:[%s3520_s18 + $0x298] sm:$0xff]  ;;  %v3934_v41 = vld [vmem:[%s3520_s18 + $0x290] sm:$0xff] }
  0xdb   : > { %681 = vperm.xlu0 %3077, %v3901_v56   ;;  %6003 = vst [vmem:[#allocation70_spill] sm:$0xff] %v3931_v45  ;;  %v3937_v56 = vld [vmem:[%s3520_s18 + $0x288] sm:$0xff] }
  0xdc   : > { %v3906_v61 = vpop.permute.xlu2 %526  ;;  %v3908_v62 = vpop.permute.xlu1 %476  ;;  %6004 = vst [vmem:[#allocation71_spill] sm:$0xff] %v3934_v41 }
  0xdd   : > { %5994 = vst [vmem:[#allocation61_spill] sm:$0xff] %v3906_v61  ;;  %v3910_v63 = vpop.permute.xlu0 %471 }
  0xde   : > { %5995 = vst [vmem:[#allocation62_spill] sm:$0xff] %v3908_v62 }
  0xdf   : > { %5996 = vst [vmem:[#allocation63_spill] sm:$0xff] %v3910_v63 }
  0xe0   : > { %6005 = vst [vmem:[#allocation72_spill] sm:$0xff] %v3937_v56 }
  0xe2   : > { %706 = vperm.xlu2 %3079, %v3913_v51   ;;  %701 = vperm.xlu1 %3078, %v3916_v49   ;;  %v3949_v51 = vld [vmem:[%s3520_s18 + $0x2b0] sm:$0xff]  ;;  %v3952_v49 = vld [vmem:[%s3520_s18 + $0x2a8] sm:$0xff] }
  0xe3   : > { %696 = vperm.xlu0 %3077, %v3919_v50   ;;  %6009 = vst [vmem:[#allocation76_spill] sm:$0xff] %v3949_v51  ;;  %v3955_v50 = vld [vmem:[%s3520_s18 + $0x2a0] sm:$0xff] }
  0xe4   : > { %v3924_v61 = vpop.permute.xlu2 %541  ;;  %v3926_v62 = vpop.permute.xlu1 %491  ;;  %6010 = vst [vmem:[#allocation77_spill] sm:$0xff] %v3952_v49 }
  0xe5   : > { %6000 = vst [vmem:[#allocation67_spill] sm:$0xff] %v3924_v61  ;;  %v3928_v63 = vpop.permute.xlu0 %486 }
  0xe6   : > { %6001 = vst [vmem:[#allocation68_spill] sm:$0xff] %v3926_v62 }
  0xe7   : > { %6002 = vst [vmem:[#allocation69_spill] sm:$0xff] %v3928_v63 }
  0xe8   : > { %6011 = vst [vmem:[#allocation78_spill] sm:$0xff] %v3955_v50 }
  0xea   : > { %721 = vperm.xlu2 %3079, %v3931_v45   ;;  %716 = vperm.xlu1 %3078, %v3934_v41   ;;  %v3967_v45 = vld [vmem:[%s3520_s18 + $0x2c8] sm:$0xff]  ;;  %v3970_v41 = vld [vmem:[%s3520_s18 + $0x2c0] sm:$0xff] }
  0xeb   : > { %711 = vperm.xlu0 %3077, %v3937_v56   ;;  %6015 = vst [vmem:[#allocation82_spill] sm:$0xff] %v3967_v45  ;;  %v3973_v56 = vld [vmem:[%s3520_s18 + $0x2b8] sm:$0xff] }
  0xec   : > { %v3942_v61 = vpop.permute.xlu2 %556  ;;  %v3944_v62 = vpop.permute.xlu1 %506  ;;  %6016 = vst [vmem:[#allocation83_spill] sm:$0xff] %v3970_v41 }
  0xed   : > { %6006 = vst [vmem:[#allocation73_spill] sm:$0xff] %v3942_v61  ;;  %v3946_v63 = vpop.permute.xlu0 %501 }
  0xee   : > { %6007 = vst [vmem:[#allocation74_spill] sm:$0xff] %v3944_v62 }
  0xef   : > { %6008 = vst [vmem:[#allocation75_spill] sm:$0xff] %v3946_v63 }
  0xf0   : > { %6017 = vst [vmem:[#allocation84_spill] sm:$0xff] %v3973_v56 }
  0xf2   : > { %736 = vperm.xlu2 %3079, %v3949_v51   ;;  %731 = vperm.xlu1 %3078, %v3952_v49   ;;  %v3985_v51 = vld [vmem:[%s3520_s18 + $0x2e0] sm:$0xff]  ;;  %v3988_v49 = vld [vmem:[%s3520_s18 + $0x2d8] sm:$0xff] }
  0xf3   : > { %726 = vperm.xlu0 %3077, %v3955_v50   ;;  %6021 = vst [vmem:[#allocation88_spill] sm:$0xff] %v3985_v51  ;;  %v3991_v50 = vld [vmem:[%s3520_s18 + $0x2d0] sm:$0xff] }
  0xf4   : > { %v3960_v61 = vpop.permute.xlu2 %571  ;;  %v3962_v62 = vpop.permute.xlu1 %521  ;;  %6022 = vst [vmem:[#allocation89_spill] sm:$0xff] %v3988_v49 }
  0xf5   : > { %6012 = vst [vmem:[#allocation79_spill] sm:$0xff] %v3960_v61  ;;  %v3964_v63 = vpop.permute.xlu0 %516 }
  0xf6   : > { %6013 = vst [vmem:[#allocation80_spill] sm:$0xff] %v3962_v62 }
  0xf7   : > { %6014 = vst [vmem:[#allocation81_spill] sm:$0xff] %v3964_v63 }
  0xf8   : > { %6023 = vst [vmem:[#allocation90_spill] sm:$0xff] %v3991_v50 }
  0xfa   : > { %751 = vperm.xlu2 %3079, %v3967_v45   ;;  %746 = vperm.xlu1 %3078, %v3970_v41   ;;  %v4003_v45 = vld [vmem:[%s3520_s18 + $0x2f8] sm:$0xff]  ;;  %v4006_v41 = vld [vmem:[%s3520_s18 + $0x2f0] sm:$0xff] }
  0xfb   : > { %741 = vperm.xlu0 %3077, %v3973_v56   ;;  %6027 = vst [vmem:[#allocation94_spill] sm:$0xff] %v4003_v45  ;;  %v4009_v56 = vld [vmem:[%s3520_s18 + $0x2e8] sm:$0xff] }
  0xfc   : > { %v3978_v61 = vpop.permute.xlu2 %586  ;;  %v3980_v62 = vpop.permute.xlu1 %536  ;;  %6028 = vst [vmem:[#allocation95_spill] sm:$0xff] %v4006_v41 }
  0xfd   : > { %6018 = vst [vmem:[#allocation85_spill] sm:$0xff] %v3978_v61  ;;  %v3982_v63 = vpop.permute.xlu0 %531 }
  0xfe   : > { %6019 = vst [vmem:[#allocation86_spill] sm:$0xff] %v3980_v62 }
  0xff   : > { %6020 = vst [vmem:[#allocation87_spill] sm:$0xff] %v3982_v63 }
 0x100   : > { %6029 = vst [vmem:[#allocation96_spill] sm:$0xff] %v4009_v56 }
 0x102   : > { %766 = vperm.xlu2 %3079, %v3985_v51   ;;  %761 = vperm.xlu1 %3078, %v3988_v49   ;;  %v4021_v51 = vld [vmem:[%s3520_s18 + $0x310] sm:$0xff]  ;;  %v4024_v49 = vld [vmem:[%s3520_s18 + $0x308] sm:$0xff] }
 0x103   : > { %756 = vperm.xlu0 %3077, %v3991_v50   ;;  %6033 = vst [vmem:[#allocation100_spill] sm:$0xff] %v4021_v51  ;;  %v4027_v50 = vld [vmem:[%s3520_s18 + $0x300] sm:$0xff] }
 0x104   : > { %v3996_v61 = vpop.permute.xlu2 %601  ;;  %v3998_v62 = vpop.permute.xlu1 %551  ;;  %6034 = vst [vmem:[#allocation101_spill] sm:$0xff] %v4024_v49 }
 0x105   : > { %6024 = vst [vmem:[#allocation91_spill] sm:$0xff] %v3996_v61  ;;  %v4000_v63 = vpop.permute.xlu0 %546 }
 0x106   : > { %6025 = vst [vmem:[#allocation92_spill] sm:$0xff] %v3998_v62 }
 0x107   : > { %6026 = vst [vmem:[#allocation93_spill] sm:$0xff] %v4000_v63 }
 0x108   : > { %6035 = vst [vmem:[#allocation102_spill] sm:$0xff] %v4027_v50 }
 0x10a   : > { %781 = vperm.xlu2 %3079, %v4003_v45   ;;  %776 = vperm.xlu1 %3078, %v4006_v41   ;;  %v4039_v45 = vld [vmem:[%s3520_s18 + $0x328] sm:$0xff]  ;;  %v4042_v41 = vld [vmem:[%s3520_s18 + $0x320] sm:$0xff] }
 0x10b   : > { %771 = vperm.xlu0 %3077, %v4009_v56   ;;  %6039 = vst [vmem:[#allocation106_spill] sm:$0xff] %v4039_v45  ;;  %v4045_v56 = vld [vmem:[%s3520_s18 + $0x318] sm:$0xff] }
 0x10c   : > { %v4014_v61 = vpop.permute.xlu2 %616  ;;  %v4016_v62 = vpop.permute.xlu1 %566  ;;  %6040 = vst [vmem:[#allocation107_spill] sm:$0xff] %v4042_v41 }
 0x10d   : > { %6030 = vst [vmem:[#allocation97_spill] sm:$0xff] %v4014_v61  ;;  %v4018_v63 = vpop.permute.xlu0 %561 }
 0x10e   : > { %6031 = vst [vmem:[#allocation98_spill] sm:$0xff] %v4016_v62 }
 0x10f   : > { %6032 = vst [vmem:[#allocation99_spill] sm:$0xff] %v4018_v63 }
 0x110   : > { %6041 = vst [vmem:[#allocation108_spill] sm:$0xff] %v4045_v56 }
 0x112   : > { %796 = vperm.xlu2 %3079, %v4021_v51   ;;  %791 = vperm.xlu1 %3078, %v4024_v49   ;;  %v4057_v51 = vld [vmem:[%s3520_s18 + $0x340] sm:$0xff]  ;;  %v4060_v49 = vld [vmem:[%s3520_s18 + $0x338] sm:$0xff] }
 0x113   : > { %786 = vperm.xlu0 %3077, %v4027_v50   ;;  %6045 = vst [vmem:[#allocation112_spill] sm:$0xff] %v4057_v51  ;;  %v4063_v50 = vld [vmem:[%s3520_s18 + $0x330] sm:$0xff] }
 0x114   : > { %v4032_v61 = vpop.permute.xlu2 %631  ;;  %v4034_v62 = vpop.permute.xlu1 %581  ;;  %6046 = vst [vmem:[#allocation113_spill] sm:$0xff] %v4060_v49 }
 0x115   : > { %6036 = vst [vmem:[#allocation103_spill] sm:$0xff] %v4032_v61  ;;  %v4036_v63 = vpop.permute.xlu0 %576 }
 0x116   : > { %6037 = vst [vmem:[#allocation104_spill] sm:$0xff] %v4034_v62 }
 0x117   : > { %6038 = vst [vmem:[#allocation105_spill] sm:$0xff] %v4036_v63 }
 0x118   : > { %6047 = vst [vmem:[#allocation114_spill] sm:$0xff] %v4063_v50 }
 0x11a   : > { %811 = vperm.xlu2 %3079, %v4039_v45   ;;  %806 = vperm.xlu1 %3078, %v4042_v41   ;;  %v4075_v45 = vld [vmem:[%s3520_s18 + $0x358] sm:$0xff]  ;;  %v4078_v41 = vld [vmem:[%s3520_s18 + $0x350] sm:$0xff] }
 0x11b   : > { %801 = vperm.xlu0 %3077, %v4045_v56   ;;  %6051 = vst [vmem:[#allocation118_spill] sm:$0xff] %v4075_v45  ;;  %v4081_v56 = vld [vmem:[%s3520_s18 + $0x348] sm:$0xff] }
 0x11c   : > { %v4050_v61 = vpop.permute.xlu2 %646  ;;  %v4052_v62 = vpop.permute.xlu1 %596  ;;  %6052 = vst [vmem:[#allocation119_spill] sm:$0xff] %v4078_v41 }
 0x11d   : > { %6042 = vst [vmem:[#allocation109_spill] sm:$0xff] %v4050_v61  ;;  %v4054_v63 = vpop.permute.xlu0 %591 }
 0x11e   : > { %6043 = vst [vmem:[#allocation110_spill] sm:$0xff] %v4052_v62 }
 0x11f   : > { %6044 = vst [vmem:[#allocation111_spill] sm:$0xff] %v4054_v63 }
 0x120   : > { %6053 = vst [vmem:[#allocation120_spill] sm:$0xff] %v4081_v56 }
 0x122   : > { %826 = vperm.xlu2 %3079, %v4057_v51   ;;  %821 = vperm.xlu1 %3078, %v4060_v49   ;;  %v4093_v51 = vld [vmem:[%s3520_s18 + $0x370] sm:$0xff]  ;;  %v4096_v49 = vld [vmem:[%s3520_s18 + $0x368] sm:$0xff] }
 0x123   : > { %816 = vperm.xlu0 %3077, %v4063_v50   ;;  %6057 = vst [vmem:[#allocation124_spill] sm:$0xff] %v4093_v51  ;;  %v4099_v50 = vld [vmem:[%s3520_s18 + $0x360] sm:$0xff] }
 0x124   : > { %v4068_v61 = vpop.permute.xlu2 %661  ;;  %v4070_v62 = vpop.permute.xlu1 %611  ;;  %6058 = vst [vmem:[#allocation125_spill] sm:$0xff] %v4096_v49 }
 0x125   : > { %6048 = vst [vmem:[#allocation115_spill] sm:$0xff] %v4068_v61  ;;  %v4072_v63 = vpop.permute.xlu0 %606 }
 0x126   : > { %6049 = vst [vmem:[#allocation116_spill] sm:$0xff] %v4070_v62 }
 0x127   : > { %6050 = vst [vmem:[#allocation117_spill] sm:$0xff] %v4072_v63 }
 0x128   : > { %6059 = vst [vmem:[#allocation126_spill] sm:$0xff] %v4099_v50 }
 0x12a   : > { %841 = vperm.xlu2 %3079, %v4075_v45   ;;  %836 = vperm.xlu1 %3078, %v4078_v41   ;;  %v4111_v45 = vld [vmem:[%s3520_s18 + $0x388] sm:$0xff]  ;;  %v4114_v41 = vld [vmem:[%s3520_s18 + $0x380] sm:$0xff] }
 0x12b   : > { %831 = vperm.xlu0 %3077, %v4081_v56   ;;  %6063 = vst [vmem:[#allocation130_spill] sm:$0xff] %v4111_v45  ;;  %v4117_v56 = vld [vmem:[%s3520_s18 + $0x378] sm:$0xff] }
 0x12c   : > { %v4086_v61 = vpop.permute.xlu2 %676  ;;  %v4088_v62 = vpop.permute.xlu1 %626  ;;  %6064 = vst [vmem:[#allocation131_spill] sm:$0xff] %v4114_v41 }
 0x12d   : > { %6054 = vst [vmem:[#allocation121_spill] sm:$0xff] %v4086_v61  ;;  %v4090_v63 = vpop.permute.xlu0 %621 }
 0x12e   : > { %6055 = vst [vmem:[#allocation122_spill] sm:$0xff] %v4088_v62 }
 0x12f   : > { %6056 = vst [vmem:[#allocation123_spill] sm:$0xff] %v4090_v63 }
 0x130   : > { %6065 = vst [vmem:[#allocation132_spill] sm:$0xff] %v4117_v56 }
 0x132   : > { %856 = vperm.xlu2 %3079, %v4093_v51   ;;  %851 = vperm.xlu1 %3078, %v4096_v49   ;;  %v4129_v51 = vld [vmem:[%s3520_s18 + $0x3a0] sm:$0xff]  ;;  %v4132_v49 = vld [vmem:[%s3520_s18 + $0x398] sm:$0xff] }
 0x133   : > { %846 = vperm.xlu0 %3077, %v4099_v50   ;;  %6069 = vst [vmem:[#allocation136_spill] sm:$0xff] %v4129_v51  ;;  %v4135_v50 = vld [vmem:[%s3520_s18 + $0x390] sm:$0xff] }
 0x134   : > { %v4104_v61 = vpop.permute.xlu2 %691  ;;  %v4106_v62 = vpop.permute.xlu1 %641  ;;  %6070 = vst [vmem:[#allocation137_spill] sm:$0xff] %v4132_v49 }
 0x135   : > { %6060 = vst [vmem:[#allocation127_spill] sm:$0xff] %v4104_v61  ;;  %v4108_v63 = vpop.permute.xlu0 %636 }
 0x136   : > { %6061 = vst [vmem:[#allocation128_spill] sm:$0xff] %v4106_v62 }
 0x137   : > { %6062 = vst [vmem:[#allocation129_spill] sm:$0xff] %v4108_v63 }
 0x138   : > { %6071 = vst [vmem:[#allocation138_spill] sm:$0xff] %v4135_v50 }
 0x13a   : > { %871 = vperm.xlu2 %3079, %v4111_v45   ;;  %866 = vperm.xlu1 %3078, %v4114_v41   ;;  %v4147_v45 = vld [vmem:[%s3520_s18 + $0x3b8] sm:$0xff]  ;;  %v4150_v41 = vld [vmem:[%s3520_s18 + $0x3b0] sm:$0xff] }
 0x13b   : > { %861 = vperm.xlu0 %3077, %v4117_v56   ;;  %6075 = vst [vmem:[#allocation142_spill] sm:$0xff] %v4147_v45  ;;  %v4153_v56 = vld [vmem:[%s3520_s18 + $0x3a8] sm:$0xff] }
 0x13c   : > { %v4122_v61 = vpop.permute.xlu2 %706  ;;  %v4124_v62 = vpop.permute.xlu1 %656  ;;  %6076 = vst [vmem:[#allocation143_spill] sm:$0xff] %v4150_v41 }
 0x13d   : > { %6066 = vst [vmem:[#allocation133_spill] sm:$0xff] %v4122_v61  ;;  %v4126_v63 = vpop.permute.xlu0 %651 }
 0x13e   : > { %6067 = vst [vmem:[#allocation134_spill] sm:$0xff] %v4124_v62 }
 0x13f   : > { %6068 = vst [vmem:[#allocation135_spill] sm:$0xff] %v4126_v63 }
 0x140   : > { %6077 = vst [vmem:[#allocation144_spill] sm:$0xff] %v4153_v56 }
 0x142   : > { %886 = vperm.xlu2 %3079, %v4129_v51   ;;  %881 = vperm.xlu1 %3078, %v4132_v49   ;;  %v4165_v51 = vld [vmem:[%s3520_s18 + $0x3d0] sm:$0xff]  ;;  %v4168_v49 = vld [vmem:[%s3520_s18 + $0x3c8] sm:$0xff] }
 0x143   : > { %876 = vperm.xlu0 %3077, %v4135_v50   ;;  %6081 = vst [vmem:[#allocation148_spill] sm:$0xff] %v4165_v51  ;;  %v4171_v50 = vld [vmem:[%s3520_s18 + $0x3c0] sm:$0xff] }
 0x144   : > { %v4140_v61 = vpop.permute.xlu2 %721  ;;  %v4142_v62 = vpop.permute.xlu1 %671  ;;  %6082 = vst [vmem:[#allocation149_spill] sm:$0xff] %v4168_v49 }
 0x145   : > { %6072 = vst [vmem:[#allocation139_spill] sm:$0xff] %v4140_v61  ;;  %v4144_v63 = vpop.permute.xlu0 %666 }
 0x146   : > { %6073 = vst [vmem:[#allocation140_spill] sm:$0xff] %v4142_v62 }
 0x147   : > { %6074 = vst [vmem:[#allocation141_spill] sm:$0xff] %v4144_v63 }
 0x148   : > { %6083 = vst [vmem:[#allocation150_spill] sm:$0xff] %v4171_v50 }
 0x14a   : > { %901 = vperm.xlu2 %3079, %v4147_v45   ;;  %896 = vperm.xlu1 %3078, %v4150_v41   ;;  %v4186_v41 = vld [vmem:[%s3520_s18 + $0x3e0] sm:$0xff] }
 0x14b   : > { %891 = vperm.xlu0 %3077, %v4153_v56   ;;  %6088 = vst [vmem:[#allocation155_spill] sm:$0xff] %v4186_v41  ;;  %v4189_v56 = vld [vmem:[%s3520_s18 + $0x3d8] sm:$0xff] }
 0x14c   : > { %v4158_v61 = vpop.permute.xlu2 %736  ;;  %v4160_v62 = vpop.permute.xlu1 %686 }
 0x14d   : > { %6078 = vst [vmem:[#allocation145_spill] sm:$0xff] %v4158_v61  ;;  %v4162_v63 = vpop.permute.xlu0 %681 }
 0x14e   : > { %6079 = vst [vmem:[#allocation146_spill] sm:$0xff] %v4160_v62 }
 0x14f   : > { %6080 = vst [vmem:[#allocation147_spill] sm:$0xff] %v4162_v63  ;;  %v4183_v63 = vld [vmem:[%s3520_s18 + $0x3e8] sm:$0xff] }
 0x150   : > { %6087 = vst [vmem:[#allocation154_spill] sm:$0xff] %v4183_v63 }
 0x152   : > { %916 = vperm.xlu2 %3079, %v4165_v51   ;;  %911 = vperm.xlu1 %3078, %v4168_v49  }
 0x153   : > { %906 = vperm.xlu0 %3077, %v4171_v50   ;;  %v3482_v50 = vmov 1  }
 0x154   : > { %v4176_v45 = vpop.permute.xlu2 %751  ;;  %v4178_v61 = vpop.permute.xlu1 %701 }
 0x155   : > { %6084 = vst [vmem:[#allocation151_spill] sm:$0xff] %v4176_v45  ;;  %v4180_v62 = vpop.permute.xlu0 %696 }
 0x156   : > { %6085 = vst [vmem:[#allocation152_spill] sm:$0xff] %v4178_v61  ;;  %v4201_v61 = vld [vmem:[%s3520_s18 + $0x3f8] sm:$0xff] }
 0x157   : > { %6086 = vst [vmem:[#allocation153_spill] sm:$0xff] %v4180_v62  ;;  %v4204_v62 = vld [vmem:[%s3520_s18 + $0x3f0] sm:$0xff] }
 0x158   : > { %6092 = vst [vmem:[#allocation159_spill] sm:$0xff] %v4201_v61 }
 0x15a   : > { %931 = vperm.xlu2 %3079, %v4183_v63   ;;  %926 = vperm.xlu1 %3078, %v4186_v41  }
 0x15b   : > { %921 = vperm.xlu0 %3077, %v4189_v56  }
 0x15c   : > { %v4194_v51 = vpop.permute.xlu2 %766  ;;  %v4196_v49 = vpop.permute.xlu1 %716 }
 0x15d   : > { %6089 = vst [vmem:[#allocation156_spill] sm:$0xff] %v4194_v51  ;;  %v4198_v45 = vpop.permute.xlu0 %711 }
 0x15e   : > { %6090 = vst [vmem:[#allocation157_spill] sm:$0xff] %v4196_v49 }
 0x15f   : > { %6091 = vst [vmem:[#allocation158_spill] sm:$0xff] %v4198_v45 }
 0x162   : > { %3080 = vset.pattern.permute.xlu2 %v3482_v50  ;;  %941 = vperm.xlu1 %3078, %v4201_v61  }
 0x163   : > { %936 = vperm.xlu0 %3077, %v4204_v62   ;;  %1205 = vperm.xlu2 %3080, %v3529_v3  }
 0x164   : > { %v4209_v63 = vpop.permute.xlu2 %781  ;;  %v4211_v41 = vpop.permute.xlu1 %731 }
 0x165   : > { %6093 = vst [vmem:[#allocation160_spill] sm:$0xff] %v4209_v63  ;;  %v4213_v51 = vpop.permute.xlu0 %726 }
 0x166   : > { %6094 = vst [vmem:[#allocation161_spill] sm:$0xff] %v4211_v41 }
 0x167   : > { %6095 = vst [vmem:[#allocation162_spill] sm:$0xff] %v4213_v51 }
 0x16a   : > { %3082 = vset.pattern.permute.xlu1 %v3482_v50 }
 0x16b   : > { %3081 = vset.pattern.permute.xlu0 %v3482_v50  ;;  %1213 = vperm.xlu1 %3082, %v3526_v2  }
 0x16c   : > { %1217 = vperm.xlu2 %3080, %v3538_v5   ;;  %1209 = vperm.xlu0 %3081, %v3541_v6   ;;  %v4218_v49 = vpop.permute.xlu2 %796  ;;  %v4220_v45 = vpop.permute.xlu1 %746 }
 0x16d   : > { %6096 = vst [vmem:[#allocation163_spill] sm:$0xff] %v4218_v49  ;;  %v4222_v61 = vpop.permute.xlu0 %741 }
 0x16e   : > { %6097 = vst [vmem:[#allocation164_spill] sm:$0xff] %v4220_v45 }
 0x16f   : > { %6098 = vst [vmem:[#allocation165_spill] sm:$0xff] %v4222_v61  ;;  %v6184_v61 = vld [vmem:[#allocation102_spill] sm:$0xff] }
 0x173   : > { %1221 = vperm.xlu1 %3082, %v3523_v1  }
 0x174   : > { %1225 = vperm.xlu2 %3080, %v3535_v4   ;;  %1229 = vperm.xlu0 %3081, %v3553_v9   ;;  %v4227_v3 = vpop.permute.xlu2 %811  ;;  %v4229_v50 = vpop.permute.xlu1 %761 }
 0x175   : > { %6099 = vst [vmem:[#allocation166_spill] sm:$0xff] %v4227_v3  ;;  %v4231_v2 = vpop.permute.xlu0 %756 }
 0x176   : > { %6100 = vst [vmem:[#allocation167_spill] sm:$0xff] %v4229_v50 }
 0x177   : > { %6101 = vst [vmem:[#allocation168_spill] sm:$0xff] %v4231_v2  ;;  %v6178_v2 = vld [vmem:[#allocation96_spill] sm:$0xff] }
 0x17b   : > { %1233 = vperm.xlu1 %3082, %v3550_v8  }
 0x17c   : > { %1237 = vperm.xlu2 %3080, %v3547_v7   ;;  %1241 = vperm.xlu0 %3081, %v3565_v12   ;;  %v4236_v5 = vpop.permute.xlu2 %826  ;;  %v4238_v6 = vpop.permute.xlu1 %776 }
 0x17d   : > { %6102 = vst [vmem:[#allocation169_spill] sm:$0xff] %v4236_v5  ;;  %v4240_v1 = vpop.permute.xlu0 %771 }
 0x17e   : > { %6103 = vst [vmem:[#allocation170_spill] sm:$0xff] %v4238_v6 }
 0x17f   : > { %6104 = vst [vmem:[#allocation171_spill] sm:$0xff] %v4240_v1  ;;  %v6172_v1 = vld [vmem:[#allocation90_spill] sm:$0xff] }
 0x183   : > { %1245 = vperm.xlu1 %3082, %v3562_v11  }
 0x184   : > { %1249 = vperm.xlu2 %3080, %v3559_v10   ;;  %1253 = vperm.xlu0 %3081, %v3577_v15   ;;  %v4245_v4 = vpop.permute.xlu2 %841  ;;  %v4247_v9 = vpop.permute.xlu1 %791 }
 0x185   : > { %6105 = vst [vmem:[#allocation172_spill] sm:$0xff] %v4245_v4  ;;  %v4249_v8 = vpop.permute.xlu0 %786 }
 0x186   : > { %6106 = vst [vmem:[#allocation173_spill] sm:$0xff] %v4247_v9 }
 0x187   : > { %6107 = vst [vmem:[#allocation174_spill] sm:$0xff] %v4249_v8  ;;  %v6166_v8 = vld [vmem:[#allocation84_spill] sm:$0xff] }
 0x18b   : > { %1257 = vperm.xlu1 %3082, %v3574_v14  }
 0x18c   : > { %1261 = vperm.xlu2 %3080, %v3571_v13   ;;  %1265 = vperm.xlu0 %3081, %v3589_v18   ;;  %v4254_v7 = vpop.permute.xlu2 %856  ;;  %v4256_v12 = vpop.permute.xlu1 %806 }
 0x18d   : > { %6108 = vst [vmem:[#allocation175_spill] sm:$0xff] %v4254_v7  ;;  %v4258_v11 = vpop.permute.xlu0 %801 }
 0x18e   : > { %6109 = vst [vmem:[#allocation176_spill] sm:$0xff] %v4256_v12 }
 0x18f   : > { %6110 = vst [vmem:[#allocation177_spill] sm:$0xff] %v4258_v11  ;;  %v6163_v11 = vld [vmem:[#allocation78_spill] sm:$0xff] }
 0x193   : > { %1269 = vperm.xlu1 %3082, %v3586_v17  }
 0x194   : > { %1273 = vperm.xlu2 %3080, %v3583_v16   ;;  %1277 = vperm.xlu0 %3081, %v3601_v21   ;;  %v4263_v10 = vpop.permute.xlu2 %871  ;;  %v4265_v15 = vpop.permute.xlu1 %821 }
 0x195   : > { %6111 = vst [vmem:[#allocation178_spill] sm:$0xff] %v4263_v10  ;;  %v4267_v14 = vpop.permute.xlu0 %816 }
 0x196   : > { %6112 = vst [vmem:[#allocation179_spill] sm:$0xff] %v4265_v15 }
 0x197   : > { %6113 = vst [vmem:[#allocation180_spill] sm:$0xff] %v4267_v14  ;;  %v6160_v14 = vld [vmem:[#allocation72_spill] sm:$0xff] }
 0x19b   : > { %1281 = vperm.xlu1 %3082, %v3598_v20  }
 0x19c   : > { %1285 = vperm.xlu2 %3080, %v3595_v19   ;;  %1289 = vperm.xlu0 %3081, %v3613_v24   ;;  %v4272_v13 = vpop.permute.xlu2 %886  ;;  %v4274_v18 = vpop.permute.xlu1 %836 }
 0x19d   : > { %6114 = vst [vmem:[#allocation181_spill] sm:$0xff] %v4272_v13  ;;  %v4276_v17 = vpop.permute.xlu0 %831 }
 0x19e   : > { %6115 = vst [vmem:[#allocation182_spill] sm:$0xff] %v4274_v18 }
 0x19f   : > { %6116 = vst [vmem:[#allocation183_spill] sm:$0xff] %v4276_v17  ;;  %v6157_v17 = vld [vmem:[#allocation66_spill] sm:$0xff] }
 0x1a3   : > { %1293 = vperm.xlu1 %3082, %v3610_v23  }
 0x1a4   : > { %1297 = vperm.xlu2 %3080, %v3607_v22   ;;  %1301 = vperm.xlu0 %3081, %v3625_v27   ;;  %v4281_v16 = vpop.permute.xlu2 %901  ;;  %v4283_v21 = vpop.permute.xlu1 %851 }
 0x1a5   : > { %6117 = vst [vmem:[#allocation184_spill] sm:$0xff] %v4281_v16  ;;  %v4285_v20 = vpop.permute.xlu0 %846 }
 0x1a6   : > { %6118 = vst [vmem:[#allocation185_spill] sm:$0xff] %v4283_v21 }
 0x1a7   : > { %6119 = vst [vmem:[#allocation186_spill] sm:$0xff] %v4285_v20  ;;  %v6154_v20 = vld [vmem:[#allocation60_spill] sm:$0xff] }
 0x1ab   : > { %1305 = vperm.xlu1 %3082, %v3622_v26  }
 0x1ac   : > { %1309 = vperm.xlu2 %3080, %v3619_v25   ;;  %1313 = vperm.xlu0 %3081, %v3637_v30   ;;  %v4290_v19 = vpop.permute.xlu2 %916  ;;  %v4292_v24 = vpop.permute.xlu1 %866 }
 0x1ad   : > { %6120 = vst [vmem:[#allocation187_spill] sm:$0xff] %v4290_v19  ;;  %v4294_v23 = vpop.permute.xlu0 %861 }
 0x1ae   : > { %6121 = vst [vmem:[#allocation188_spill] sm:$0xff] %v4292_v24 }
 0x1af   : > { %6122 = vst [vmem:[#allocation189_spill] sm:$0xff] %v4294_v23  ;;  %v6151_v23 = vld [vmem:[#allocation54_spill] sm:$0xff] }
 0x1b3   : > { %1317 = vperm.xlu1 %3082, %v3634_v29  }
 0x1b4   : > { %1321 = vperm.xlu2 %3080, %v3631_v28   ;;  %1325 = vperm.xlu0 %3081, %v3649_v33   ;;  %v4299_v22 = vpop.permute.xlu2 %931  ;;  %v4301_v27 = vpop.permute.xlu1 %881 }
 0x1b5   : > { %6123 = vst [vmem:[#allocation190_spill] sm:$0xff] %v4299_v22  ;;  %v4303_v26 = vpop.permute.xlu0 %876 }
 0x1b6   : > { %6124 = vst [vmem:[#allocation191_spill] sm:$0xff] %v4301_v27 }
 0x1b7   : > { %6125 = vst [vmem:[#allocation192_spill] sm:$0xff] %v4303_v26  ;;  %v6148_v26 = vld [vmem:[#allocation48_spill] sm:$0xff] }
 0x1bb   : > { %1329 = vperm.xlu1 %3082, %v3646_v32  }
 0x1bc   : > { %1333 = vperm.xlu2 %3080, %v3643_v31   ;;  %1337 = vperm.xlu0 %3081, %v3661_v36   ;;  %v4308_v25 = vpop.permute.xlu1 %896 }
 0x1bd   : > { %6126 = vst [vmem:[#allocation193_spill] sm:$0xff] %v4308_v25  ;;  %v4310_v30 = vpop.permute.xlu0 %891  ;;  %v4312_v29 = vpop.permute.xlu2 %1205 }
 0x1be   : > { %6127 = vst [vmem:[#allocation194_spill] sm:$0xff] %v4310_v30  ;;  %v6145_v30 = vld [vmem:[#allocation42_spill] sm:$0xff] }
 0x1c3   : > { %1341 = vperm.xlu1 %3082, %v3658_v35  }
 0x1c4   : > { %1345 = vperm.xlu2 %3080, %v3655_v34   ;;  %1349 = vperm.xlu0 %3081, %v3675_v40   ;;  %v4317_v28 = vpop.permute.xlu1 %911 }
 0x1c5   : > { %6128 = vst [vmem:[#allocation195_spill] sm:$0xff] %v4317_v28  ;;  %v4319_v33 = vpop.permute.xlu0 %906  ;;  %v6139_v28 = vld [vmem:[#allocation30_spill] sm:$0xff] }
 0x1c6   : > { %6129 = vst [vmem:[#allocation196_spill] sm:$0xff] %v4319_v33  ;;  %v4321_v32 = vpop.permute.xlu2 %1217  ;;  %v6142_v33 = vld [vmem:[#allocation36_spill] sm:$0xff] }
 0x1cb   : > { %1353 = vperm.xlu1 %3082, %v3672_v39  }
 0x1cc   : > { %1357 = vperm.xlu2 %3080, %v3669_v38   ;;  %1361 = vperm.xlu0 %3081, %v3689_v44   ;;  %v4326_v31 = vpop.permute.xlu1 %926 }
 0x1cd   : > { %6130 = vst [vmem:[#allocation197_spill] sm:$0xff] %v4326_v31  ;;  %v4328_v36 = vpop.permute.xlu0 %921 }
 0x1ce   : > { %6131 = vst [vmem:[#allocation198_spill] sm:$0xff] %v4328_v36  ;;  %v4330_v35 = vpop.permute.xlu2 %1225 }
 0x1d3   : > { %1365 = vperm.xlu1 %3082, %v3686_v43  }
 0x1d4   : > { %1369 = vperm.xlu2 %3080, %v3683_v42   ;;  %1373 = vperm.xlu0 %3081, %v3703_v48   ;;  %v4335_v34 = vpop.permute.xlu1 %941 }
 0x1d5   : > { %6132 = vst [vmem:[#allocation199_spill] sm:$0xff] %v4335_v34  ;;  %v4337_v40 = vpop.permute.xlu0 %936  ;;  %v6136_v34 = vld [vmem:[#allocation24_spill] sm:$0xff] }
 0x1d6   : > { %6133 = vst [vmem:[#allocation200_spill] sm:$0xff] %v4337_v40  ;;  %v4339_v39 = vpop.permute.xlu2 %1237 }
 0x1db   : > { %1377 = vperm.xlu1 %3082, %v3700_v47  }
 0x1dc   : > { %1381 = vperm.xlu2 %3080, %v3697_v46   ;;  %1385 = vperm.xlu0 %3081, %v3721_v54  }
 0x1dd   : > { %v4344_v38 = vpop.permute.xlu1 %1213 }
 0x1de   : > { %v4346_v44 = vpop.permute.xlu2 %1249  ;;  %v4348_v43 = vpop.permute.xlu0 %1209 }
 0x1e3   : > { %1389 = vperm.xlu1 %3082, %v3718_v53  }
 0x1e4   : > { %1393 = vperm.xlu2 %3080, %v3715_v52   ;;  %1397 = vperm.xlu0 %3081, %v3739_v60  }
 0x1e5   : > { %v4353_v42 = vpop.permute.xlu1 %1221 }
 0x1e6   : > { %v4355_v48 = vpop.permute.xlu2 %1261  ;;  %v4357_v47 = vpop.permute.xlu0 %1229 }
 0x1eb   : > { %1401 = vperm.xlu1 %3082, %v3736_v59  }
 0x1ec   : > { %1405 = vperm.xlu2 %3080, %v3733_v58   ;;  %1409 = vperm.xlu0 %3081, %v3757_v37   ;;  %v6134_v58 = vld [vmem:[#allocation18_spill] sm:$0xff]  ;;  %v6135_v37 = vld [vmem:[#allocation17_spill] sm:$0xff] }
 0x1ed   : > { %v4362_v46 = vpop.permute.xlu1 %1233 }
 0x1ee   : > { %v4364_v54 = vpop.permute.xlu2 %1273  ;;  %v4366_v53 = vpop.permute.xlu0 %1241 }
 0x1f3   : > { %1413 = vperm.xlu1 %3082, %v3754_v55  }
 0x1f4   : > { %1417 = vperm.xlu2 %3080, %v3751_v0   ;;  %1421 = vperm.xlu0 %3081, %v3775_v57   ;;  %v6137_v0 = vld [vmem:[#allocation23_spill] sm:$0xff]  ;;  %v6138_v57 = vld [vmem:[#allocation22_spill] sm:$0xff] }
 0x1f5   : > { %v4371_v52 = vpop.permute.xlu1 %1245 }
 0x1f6   : > { %v4373_v60 = vpop.permute.xlu2 %1285  ;;  %v4375_v59 = vpop.permute.xlu0 %1253 }
 0x1fb   : > { %1425 = vperm.xlu1 %3082, %v6134_v58  }
 0x1fc   : > { %1429 = vperm.xlu2 %3080, %v6135_v37   ;;  %1433 = vperm.xlu0 %3081, %v6136_v34   ;;  %v6140_v37 = vld [vmem:[#allocation29_spill] sm:$0xff]  ;;  %v6141_v34 = vld [vmem:[#allocation28_spill] sm:$0xff] }
 0x1fd   : > { %v4380_v31 = vpop.permute.xlu1 %1257 }
 0x1fe   : > { %v4382_v40 = vpop.permute.xlu2 %1297  ;;  %v4384_v55 = vpop.permute.xlu0 %1265 }
 0x203   : > { %1437 = vperm.xlu1 %3082, %v6137_v0  }
 0x204   : > { %1441 = vperm.xlu2 %3080, %v6138_v57   ;;  %1445 = vperm.xlu0 %3081, %v6139_v28   ;;  %v6143_v57 = vld [vmem:[#allocation35_spill] sm:$0xff]  ;;  %v6144_v28 = vld [vmem:[#allocation34_spill] sm:$0xff] }
 0x205   : > { %v4389_v36 = vpop.permute.xlu1 %1269 }
 0x206   : > { %v4391_v25 = vpop.permute.xlu2 %1309  ;;  %v4393_v58 = vpop.permute.xlu0 %1277 }
 0x20b   : > { %1449 = vperm.xlu1 %3082, %v6140_v37  }
 0x20c   : > { %1453 = vperm.xlu2 %3080, %v6141_v34   ;;  %1457 = vperm.xlu0 %3081, %v6142_v33   ;;  %v6146_v34 = vld [vmem:[#allocation41_spill] sm:$0xff]  ;;  %v6147_v33 = vld [vmem:[#allocation40_spill] sm:$0xff] }
 0x20d   : > { %v4398_v22 = vpop.permute.xlu1 %1281 }
 0x20e   : > { %v4400_v27 = vpop.permute.xlu2 %1321  ;;  %v4402_v0 = vpop.permute.xlu0 %1289 }
 0x213   : > { %1461 = vperm.xlu1 %3082, %v6143_v57  }
 0x214   : > { %1465 = vperm.xlu2 %3080, %v6144_v28   ;;  %1469 = vperm.xlu0 %3081, %v6145_v30   ;;  %v6149_v28 = vld [vmem:[#allocation47_spill] sm:$0xff]  ;;  %v6150_v30 = vld [vmem:[#allocation46_spill] sm:$0xff] }
 0x215   : > { %v4407_v19 = vpop.permute.xlu1 %1293 }
 0x216   : > { %v4409_v24 = vpop.permute.xlu2 %1333  ;;  %v4411_v37 = vpop.permute.xlu0 %1301 }
 0x21b   : > { %1473 = vperm.xlu1 %3082, %v6146_v34  }
 0x21c   : > { %1477 = vperm.xlu2 %3080, %v6147_v33   ;;  %1481 = vperm.xlu0 %3081, %v6148_v26   ;;  %v6152_v33 = vld [vmem:[#allocation53_spill] sm:$0xff]  ;;  %v6153_v26 = vld [vmem:[#allocation52_spill] sm:$0xff] }
 0x21d   : > { %v4416_v16 = vpop.permute.xlu1 %1305 }
 0x21e   : > { %v4418_v21 = vpop.permute.xlu2 %1345  ;;  %v4420_v57 = vpop.permute.xlu0 %1313 }
 0x223   : > { %1485 = vperm.xlu1 %3082, %v6149_v28  }
 0x224   : > { %1489 = vperm.xlu2 %3080, %v6150_v30   ;;  %1493 = vperm.xlu0 %3081, %v6151_v23   ;;  %v6155_v30 = vld [vmem:[#allocation59_spill] sm:$0xff]  ;;  %v6156_v23 = vld [vmem:[#allocation58_spill] sm:$0xff] }
 0x225   : > { %v4425_v13 = vpop.permute.xlu1 %1317 }
 0x226   : > { %v4427_v18 = vpop.permute.xlu2 %1357  ;;  %v4429_v34 = vpop.permute.xlu0 %1325 }
 0x22b   : > { %1497 = vperm.xlu1 %3082, %v6152_v33  }
 0x22c   : > { %1501 = vperm.xlu2 %3080, %v6153_v26   ;;  %1505 = vperm.xlu0 %3081, %v6154_v20   ;;  %v6158_v26 = vld [vmem:[#allocation65_spill] sm:$0xff]  ;;  %v6159_v20 = vld [vmem:[#allocation64_spill] sm:$0xff] }
 0x22d   : > { %v4434_v10 = vpop.permute.xlu1 %1329 }
 0x22e   : > { %v4436_v15 = vpop.permute.xlu2 %1369  ;;  %v4438_v28 = vpop.permute.xlu0 %1337 }
 0x233   : > { %1509 = vperm.xlu1 %3082, %v6155_v30  }
 0x234   : > { %1513 = vperm.xlu2 %3080, %v6156_v23   ;;  %1517 = vperm.xlu0 %3081, %v6157_v17   ;;  %v6161_v23 = vld [vmem:[#allocation71_spill] sm:$0xff]  ;;  %v6162_v17 = vld [vmem:[#allocation70_spill] sm:$0xff] }
 0x235   : > { %v4443_v7 = vpop.permute.xlu1 %1341 }
 0x236   : > { %v4445_v12 = vpop.permute.xlu2 %1381  ;;  %v4447_v33 = vpop.permute.xlu0 %1349 }
 0x23b   : > { %1521 = vperm.xlu1 %3082, %v6158_v26  }
 0x23c   : > { %1525 = vperm.xlu2 %3080, %v6159_v20   ;;  %1529 = vperm.xlu0 %3081, %v6160_v14   ;;  %v6164_v20 = vld [vmem:[#allocation77_spill] sm:$0xff]  ;;  %v6165_v14 = vld [vmem:[#allocation76_spill] sm:$0xff] }
 0x23d   : > { %v4452_v4 = vpop.permute.xlu1 %1353 }
 0x23e   : > { %v4454_v9 = vpop.permute.xlu2 %1393  ;;  %v4456_v30 = vpop.permute.xlu0 %1361 }
 0x243   : > { %1533 = vperm.xlu1 %3082, %v6161_v23  }
 0x244   : > { %1537 = vperm.xlu2 %3080, %v6162_v17   ;;  %1541 = vperm.xlu0 %3081, %v6163_v11   ;;  %v6170_v17 = vld [vmem:[#allocation83_spill] sm:$0xff]  ;;  %v6171_v11 = vld [vmem:[#allocation82_spill] sm:$0xff] }
 0x245   : > { %v4461_v5 = vpop.permute.xlu1 %1365 }
 0x246   : > { %v4463_v6 = vpop.permute.xlu2 %1405  ;;  %v4465_v26 = vpop.permute.xlu0 %1373 }
 0x24b   : > { %1545 = vperm.xlu1 %3082, %v6164_v20  }
 0x24c   : > { %1549 = vperm.xlu2 %3080, %v6165_v14   ;;  %1553 = vperm.xlu0 %3081, %v6166_v8   ;;  %v6176_v14 = vld [vmem:[#allocation89_spill] sm:$0xff]  ;;  %v6177_v8 = vld [vmem:[#allocation88_spill] sm:$0xff] }
 0x24d   : > { %v4470_v3 = vpop.permute.xlu1 %1377 }
 0x24e   : > { %6167 = vst [vmem:[#allocation18_spill] sm:$0xff] %v4470_v3  ;;  %v4472_v50 = vpop.permute.xlu2 %1417  ;;  %v4474_v23 = vpop.permute.xlu0 %1385 }
 0x24f   : > { %6168 = vst [vmem:[#allocation17_spill] sm:$0xff] %v4472_v50 }
 0x250   : > { %6169 = vst [vmem:[#allocation24_spill] sm:$0xff] %v4474_v23 }
 0x253   : > { %1557 = vperm.xlu1 %3082, %v6170_v17  }
 0x254   : > { %1561 = vperm.xlu2 %3080, %v6171_v11   ;;  %1565 = vperm.xlu0 %3081, %v6172_v1   ;;  %v6182_v11 = vld [vmem:[#allocation95_spill] sm:$0xff]  ;;  %v6183_v1 = vld [vmem:[#allocation94_spill] sm:$0xff] }
 0x255   : > { %v4479_v49 = vpop.permute.xlu1 %1389 }
 0x256   : > { %6173 = vst [vmem:[#allocation23_spill] sm:$0xff] %v4479_v49  ;;  %v4481_v45 = vpop.permute.xlu2 %1429  ;;  %v4483_v20 = vpop.permute.xlu0 %1397 }
 0x257   : > { %6174 = vst [vmem:[#allocation22_spill] sm:$0xff] %v4481_v45 }
 0x258   : > { %6175 = vst [vmem:[#allocation30_spill] sm:$0xff] %v4483_v20 }
 0x25b   : > { %1569 = vperm.xlu1 %3082, %v6176_v14  }
 0x25c   : > { %1573 = vperm.xlu2 %3080, %v6177_v8   ;;  %1577 = vperm.xlu0 %3081, %v6178_v2   ;;  %v6188_v8 = vld [vmem:[#allocation101_spill] sm:$0xff]  ;;  %v6189_v2 = vld [vmem:[#allocation100_spill] sm:$0xff] }
 0x25d   : > { %v4488_v63 = vpop.permute.xlu1 %1401 }
 0x25e   : > { %6179 = vst [vmem:[#allocation29_spill] sm:$0xff] %v4488_v63  ;;  %v4490_v41 = vpop.permute.xlu2 %1441  ;;  %v4492_v17 = vpop.permute.xlu0 %1409  ;;  %v6190_v63 = vld [vmem:[#allocation108_spill] sm:$0xff] }
 0x25f   : > { %6180 = vst [vmem:[#allocation28_spill] sm:$0xff] %v4490_v41 }
 0x260   : > { %6181 = vst [vmem:[#allocation36_spill] sm:$0xff] %v4492_v17 }
 0x263   : > { %1581 = vperm.xlu1 %3082, %v6182_v11  }
 0x264   : > { %1585 = vperm.xlu2 %3080, %v6183_v1   ;;  %1589 = vperm.xlu0 %3081, %v6184_v61   ;;  %v6194_v1 = vld [vmem:[#allocation107_spill] sm:$0xff]  ;;  %v6195_v61 = vld [vmem:[#allocation106_spill] sm:$0xff] }
 0x265   : > { %v4497_v51 = vpop.permute.xlu1 %1413 }
 0x266   : > { %6185 = vst [vmem:[#allocation35_spill] sm:$0xff] %v4497_v51  ;;  %v4499_v45 = vpop.permute.xlu2 %1453  ;;  %v4501_v14 = vpop.permute.xlu0 %1421  ;;  %v6196_v51 = vld [vmem:[#allocation114_spill] sm:$0xff] }
 0x267   : > { %6186 = vst [vmem:[#allocation34_spill] sm:$0xff] %v4499_v45 }
 0x268   : > { %6187 = vst [vmem:[#allocation42_spill] sm:$0xff] %v4501_v14 }
 0x26b   : > { %1593 = vperm.xlu1 %3082, %v6188_v8  }
 0x26c   : > { %1597 = vperm.xlu2 %3080, %v6189_v2   ;;  %1601 = vperm.xlu0 %3081, %v6190_v63   ;;  %v6200_v2 = vld [vmem:[#allocation113_spill] sm:$0xff]  ;;  %v6201_v63 = vld [vmem:[#allocation112_spill] sm:$0xff] }
 0x26d   : > { %v4506_v41 = vpop.permute.xlu1 %1425 }
 0x26e   : > { %6191 = vst [vmem:[#allocation41_spill] sm:$0xff] %v4506_v41  ;;  %v4508_v17 = vpop.permute.xlu2 %1465  ;;  %v4510_v11 = vpop.permute.xlu0 %1433  ;;  %v6202_v41 = vld [vmem:[#allocation120_spill] sm:$0xff] }
 0x26f   : > { %6192 = vst [vmem:[#allocation40_spill] sm:$0xff] %v4508_v17 }
 0x270   : > { %6193 = vst [vmem:[#allocation48_spill] sm:$0xff] %v4510_v11 }
 0x273   : > { %1605 = vperm.xlu1 %3082, %v6194_v1  }
 0x274   : > { %1609 = vperm.xlu2 %3080, %v6195_v61   ;;  %1613 = vperm.xlu0 %3081, %v6196_v51   ;;  %v6206_v61 = vld [vmem:[#allocation119_spill] sm:$0xff]  ;;  %v6207_v51 = vld [vmem:[#allocation118_spill] sm:$0xff] }
 0x275   : > { %v4515_v45 = vpop.permute.xlu1 %1437 }
 0x276   : > { %6197 = vst [vmem:[#allocation47_spill] sm:$0xff] %v4515_v45  ;;  %v4517_v14 = vpop.permute.xlu2 %1477  ;;  %v4519_v8 = vpop.permute.xlu0 %1445  ;;  %v6208_v45 = vld [vmem:[#allocation126_spill] sm:$0xff] }
 0x277   : > { %6198 = vst [vmem:[#allocation46_spill] sm:$0xff] %v4517_v14 }
 0x278   : > { %6199 = vst [vmem:[#allocation54_spill] sm:$0xff] %v4519_v8 }
 0x27b   : > { %1617 = vperm.xlu1 %3082, %v6200_v2  }
 0x27c   : > { %1621 = vperm.xlu2 %3080, %v6201_v63   ;;  %1625 = vperm.xlu0 %3081, %v6202_v41   ;;  %v6212_v63 = vld [vmem:[#allocation125_spill] sm:$0xff]  ;;  %v6213_v41 = vld [vmem:[#allocation124_spill] sm:$0xff] }
 0x27d   : > { %v4524_v17 = vpop.permute.xlu1 %1449 }
 0x27e   : > { %6203 = vst [vmem:[#allocation53_spill] sm:$0xff] %v4524_v17  ;;  %v4526_v11 = vpop.permute.xlu2 %1489  ;;  %v4528_v1 = vpop.permute.xlu0 %1457  ;;  %v6214_v17 = vld [vmem:[#allocation132_spill] sm:$0xff] }
 0x27f   : > { %6204 = vst [vmem:[#allocation52_spill] sm:$0xff] %v4526_v11 }
 0x280   : > { %6205 = vst [vmem:[#allocation60_spill] sm:$0xff] %v4528_v1 }
 0x283   : > { %1629 = vperm.xlu1 %3082, %v6206_v61  }
 0x284   : > { %1633 = vperm.xlu2 %3080, %v6207_v51   ;;  %1637 = vperm.xlu0 %3081, %v6208_v45   ;;  %v6218_v51 = vld [vmem:[#allocation131_spill] sm:$0xff]  ;;  %v6219_v45 = vld [vmem:[#allocation130_spill] sm:$0xff] }
 0x285   : > { %v4533_v14 = vpop.permute.xlu1 %1461 }
 0x286   : > { %6209 = vst [vmem:[#allocation59_spill] sm:$0xff] %v4533_v14  ;;  %v4535_v8 = vpop.permute.xlu2 %1501  ;;  %v4537_v2 = vpop.permute.xlu0 %1469  ;;  %v6220_v14 = vld [vmem:[#allocation138_spill] sm:$0xff] }
 0x287   : > { %6210 = vst [vmem:[#allocation58_spill] sm:$0xff] %v4535_v8 }
 0x288   : > { %6211 = vst [vmem:[#allocation66_spill] sm:$0xff] %v4537_v2 }
 0x28b   : > { %1641 = vperm.xlu1 %3082, %v6212_v63  }
 0x28c   : > { %1645 = vperm.xlu2 %3080, %v6213_v41   ;;  %1649 = vperm.xlu0 %3081, %v6214_v17   ;;  %v6224_v41 = vld [vmem:[#allocation137_spill] sm:$0xff]  ;;  %v6225_v17 = vld [vmem:[#allocation136_spill] sm:$0xff] }
 0x28d   : > { %v4542_v11 = vpop.permute.xlu1 %1473 }
 0x28e   : > { %6215 = vst [vmem:[#allocation65_spill] sm:$0xff] %v4542_v11  ;;  %v4544_v1 = vpop.permute.xlu2 %1513  ;;  %v4546_v61 = vpop.permute.xlu0 %1481  ;;  %v6226_v11 = vld [vmem:[#allocation144_spill] sm:$0xff] }
 0x28f   : > { %6216 = vst [vmem:[#allocation64_spill] sm:$0xff] %v4544_v1 }
 0x290   : > { %6217 = vst [vmem:[#allocation72_spill] sm:$0xff] %v4546_v61 }
 0x293   : > { %1653 = vperm.xlu1 %3082, %v6218_v51  }
 0x294   : > { %1657 = vperm.xlu2 %3080, %v6219_v45   ;;  %1661 = vperm.xlu0 %3081, %v6220_v14   ;;  %v6230_v45 = vld [vmem:[#allocation143_spill] sm:$0xff]  ;;  %v6231_v14 = vld [vmem:[#allocation142_spill] sm:$0xff] }
 0x295   : > { %v4551_v8 = vpop.permute.xlu1 %1485 }
 0x296   : > { %6221 = vst [vmem:[#allocation71_spill] sm:$0xff] %v4551_v8  ;;  %v4553_v2 = vpop.permute.xlu2 %1525  ;;  %v4555_v63 = vpop.permute.xlu0 %1493  ;;  %v6232_v8 = vld [vmem:[#allocation150_spill] sm:$0xff] }
 0x297   : > { %6222 = vst [vmem:[#allocation70_spill] sm:$0xff] %v4553_v2 }
 0x298   : > { %6223 = vst [vmem:[#allocation78_spill] sm:$0xff] %v4555_v63 }
 0x29b   : > { %1665 = vperm.xlu1 %3082, %v6224_v41  }
 0x29c   : > { %1669 = vperm.xlu2 %3080, %v6225_v17   ;;  %1673 = vperm.xlu0 %3081, %v6226_v11   ;;  %v6236_v17 = vld [vmem:[#allocation149_spill] sm:$0xff]  ;;  %v6237_v11 = vld [vmem:[#allocation148_spill] sm:$0xff] }
 0x29d   : > { %v4560_v1 = vpop.permute.xlu1 %1497 }
 0x29e   : > { %6227 = vst [vmem:[#allocation77_spill] sm:$0xff] %v4560_v1  ;;  %v4562_v61 = vpop.permute.xlu2 %1537  ;;  %v4564_v51 = vpop.permute.xlu0 %1505 }
 0x29f   : > { %6228 = vst [vmem:[#allocation76_spill] sm:$0xff] %v4562_v61 }
 0x2a0   : > { %6229 = vst [vmem:[#allocation84_spill] sm:$0xff] %v4564_v51 }
 0x2a3   : > { %1677 = vperm.xlu1 %3082, %v6230_v45  }
 0x2a4   : > { %1681 = vperm.xlu2 %3080, %v6231_v14   ;;  %1685 = vperm.xlu0 %3081, %v6232_v8   ;;  %v6241_v8 = vld [vmem:[#allocation155_spill] sm:$0xff] }
 0x2a5   : > { %v4569_v2 = vpop.permute.xlu1 %1509 }
 0x2a6   : > { %6233 = vst [vmem:[#allocation83_spill] sm:$0xff] %v4569_v2  ;;  %v4571_v63 = vpop.permute.xlu2 %1549  ;;  %v4573_v41 = vpop.permute.xlu0 %1517  ;;  %v6242_v2 = vld [vmem:[#allocation154_spill] sm:$0xff] }
 0x2a7   : > { %6234 = vst [vmem:[#allocation82_spill] sm:$0xff] %v4571_v63 }
 0x2a8   : > { %6235 = vst [vmem:[#allocation90_spill] sm:$0xff] %v4573_v41  ;;  %v3377_v41 = vld [vmem:[%s3520_s18 + $0x120] sm:$0xff] }
 0x2ab   : > { %1689 = vperm.xlu1 %3082, %v6236_v17  }
 0x2ac   : > { %1693 = vperm.xlu2 %3080, %v6237_v11   ;;  %1697 = vperm.xlu0 %3081, %v4189_v56   ;;  %v6246_v11 = vld [vmem:[#allocation159_spill] sm:$0xff] }
 0x2ad   : > { %v4578_v61 = vpop.permute.xlu1 %1521 }
 0x2ae   : > { %6238 = vst [vmem:[#allocation89_spill] sm:$0xff] %v4578_v61  ;;  %v4580_v45 = vpop.permute.xlu2 %1561  ;;  %v4582_v14 = vpop.permute.xlu0 %1529  ;;  %v3343_v61 = vld [vmem:[%s3520_s18] sm:$0xff] }
 0x2af   : > { %6239 = vst [vmem:[#allocation88_spill] sm:$0xff] %v4580_v45  ;;  %v3483_v45 = vmov 2  }
 0x2b0   : > { %6240 = vst [vmem:[#allocation96_spill] sm:$0xff] %v4582_v14  ;;  %v3349_v14 = vld [vmem:[%s3520_s18 + $0x28] sm:$0xff] }
 0x2b3   : > { %1701 = vperm.xlu1 %3082, %v6241_v8  }
 0x2b4   : > { %1705 = vperm.xlu2 %3080, %v6242_v2   ;;  %1709 = vperm.xlu0 %3081, %v4204_v62   ;;  %v3344_v2 = vld [vmem:[%s3520_s18 + $0x8] sm:$0xff] }
 0x2b5   : > { %v4587_v17 = vpop.permute.xlu1 %1533 }
 0x2b6   : > { %6243 = vst [vmem:[#allocation95_spill] sm:$0xff] %v4587_v17  ;;  %v4589_v63 = vpop.permute.xlu2 %1573  ;;  %v4591_v56 = vpop.permute.xlu0 %1541  ;;  %v3345_v17 = vld [vmem:[%s3520_s18 + $0x10] sm:$0xff] }
 0x2b7   : > { %6244 = vst [vmem:[#allocation94_spill] sm:$0xff] %v4589_v63 }
 0x2b8   : > { %6245 = vst [vmem:[#allocation102_spill] sm:$0xff] %v4591_v56  ;;  %v3347_v56 = vld [vmem:[%s3520_s18 + $0x30] sm:$0xff] }
 0x2bb   : > { %1713 = vperm.xlu1 %3082, %v6246_v11   ;;  %v3346_v11 = vld [vmem:[%s3520_s18 + $0x18] sm:$0xff] }
 0x2bc   : > { %3083 = vset.pattern.permute.xlu2 %v3483_v45  ;;  %3084 = vset.pattern.permute.xlu0 %v3483_v45 }
 0x2bd   : > { %1974 = vperm.xlu2 %3083, %v3343_v61   ;;  %1978 = vperm.xlu0 %3084, %v3344_v2   ;;  %v4596_v62 = vpop.permute.xlu1 %1545 }
 0x2be   : > { %6247 = vst [vmem:[#allocation101_spill] sm:$0xff] %v4596_v62  ;;  %v4598_v8 = vpop.permute.xlu2 %1585  ;;  %v4600_v63 = vpop.permute.xlu0 %1553 }
 0x2bf   : > { %6248 = vst [vmem:[#allocation100_spill] sm:$0xff] %v4598_v8  ;;  %v3348_v8 = vld [vmem:[%s3520_s18 + $0x20] sm:$0xff] }
 0x2c0   : > { %6249 = vst [vmem:[#allocation108_spill] sm:$0xff] %v4600_v63 }
 0x2c3   : > { %3085 = vset.pattern.permute.xlu1 %v3483_v45  ;;  %v3350_v45 = vld [vmem:[%s3520_s18 + $0x48] sm:$0xff] }
 0x2c4   : > { %1982 = vperm.xlu1 %3085, %v3345_v17  }
 0x2c5   : > { %1986 = vperm.xlu2 %3083, %v3346_v11   ;;  %1998 = vperm.xlu0 %3084, %v3347_v56   ;;  %v4605_v61 = vpop.permute.xlu1 %1557 }
 0x2c6   : > { %6250 = vst [vmem:[#allocation107_spill] sm:$0xff] %v4605_v61  ;;  %v4607_v2 = vpop.permute.xlu2 %1597  ;;  %v4609_v62 = vpop.permute.xlu0 %1565  ;;  %v3351_v61 = vld [vmem:[%s3520_s18 + $0x38] sm:$0xff] }
 0x2c7   : > { %6251 = vst [vmem:[#allocation106_spill] sm:$0xff] %v4607_v2  ;;  %v3352_v2 = vld [vmem:[%s3520_s18 + $0x40] sm:$0xff] }
 0x2c8   : > { %6252 = vst [vmem:[#allocation114_spill] sm:$0xff] %v4609_v62  ;;  %v3353_v62 = vld [vmem:[%s3520_s18 + $0x60] sm:$0xff] }
 0x2cc   : > { %1990 = vperm.xlu1 %3085, %v3348_v8  }
 0x2cd   : > { %1994 = vperm.xlu2 %3083, %v3349_v14   ;;  %2010 = vperm.xlu0 %3084, %v3350_v45   ;;  %v4614_v17 = vpop.permute.xlu1 %1569 }
 0x2ce   : > { %6253 = vst [vmem:[#allocation113_spill] sm:$0xff] %v4614_v17  ;;  %v4616_v11 = vpop.permute.xlu2 %1609  ;;  %v4618_v56 = vpop.permute.xlu0 %1577  ;;  %v3354_v17 = vld [vmem:[%s3520_s18 + $0x50] sm:$0xff] }
 0x2cf   : > { %6254 = vst [vmem:[#allocation112_spill] sm:$0xff] %v4616_v11  ;;  %v3355_v11 = vld [vmem:[%s3520_s18 + $0x58] sm:$0xff] }
 0x2d0   : > { %6255 = vst [vmem:[#allocation120_spill] sm:$0xff] %v4618_v56  ;;  %v3356_v56 = vld [vmem:[%s3520_s18 + $0x78] sm:$0xff] }
 0x2d4   : > { %2002 = vperm.xlu1 %3085, %v3351_v61  }
 0x2d5   : > { %2006 = vperm.xlu2 %3083, %v3352_v2   ;;  %2022 = vperm.xlu0 %3084, %v3353_v62   ;;  %v4623_v8 = vpop.permute.xlu1 %1581 }
 0x2d6   : > { %6256 = vst [vmem:[#allocation119_spill] sm:$0xff] %v4623_v8  ;;  %v4625_v14 = vpop.permute.xlu2 %1621  ;;  %v4627_v45 = vpop.permute.xlu0 %1589  ;;  %v3357_v8 = vld [vmem:[%s3520_s18 + $0x68] sm:$0xff] }
 0x2d7   : > { %6257 = vst [vmem:[#allocation118_spill] sm:$0xff] %v4625_v14  ;;  %v3358_v14 = vld [vmem:[%s3520_s18 + $0x70] sm:$0xff] }
 0x2d8   : > { %6258 = vst [vmem:[#allocation126_spill] sm:$0xff] %v4627_v45  ;;  %v3359_v45 = vld [vmem:[%s3520_s18 + $0x90] sm:$0xff] }
 0x2dc   : > { %2014 = vperm.xlu1 %3085, %v3354_v17  }
 0x2dd   : > { %2018 = vperm.xlu2 %3083, %v3355_v11   ;;  %2034 = vperm.xlu0 %3084, %v3356_v56   ;;  %v4632_v61 = vpop.permute.xlu1 %1593 }
 0x2de   : > { %6259 = vst [vmem:[#allocation125_spill] sm:$0xff] %v4632_v61  ;;  %v4634_v2 = vpop.permute.xlu2 %1633  ;;  %v4636_v62 = vpop.permute.xlu0 %1601  ;;  %v3360_v61 = vld [vmem:[%s3520_s18 + $0x80] sm:$0xff] }
 0x2df   : > { %6260 = vst [vmem:[#allocation124_spill] sm:$0xff] %v4634_v2  ;;  %v3361_v2 = vld [vmem:[%s3520_s18 + $0x88] sm:$0xff] }
 0x2e0   : > { %6261 = vst [vmem:[#allocation132_spill] sm:$0xff] %v4636_v62  ;;  %v3362_v62 = vld [vmem:[%s3520_s18 + $0xa8] sm:$0xff] }
 0x2e4   : > { %2026 = vperm.xlu1 %3085, %v3357_v8  }
 0x2e5   : > { %2030 = vperm.xlu2 %3083, %v3358_v14   ;;  %2046 = vperm.xlu0 %3084, %v3359_v45   ;;  %v4641_v17 = vpop.permute.xlu1 %1605 }
 0x2e6   : > { %6262 = vst [vmem:[#allocation131_spill] sm:$0xff] %v4641_v17  ;;  %v4643_v11 = vpop.permute.xlu2 %1645  ;;  %v4645_v56 = vpop.permute.xlu0 %1613  ;;  %v3363_v17 = vld [vmem:[%s3520_s18 + $0x98] sm:$0xff] }
 0x2e7   : > { %6263 = vst [vmem:[#allocation130_spill] sm:$0xff] %v4643_v11  ;;  %v3364_v11 = vld [vmem:[%s3520_s18 + $0xa0] sm:$0xff] }
 0x2e8   : > { %6264 = vst [vmem:[#allocation138_spill] sm:$0xff] %v4645_v56  ;;  %v3365_v56 = vld [vmem:[%s3520_s18 + $0xc0] sm:$0xff] }
 0x2ec   : > { %2038 = vperm.xlu1 %3085, %v3360_v61  }
 0x2ed   : > { %2042 = vperm.xlu2 %3083, %v3361_v2   ;;  %2058 = vperm.xlu0 %3084, %v3362_v62   ;;  %v4650_v8 = vpop.permute.xlu1 %1617 }
 0x2ee   : > { %6265 = vst [vmem:[#allocation137_spill] sm:$0xff] %v4650_v8  ;;  %v4652_v14 = vpop.permute.xlu2 %1657  ;;  %v4654_v45 = vpop.permute.xlu0 %1625  ;;  %v3366_v8 = vld [vmem:[%s3520_s18 + $0xb0] sm:$0xff] }
 0x2ef   : > { %6266 = vst [vmem:[#allocation136_spill] sm:$0xff] %v4652_v14  ;;  %v3367_v14 = vld [vmem:[%s3520_s18 + $0xb8] sm:$0xff] }
 0x2f0   : > { %6267 = vst [vmem:[#allocation144_spill] sm:$0xff] %v4654_v45  ;;  %v3368_v45 = vld [vmem:[%s3520_s18 + $0xd8] sm:$0xff] }
 0x2f4   : > { %2050 = vperm.xlu1 %3085, %v3363_v17  }
 0x2f5   : > { %2054 = vperm.xlu2 %3083, %v3364_v11   ;;  %2070 = vperm.xlu0 %3084, %v3365_v56   ;;  %v4659_v61 = vpop.permute.xlu1 %1629 }
 0x2f6   : > { %6268 = vst [vmem:[#allocation143_spill] sm:$0xff] %v4659_v61  ;;  %v4661_v2 = vpop.permute.xlu2 %1669  ;;  %v4663_v62 = vpop.permute.xlu0 %1637  ;;  %v3369_v61 = vld [vmem:[%s3520_s18 + $0xc8] sm:$0xff] }
 0x2f7   : > { %6269 = vst [vmem:[#allocation142_spill] sm:$0xff] %v4661_v2  ;;  %v3370_v2 = vld [vmem:[%s3520_s18 + $0xd0] sm:$0xff] }
 0x2f8   : > { %6270 = vst [vmem:[#allocation150_spill] sm:$0xff] %v4663_v62  ;;  %v3371_v62 = vld [vmem:[%s3520_s18 + $0xf0] sm:$0xff] }
 0x2fc   : > { %2062 = vperm.xlu1 %3085, %v3366_v8  }
 0x2fd   : > { %2066 = vperm.xlu2 %3083, %v3367_v14   ;;  %2082 = vperm.xlu0 %3084, %v3368_v45   ;;  %v4668_v17 = vpop.permute.xlu1 %1641  ;;  %v3372_v45 = vld [vmem:[%s3520_s18 + $0xe0] sm:$0xff] }
 0x2fe   : > { %6271 = vst [vmem:[#allocation149_spill] sm:$0xff] %v4668_v17  ;;  %v4670_v11 = vpop.permute.xlu2 %1681  ;;  %v4672_v56 = vpop.permute.xlu0 %1649  ;;  %v3373_v17 = vld [vmem:[%s3520_s18 + $0xe8] sm:$0xff] }
 0x2ff   : > { %6272 = vst [vmem:[#allocation148_spill] sm:$0xff] %v4670_v11  ;;  %v302_v11 = vld [vmem:[%s5861_s1] sm:$0x7] }
 0x300   : > { %6273 = vst [vmem:[#allocation155_spill] sm:$0xff] %v4672_v56 }
 0x304   : > { %2074 = vperm.xlu1 %3085, %v3369_v61   ;;  %v3374_v61 = vld [vmem:[%s3520_s18 + $0x108] sm:$0xff] }
 0x305   : > { %2078 = vperm.xlu2 %3083, %v3370_v2   ;;  %2094 = vperm.xlu0 %3084, %v3371_v62   ;;  %v4677_v8 = vpop.permute.xlu1 %1653 }
 0x306   : > { %6274 = vst [vmem:[#allocation154_spill] sm:$0xff] %v4677_v8  ;;  %v4679_v63 = vpop.permute.xlu2 %1693  ;;  %v4681_v14 = vpop.permute.xlu0 %1661  ;;  %v4695_v8 = vperm.slane %v302_v11, 0 }
 0x307   : > { %6275 = vst [vmem:[#allocation159_spill] sm:$0xff] %v4679_v63 }
 0x308   : > { %6276 = vst [vmem:[#allocation201_spill] sm:$0xff] %v4681_v14  ;;  %v4697_v14 = vperm.slane %v302_v11, 1 }
 0x30c   : > { %2086 = vperm.xlu1 %3085, %v3372_v45   ;;  %v6280_v45 = vld [vmem:[#allocation7_spill] sm:$0xff] }
 0x30d   : > { %2090 = vperm.xlu2 %3083, %v3373_v17   ;;  %2106 = vperm.xlu0 %3084, %v3374_v61   ;;  %v4689_v2 = vpop.permute.xlu1 %1665  ;;  %v945_v56 = vmul.f32 %v4695_v8, %v6280_v45  ;;  %v4704_v17 = vld [vmem:[%s5862_s2] ss:$0 sm:$0xff]  ;;  %v1717_v61 = vmul.f32 %v4697_v14, %v4312_v29 }
 0x30e   : > { %6277 = vst [vmem:[#allocation202_spill] sm:$0xff] %v4689_v2  ;;  %v4691_v62 = vpop.permute.xlu2 %1705  ;;  %v4693_v63 = vpop.permute.xlu0 %1673  ;;  %v3375_v2 = vld [vmem:[%s3520_s18 + $0xf8] sm:$0xff] }
 0x30f   : > { %6278 = vst [vmem:[#allocation203_spill] sm:$0xff] %v4691_v62  ;;  %v4709_v62 = vperm.slane %v302_v11, 2  ;;  %v1076_v1 = vadd.f32 %v4704_v17, %v945_v56  ;;  %v3380_v56 = vld [vmem:[%s3520_s18 + $0x138] sm:$0xff] }
 0x310   : > { %6279 = vst [vmem:[#allocation204_spill] sm:$0xff] %v4693_v63  ;;  %v3376_v63 = vld [vmem:[%s3520_s18 + $0x100] sm:$0xff] }
 0x311   : > { %v1845_v20 = vadd.f32 %v1717_v61, %v1076_v1 }
 0x314   : > { %2098 = vperm.xlu1 %3085, %v3375_v2   ;;  %v6283_v2 = vld [vmem:[#allocation9_spill] sm:$0xff] }
 0x315   : > { %2102 = vperm.xlu2 %3083, %v3376_v63   ;;  %2118 = vperm.xlu0 %3084, %v3377_v41   ;;  %v4713_v45 = vpop.permute.xlu1 %1677  ;;  %v948_v11 = vmul.f32 %v4695_v8, %v6283_v2  ;;  %v1720_v63 = vmul.f32 %v4697_v14, %v4321_v32  ;;  %v3378_v41 = vld [vmem:[%s3520_s18 + $0x110] sm:$0xff] }
 0x316   : > { %6281 = vst [vmem:[#allocation7_spill] sm:$0xff] %v4713_v45  ;;  %v4716_v51 = vpop.permute.xlu0 %1685  ;;  %v3379_v45 = vld [vmem:[%s3520_s18 + $0x118] sm:$0xff] }
 0x317   : > { %6282 = vst [vmem:[#allocation205_spill] sm:$0xff] %v4716_v51  ;;  %v1975_v49 = vpop.permute.xlu2 %1974 }
 0x318   : > { %v2486_v29 = vmul.f32 %v4709_v62, %v1975_v49  ;;  %v1079_v49 = vadd.f32 %v4704_v17, %v948_v11  ;;  %v1722_v11 = vmul.f32 %v4697_v14, %v4330_v35 }
 0x31a   : > { %v2614_v50 = vadd.f32 %v2486_v29, %v1845_v20 }
 0x31c   : > { %3087 = vtanh.f32 %v2614_v50  ;;  %2110 = vperm.xlu1 %3085, %v3378_v41   ;;  %v1848_v50 = vadd.f32 %v1720_v63, %v1079_v49  ;;  %v3381_v41 = vld [vmem:[%s3520_s18 + $0x128] sm:$0xff]  ;;  %v3383_v63 = vld [vmem:[%s3520_s18 + $0x150] sm:$0xff] }
 0x31d   : > { %2114 = vperm.xlu2 %3083, %v3379_v45   ;;  %2130 = vperm.xlu0 %3084, %v3380_v56   ;;  %v4726_v51 = vpop.permute.xlu1 %1689  ;;  %v6286_v45 = vld [vmem:[#allocation3_spill] sm:$0xff]  ;;  %v3382_v56 = vld [vmem:[%s3520_s18 + $0x130] sm:$0xff] }
 0x31e   : > { %6284 = vst [vmem:[#allocation9_spill] sm:$0xff] %v4726_v51  ;;  %v4729_v1 = vpop.permute.xlu0 %1697  ;;  %v950_v29 = vmul.f32 %v4695_v8, %v6286_v45 }
 0x31f   : > { %6285 = vst [vmem:[#allocation206_spill] sm:$0xff] %v4729_v1  ;;  %v1987_v20 = vpop.permute.xlu2 %1986  ;;  %v6294_v1 = vld [vmem:[#allocation13_spill] sm:$0xff] }
 0x320   : > { %v2489_v32 = vmul.f32 %v4709_v62, %v1987_v20  ;;  %v1081_v20 = vadd.f32 %v4704_v17, %v950_v29  ;;  %v1725_v29 = vmul.f32 %v4697_v14, %v4339_v39 }
 0x322   : > { %v3088_v61 = vpop.eup %3087  ;;  %v2617_v2 = vadd.f32 %v2489_v32, %v1848_v50 }
 0x323   : > { %2871 = vst.msk [vmem:[%s4736_s25] sm:$0xff] %vm2870_vm0, %v3088_v61  ;;  %v1850_v61 = vadd.f32 %v1722_v11, %v1081_v20  ;;  %v3384_v11 = vld [vmem:[%s3520_s18 + $0x140] sm:$0xff]  ;;  %v3385_v20 = vld [vmem:[%s3520_s18 + $0x148] sm:$0xff] }
 0x324   : > { %3089 = vtanh.f32 %v2617_v2  ;;  %2122 = vperm.xlu1 %3085, %v3381_v41   ;;  %v6289_v2 = vld [vmem:[#allocation4_spill] sm:$0xff] }
 0x325   : > { %2126 = vperm.xlu2 %3083, %v3382_v56   ;;  %2142 = vperm.xlu0 %3084, %v3383_v63   ;;  %v4748_v49 = vpop.permute.xlu1 %1701  ;;  %v953_v41 = vmul.f32 %v4695_v8, %v6289_v2  ;;  %v6290_v56 = vld [vmem:[#allocation10_spill] sm:$0xff] }
 0x326   : > { %6287 = vst [vmem:[#allocation3_spill] sm:$0xff] %v4748_v49  ;;  %v4751_v50 = vpop.permute.xlu0 %1709  ;;  %v946_v51 = vmul.f32 %v4695_v8, %v6290_v56  ;;  %v1718_v49 = vmul.f32 %v4697_v14, %v4348_v43 }
 0x327   : > { %6288 = vst [vmem:[#allocation207_spill] sm:$0xff] %v4751_v50  ;;  %v1995_v32 = vpop.permute.xlu2 %1994 }
 0x328   : > { %v2491_v35 = vmul.f32 %v4709_v62, %v1995_v32  ;;  %v3386_v32 = vld [vmem:[%s3520_s18 + $0x168] sm:$0xff] }
 0x32a   : > { %v3090_v45 = vpop.eup %3089  ;;  %v2619_v63 = vadd.f32 %v2491_v35, %v1850_v61  ;;  %v1084_v61 = vadd.f32 %v4704_v17, %v953_v41  ;;  %v1077_v35 = vadd.f32 %v4704_v17, %v946_v51  ;;  %v951_v51 = vmul.f32 %v4695_v8, %v6294_v1  ;;  %v3388_v1 = vld [vmem:[%s3520_s18 + $0x160] sm:$0xff] }
 0x32b   : > { %2874 = vst.msk [vmem:[%s4736_s25 + $0x18] sm:$0xff] %vm2870_vm0, %v3090_v45 }
 0x32c   : > { %3091 = vtanh.f32 %v2619_v63  ;;  %2134 = vperm.xlu1 %3085, %v3384_v11   ;;  %v1853_v39 = vadd.f32 %v1725_v29, %v1084_v61  ;;  %v1846_v50 = vadd.f32 %v1718_v49, %v1077_v35  ;;  %v6292_v11 = vld [vmem:[#allocation6_spill] sm:$0xff]  ;;  %v1719_v49 = vmul.f32 %v4697_v14, %v4344_v38  ;;  %v3387_v35 = vld [vmem:[%s3520_s18 + $0x158] sm:$0xff] }
 0x32d   : > { %2138 = vperm.xlu2 %3083, %v3385_v20   ;;  %2154 = vperm.xlu0 %3084, %v3386_v32   ;;  %v4767_v2 = vpop.permute.xlu1 %1713  ;;  %v947_v20 = vmul.f32 %v4695_v8, %v6292_v11  ;;  %v1728_v29 = vmul.f32 %v4697_v14, %v4346_v44  ;;  %v1723_v61 = vmul.f32 %v4697_v14, %v4357_v47 }
 0x32e   : > { %6291 = vst [vmem:[#allocation4_spill] sm:$0xff] %v4767_v2  ;;  %v6293_v2 = vld [vmem:[#allocation5_spill] sm:$0xff] }
 0x32f   : > { %v2007_v45 = vpop.permute.xlu2 %2006  ;;  %v1979_v56 = vpop.permute.xlu0 %1978  ;;  %v956_v41 = vmul.f32 %v4695_v8, %v6293_v2  ;;  %v1078_v2 = vadd.f32 %v4704_v17, %v947_v20  ;;  %v6295_v20 = vld [vmem:[#allocation2_spill] sm:$0xff] }
 0x330   : > { %v2494_v43 = vmul.f32 %v4709_v62, %v2007_v45  ;;  %v2487_v63 = vmul.f32 %v4709_v62, %v1979_v56  ;;  %v1082_v45 = vadd.f32 %v4704_v17, %v951_v51 }
 0x331   : > { %v1087_v38 = vadd.f32 %v4704_v17, %v956_v41 }
 0x332   : > { %v3092_v32 = vpop.eup %3091  ;;  %v2622_v3 = vadd.f32 %v2494_v43, %v1853_v39  ;;  %v2615_v23 = vadd.f32 %v2487_v63, %v1846_v50  ;;  %v3389_v50 = vld [vmem:[%s3520_s18 + $0x180] sm:$0xff]  ;;  %v1847_v39 = vadd.f32 %v1719_v49, %v1078_v2  ;;  %v1851_v63 = vadd.f32 %v1723_v61, %v1082_v45  ;;  %v6297_v2 = vld [vmem:[#allocation16_spill] sm:$0xff] }
 0x333   : > { %2876 = vst.msk [vmem:[%s4736_s25 + $0x28] sm:$0xff] %vm2870_vm0, %v3092_v32  ;;  %v1856_v43 = vadd.f32 %v1728_v29, %v1087_v38  ;;  %v949_v32 = vmul.f32 %v4695_v8, %v6295_v20  ;;  %v1721_v38 = vmul.f32 %v4697_v14, %v4353_v42  ;;  %v1731_v45 = vmul.f32 %v4697_v14, %v4355_v48  ;;  %v3392_v42 = vld [vmem:[%s3520_s18 + $0x198] sm:$0xff] }
 0x334   : > { %3093 = vtanh.f32 %v2622_v3  ;;  %2146 = vperm.xlu1 %3085, %v3387_v35   ;;  %v6296_v35 = vld [vmem:[#allocation8_spill] sm:$0xff] }
 0x335   : > { %3095 = vtanh.f32 %v2615_v23  ;;  %2150 = vperm.xlu2 %3083, %v3388_v1   ;;  %2166 = vperm.xlu0 %3084, %v3389_v50   ;;  %v959_v49 = vmul.f32 %v4695_v8, %v6296_v35  ;;  %v954_v1 = vmul.f32 %v4695_v8, %v6297_v2  ;;  %v6298_v2 = vld [vmem:[#allocation12_spill] sm:$0xff] }
 0x336   : > { %v1983_v56 = vpop.permute.xlu1 %1982 }
 0x337   : > { %v2488_v44 = vmul.f32 %v4709_v62, %v1983_v56  ;;  %v2019_v47 = vpop.permute.xlu2 %2018  ;;  %v1999_v3 = vpop.permute.xlu0 %1998  ;;  %v1726_v56 = vmul.f32 %v4697_v14, %v4366_v53 }
 0x338   : > { %v2497_v23 = vmul.f32 %v4709_v62, %v2019_v47  ;;  %v2492_v11 = vmul.f32 %v4709_v62, %v1999_v3  ;;  %v3391_v47 = vld [vmem:[%s3520_s18 + $0x178] sm:$0xff]  ;;  %v1090_v3 = vadd.f32 %v4704_v17, %v959_v49  ;;  %v952_v49 = vmul.f32 %v4695_v8, %v6298_v2 }
 0x339   : > { %v2616_v41 = vadd.f32 %v2488_v44, %v1847_v39  ;;  %v3390_v39 = vld [vmem:[%s3520_s18 + $0x170] sm:$0xff]  ;;  %v1080_v44 = vadd.f32 %v4704_v17, %v949_v32 }
 0x33a   : > { %v3094_v51 = vpop.eup %3093  ;;  %v2625_v29 = vadd.f32 %v2497_v23, %v1856_v43  ;;  %v2620_v61 = vadd.f32 %v2492_v11, %v1851_v63  ;;  %v1085_v43 = vadd.f32 %v4704_v17, %v954_v1  ;;  %v1859_v20 = vadd.f32 %v1731_v45, %v1090_v3 }
 0x33b   : > { %v3096_v50 = vpop.eup %3095  ;;  %2879 = vst.msk [vmem:[%s4736_s25 + $0x40] sm:$0xff] %vm2870_vm0, %v3094_v51  ;;  %3097 = vtanh.f32 %v2616_v41  ;;  %v1849_v63 = vadd.f32 %v1721_v38, %v1080_v44  ;;  %v6300_v38 = vld [vmem:[#allocation21_spill] sm:$0xff]  ;;  %v1729_v3 = vmul.f32 %v4697_v14, %v4375_v59 }
 0x33c   : > { %2872 = vst.msk [vmem:[%s4736_s25 + $0x8] sm:$0xff] %vm2870_vm0, %v3096_v50  ;;  %3099 = vtanh.f32 %v2625_v29  ;;  %2158 = vperm.xlu1 %3085, %v3390_v39   ;;  %v1854_v41 = vadd.f32 %v1726_v56, %v1085_v43  ;;  %v957_v39 = vmul.f32 %v4695_v8, %v6300_v38  ;;  %v3393_v43 = vld [vmem:[%s3520_s18 + $0x188] sm:$0xff]  ;;  %v6302_v38 = vld [vmem:[#allocation14_spill] sm:$0xff] }
 0x33d   : > { %3101 = vtanh.f32 %v2620_v61  ;;  %2162 = vperm.xlu2 %3083, %v3391_v47   ;;  %2178 = vperm.xlu0 %3084, %v3392_v42   ;;  %v6299_v61 = vld [vmem:[#allocation11_spill] sm:$0xff]  ;;  %v1724_v47 = vmul.f32 %v4697_v14, %v4362_v46  ;;  %v1734_v42 = vmul.f32 %v4697_v14, %v4364_v54  ;;  %v3395_v46 = vld [vmem:[%s3520_s18 + $0x1b0] sm:$0xff] }
 0x33e   : > { %v1991_v48 = vpop.permute.xlu1 %1990  ;;  %v962_v50 = vmul.f32 %v4695_v8, %v6299_v61 }
 0x33f   : > { %v2490_v53 = vmul.f32 %v4709_v62, %v1991_v48  ;;  %v2031_v23 = vpop.permute.xlu2 %2030  ;;  %v2011_v11 = vpop.permute.xlu0 %2010  ;;  %v1083_v48 = vadd.f32 %v4704_v17, %v952_v49 }
 0x340   : > { %v2500_v32 = vmul.f32 %v4709_v62, %v2031_v23  ;;  %v2495_v51 = vmul.f32 %v4709_v62, %v2011_v11  ;;  %v1088_v23 = vadd.f32 %v4704_v17, %v957_v39  ;;  %v965_v39 = vmul.f32 %v4695_v8, %v6302_v38 }
 0x341   : > { %v3098_v35 = vpop.eup %3097  ;;  %v2618_v1 = vadd.f32 %v2490_v53, %v1849_v63  ;;  %v3394_v63 = vld [vmem:[%s3520_s18 + $0x190] sm:$0xff]  ;;  %v1093_v53 = vadd.f32 %v4704_v17, %v962_v50  ;;  %v1852_v11 = vadd.f32 %v1724_v47, %v1083_v48  ;;  %v1732_v48 = vmul.f32 %v4697_v14, %v4384_v55 }
 0x342   : > { %v3100_v29 = vpop.eup %3099  ;;  %2873 = vst.msk [vmem:[%s4736_s25 + $0x10] sm:$0xff] %vm2870_vm0, %v3098_v35  ;;  %v2628_v45 = vadd.f32 %v2500_v32, %v1859_v20  ;;  %v2623_v56 = vadd.f32 %v2495_v51, %v1854_v41  ;;  %v1857_v51 = vadd.f32 %v1729_v3, %v1088_v23  ;;  %v1727_v3 = vmul.f32 %v4697_v14, %v4371_v52  ;;  %v3398_v52 = vld [vmem:[%s3520_s18 + $0x1c8] sm:$0xff] }
 0x343   : > { %v3102_v44 = vpop.eup %3101  ;;  %2882 = vst.msk [vmem:[%s4736_s25 + $0x58] sm:$0xff] %vm2870_vm0, %v3100_v29  ;;  %3103 = vtanh.f32 %v2618_v1  ;;  %v1862_v32 = vadd.f32 %v1734_v42, %v1093_v53  ;;  %v6301_v1 = vld [vmem:[#allocation15_spill] sm:$0xff]  ;;  %v1096_v23 = vadd.f32 %v4704_v17, %v965_v39  ;;  %v6306_v39 = vld [vmem:[#allocation33_spill] sm:$0xff] }
 0x344   : > { %2877 = vst.msk [vmem:[%s4736_s25 + $0x30] sm:$0xff] %vm2870_vm0, %v3102_v44  ;;  %3105 = vtanh.f32 %v2628_v45  ;;  %2170 = vperm.xlu1 %3085, %v3393_v43   ;;  %v955_v29 = vmul.f32 %v4695_v8, %v6301_v1  ;;  %v6303_v45 = vld [vmem:[#allocation27_spill] sm:$0xff]  ;;  %v1737_v43 = vmul.f32 %v4697_v14, %v4373_v60 }
 0x345   : > { %3107 = vtanh.f32 %v2623_v56  ;;  %2174 = vperm.xlu2 %3083, %v3394_v63   ;;  %2190 = vperm.xlu0 %3084, %v3395_v46   ;;  %v960_v56 = vmul.f32 %v4695_v8, %v6303_v45  ;;  %v3396_v63 = vld [vmem:[%s3520_s18 + $0x1a0] sm:$0xff]  ;;  %v3397_v53 = vld [vmem:[%s3520_s18 + $0x1a8] sm:$0xff]  ;;  %v963_v45 = vmul.f32 %v4695_v8, %v6306_v39 }
 0x346   : > { %v2003_v54 = vpop.permute.xlu1 %2002  ;;  %v1086_v46 = vadd.f32 %v4704_v17, %v955_v29 }
 0x347   : > { %v2493_v59 = vmul.f32 %v4709_v62, %v2003_v54  ;;  %v2043_v20 = vpop.permute.xlu2 %2042  ;;  %v2023_v41 = vpop.permute.xlu0 %2022  ;;  %v1091_v54 = vadd.f32 %v4704_v17, %v960_v56 }
 0x348   : > { %v2503_v35 = vmul.f32 %v4709_v62, %v2043_v20  ;;  %v2498_v2 = vmul.f32 %v4709_v62, %v2023_v41  ;;  %v1865_v41 = vadd.f32 %v1737_v43, %v1096_v23  ;;  %v1735_v43 = vmul.f32 %v4697_v14, %v4393_v58 }
 0x349   : > { %v3104_v49 = vpop.eup %3103  ;;  %v2621_v61 = vadd.f32 %v2493_v59, %v1852_v11  ;;  %v1855_v11 = vadd.f32 %v1727_v3, %v1086_v46  ;;  %v1740_v3 = vmul.f32 %v4697_v14, %v4382_v40  ;;  %v3400_v46 = vld [vmem:[%s3520_s18 + $0x1c0] sm:$0xff] }
 0x34a   : > { %v3106_v50 = vpop.eup %3105  ;;  %2875 = vst.msk [vmem:[%s4736_s25 + $0x20] sm:$0xff] %vm2870_vm0, %v3104_v49  ;;  %v2631_v44 = vadd.f32 %v2503_v35, %v1862_v32  ;;  %v2626_v47 = vadd.f32 %v2498_v2, %v1857_v51  ;;  %v1860_v32 = vadd.f32 %v1732_v48, %v1091_v54  ;;  %v6304_v49 = vld [vmem:[#allocation20_spill] sm:$0xff]  ;;  %v3399_v48 = vld [vmem:[%s3520_s18 + $0x1b8] sm:$0xff] }
 0x34b   : > { %v3108_v42 = vpop.eup %3107  ;;  %2885 = vst.msk [vmem:[%s4736_s25 + $0x70] sm:$0xff] %vm2870_vm0, %v3106_v50  ;;  %3109 = vtanh.f32 %v2621_v61  ;;  %v958_v1 = vmul.f32 %v4695_v8, %v6304_v49  ;;  %v6305_v50 = vld [vmem:[#allocation19_spill] sm:$0xff]  ;;  %v6308_v49 = vld [vmem:[#allocation25_spill] sm:$0xff] }
 0x34c   : > { %2880 = vst.msk [vmem:[%s4736_s25 + $0x48] sm:$0xff] %vm2870_vm0, %v3108_v42  ;;  %3111 = vtanh.f32 %v2631_v44  ;;  %2182 = vperm.xlu1 %3085, %v3396_v63   ;;  %v968_v38 = vmul.f32 %v4695_v8, %v6305_v50  ;;  %v1730_v42 = vmul.f32 %v4697_v14, %v4380_v31  ;;  %v3401_v31 = vld [vmem:[%s3520_s18 + $0x1e0] sm:$0xff] }
 0x34d   : > { %3113 = vtanh.f32 %v2626_v47  ;;  %2186 = vperm.xlu2 %3083, %v3397_v53   ;;  %2202 = vperm.xlu0 %3084, %v3398_v52   ;;  %v1089_v63 = vadd.f32 %v4704_v17, %v958_v1  ;;  %v1094_v52 = vadd.f32 %v4704_v17, %v963_v45  ;;  %v971_v1 = vmul.f32 %v4695_v8, %v6308_v49 }
 0x34e   : > { %v2015_v60 = vpop.permute.xlu1 %2014  ;;  %v1099_v53 = vadd.f32 %v4704_v17, %v968_v38  ;;  %v1733_v45 = vmul.f32 %v4697_v14, %v4389_v36  ;;  %v3404_v36 = vld [vmem:[%s3520_s18 + $0x1f8] sm:$0xff]  ;;  %v1736_v49 = vmul.f32 %v4697_v14, %v4398_v22  ;;  %v3407_v22 = vld [vmem:[%s3520_s18 + $0x210] sm:$0xff] }
 0x34f   : > { %v2496_v55 = vmul.f32 %v4709_v62, %v2015_v60  ;;  %v2055_v59 = vpop.permute.xlu2 %2054  ;;  %v2035_v20 = vpop.permute.xlu0 %2034  ;;  %v1858_v23 = vadd.f32 %v1730_v42, %v1089_v63 }
 0x350   : > { %v2506_v51 = vmul.f32 %v4709_v62, %v2055_v59  ;;  %v2501_v35 = vmul.f32 %v4709_v62, %v2035_v20 }
 0x351   : > { %v3110_v2 = vpop.eup %3109  ;;  %v2624_v29 = vadd.f32 %v2496_v55, %v1855_v11  ;;  %v1868_v11 = vadd.f32 %v1740_v3, %v1099_v53  ;;  %v1863_v55 = vadd.f32 %v1735_v43, %v1094_v52  ;;  %v3403_v3 = vld [vmem:[%s3520_s18 + $0x1d8] sm:$0xff]  ;;  %v1102_v43 = vadd.f32 %v4704_v17, %v971_v1 }
 0x352   : > { %v3112_v61 = vpop.eup %3111  ;;  %2878 = vst.msk [vmem:[%s4736_s25 + $0x38] sm:$0xff] %vm2870_vm0, %v3110_v2  ;;  %v2634_v56 = vadd.f32 %v2506_v51, %v1865_v41  ;;  %v2629_v44 = vadd.f32 %v2501_v35, %v1860_v32  ;;  %v6307_v32 = vld [vmem:[#allocation26_spill] sm:$0xff]  ;;  %v1746_v1 = vmul.f32 %v4697_v14, %v4400_v27 }
 0x353   : > { %v3114_v47 = vpop.eup %3113  ;;  %2888 = vst.msk [vmem:[%s4736_s25 + $0x88] sm:$0xff] %vm2870_vm0, %v3112_v61  ;;  %3115 = vtanh.f32 %v2624_v29  ;;  %v961_v51 = vmul.f32 %v4695_v8, %v6307_v32  ;;  %v6309_v29 = vld [vmem:[#allocation39_spill] sm:$0xff] }
 0x354   : > { %2883 = vst.msk [vmem:[%s4736_s25 + $0x60] sm:$0xff] %vm2870_vm0, %v3114_v47  ;;  %3117 = vtanh.f32 %v2634_v56  ;;  %2194 = vperm.xlu1 %3085, %v3399_v48   ;;  %v966_v61 = vmul.f32 %v4695_v8, %v6309_v29  ;;  %v1743_v56 = vmul.f32 %v4697_v14, %v4391_v25  ;;  %v3402_v47 = vld [vmem:[%s3520_s18 + $0x1d0] sm:$0xff]  ;;  %v1741_v29 = vmul.f32 %v4697_v14, %v4411_v37 }
 0x355   : > { %3119 = vtanh.f32 %v2629_v44  ;;  %2198 = vperm.xlu2 %3083, %v3400_v46   ;;  %2214 = vperm.xlu0 %3084, %v3401_v31   ;;  %v1738_v44 = vmul.f32 %v4697_v14, %v4402_v0  ;;  %v1092_v42 = vadd.f32 %v4704_v17, %v961_v51 }
 0x356   : > { %v2027_v40 = vpop.permute.xlu1 %2026  ;;  %v1097_v48 = vadd.f32 %v4704_v17, %v966_v61  ;;  %v1871_v53 = vadd.f32 %v1743_v56, %v1102_v43  ;;  %v3405_v61 = vld [vmem:[%s3520_s18 + $0x1e8] sm:$0xff] }
 0x357   : > { %v2499_v58 = vmul.f32 %v4709_v62, %v2027_v40  ;;  %v2067_v54 = vpop.permute.xlu2 %2066  ;;  %v2047_v60 = vpop.permute.xlu0 %2046  ;;  %v1861_v63 = vadd.f32 %v1733_v45, %v1092_v42 }
 0x358   : > { %v2509_v59 = vmul.f32 %v4709_v62, %v2067_v54  ;;  %v2504_v20 = vmul.f32 %v4709_v62, %v2047_v60  ;;  %v1866_v52 = vadd.f32 %v1738_v44, %v1097_v48  ;;  %v6310_v54 = vld [vmem:[#allocation32_spill] sm:$0xff] }
 0x359   : > { %v3116_v41 = vpop.eup %3115  ;;  %v2627_v35 = vadd.f32 %v2499_v58, %v1858_v23  ;;  %v964_v60 = vmul.f32 %v4695_v8, %v6310_v54 }
 0x35a   : > { %v3118_v2 = vpop.eup %3117  ;;  %2881 = vst.msk [vmem:[%s4736_s25 + $0x50] sm:$0xff] %vm2870_vm0, %v3116_v41  ;;  %v2637_v50 = vadd.f32 %v2509_v59, %v1868_v11  ;;  %v2632_v38 = vadd.f32 %v2504_v20, %v1863_v55  ;;  %v6311_v59 = vld [vmem:[#allocation31_spill] sm:$0xff]  ;;  %v6312_v41 = vld [vmem:[#allocation45_spill] sm:$0xff] }
 0x35b   : > { %v3120_v39 = vpop.eup %3119  ;;  %2891 = vst.msk [vmem:[%s4736_s25 + $0xa0] sm:$0xff] %vm2870_vm0, %v3118_v2  ;;  %3121 = vtanh.f32 %v2627_v35  ;;  %v974_v20 = vmul.f32 %v4695_v8, %v6311_v59  ;;  %v969_v32 = vmul.f32 %v4695_v8, %v6312_v41  ;;  %v3408_v59 = vld [vmem:[%s3520_s18 + $0x200] sm:$0xff]  ;;  %v3409_v41 = vld [vmem:[%s3520_s18 + $0x208] sm:$0xff] }
 0x35c   : > { %2886 = vst.msk [vmem:[%s4736_s25 + $0x78] sm:$0xff] %vm2870_vm0, %v3120_v39  ;;  %3123 = vtanh.f32 %v2637_v50  ;;  %2206 = vperm.xlu1 %3085, %v3402_v47   ;;  %v1095_v50 = vadd.f32 %v4704_v17, %v964_v60  ;;  %v1739_v60 = vmul.f32 %v4697_v14, %v4407_v19  ;;  %v3410_v19 = vld [vmem:[%s3520_s18 + $0x228] sm:$0xff] }
 0x35d   : > { %3125 = vtanh.f32 %v2632_v38  ;;  %2210 = vperm.xlu2 %3083, %v3403_v3   ;;  %2226 = vperm.xlu0 %3084, %v3404_v36   ;;  %v3406_v38 = vld [vmem:[%s3520_s18 + $0x1f0] sm:$0xff]  ;;  %v1105_v39 = vadd.f32 %v4704_v17, %v974_v20  ;;  %v1100_v45 = vadd.f32 %v4704_v17, %v969_v32 }
 0x35e   : > { %v2039_v25 = vpop.permute.xlu1 %2038  ;;  %v1864_v56 = vadd.f32 %v1736_v49, %v1095_v50 }
 0x35f   : > { %v2502_v0 = vmul.f32 %v4709_v62, %v2039_v25  ;;  %v2079_v46 = vpop.permute.xlu2 %2078  ;;  %v2059_v31 = vpop.permute.xlu0 %2058  ;;  %v1874_v42 = vadd.f32 %v1746_v1, %v1105_v39  ;;  %v1869_v3 = vadd.f32 %v1741_v29, %v1100_v45  ;;  %v6313_v25 = vld [vmem:[#allocation38_spill] sm:$0xff] }
 0x360   : > { %v2512_v40 = vmul.f32 %v4709_v62, %v2079_v46  ;;  %v2507_v23 = vmul.f32 %v4709_v62, %v2059_v31  ;;  %v6314_v31 = vld [vmem:[#allocation37_spill] sm:$0xff] }
 0x361   : > { %v3122_v58 = vpop.eup %3121  ;;  %v2630_v11 = vadd.f32 %v2502_v0, %v1861_v63  ;;  %v967_v63 = vmul.f32 %v4695_v8, %v6313_v25  ;;  %v1747_v25 = vmul.f32 %v4697_v14, %v4429_v34 }
 0x362   : > { %v3124_v55 = vpop.eup %3123  ;;  %2884 = vst.msk [vmem:[%s4736_s25 + $0x68] sm:$0xff] %vm2870_vm0, %v3122_v58  ;;  %v2640_v51 = vadd.f32 %v2512_v40, %v1871_v53  ;;  %v2635_v35 = vadd.f32 %v2507_v23, %v1866_v52  ;;  %v977_v53 = vmul.f32 %v4695_v8, %v6314_v31  ;;  %v6315_v52 = vld [vmem:[#allocation51_spill] sm:$0xff] }
 0x363   : > { %v3126_v2 = vpop.eup %3125  ;;  %2894 = vst.msk [vmem:[%s4736_s25 + $0xb8] sm:$0xff] %vm2870_vm0, %v3124_v55  ;;  %3127 = vtanh.f32 %v2630_v11  ;;  %v972_v40 = vmul.f32 %v4695_v8, %v6315_v52  ;;  %v1749_v11 = vmul.f32 %v4697_v14, %v4409_v24  ;;  %v1744_v55 = vmul.f32 %v4697_v14, %v4420_v57 }
 0x364   : > { %2889 = vst.msk [vmem:[%s4736_s25 + $0x90] sm:$0xff] %vm2870_vm0, %v3126_v2  ;;  %3129 = vtanh.f32 %v2640_v51  ;;  %2218 = vperm.xlu1 %3085, %v3405_v61   ;;  %v1098_v20 = vadd.f32 %v4704_v17, %v967_v63  ;;  %v1108_v32 = vadd.f32 %v4704_v17, %v977_v53  ;;  %v3411_v63 = vld [vmem:[%s3520_s18 + $0x218] sm:$0xff] }
 0x365   : > { %3131 = vtanh.f32 %v2635_v35  ;;  %2222 = vperm.xlu2 %3083, %v3406_v38   ;;  %2238 = vperm.xlu0 %3084, %v3407_v22   ;;  %v1103_v51 = vadd.f32 %v4704_v17, %v972_v40  ;;  %v6316_v22 = vld [vmem:[#allocation44_spill] sm:$0xff] }
 0x366   : > { %v2051_v27 = vpop.permute.xlu1 %2050  ;;  %v1867_v35 = vadd.f32 %v1739_v60, %v1098_v20  ;;  %v1877_v1 = vadd.f32 %v1749_v11, %v1108_v32  ;;  %v970_v39 = vmul.f32 %v4695_v8, %v6316_v22  ;;  %v6320_v32 = vld [vmem:[#allocation49_spill] sm:$0xff] }
 0x367   : > { %v2505_v37 = vmul.f32 %v4709_v62, %v2051_v27  ;;  %v2091_v44 = vpop.permute.xlu2 %2090  ;;  %v2071_v47 = vpop.permute.xlu0 %2070  ;;  %v1872_v29 = vadd.f32 %v1744_v55, %v1103_v51  ;;  %v983_v51 = vmul.f32 %v4695_v8, %v6320_v32  ;;  %v3415_v22 = vld [vmem:[%s3520_s18 + $0x238] sm:$0xff] }
 0x368   : > { %v2515_v36 = vmul.f32 %v4709_v62, %v2091_v44  ;;  %v2510_v43 = vmul.f32 %v4709_v62, %v2071_v47  ;;  %v6318_v44 = vld [vmem:[#allocation57_spill] sm:$0xff] }
 0x369   : > { %v3128_v48 = vpop.eup %3127  ;;  %v2633_v0 = vadd.f32 %v2505_v37, %v1864_v56  ;;  %v6317_v56 = vld [vmem:[#allocation43_spill] sm:$0xff]  ;;  %v975_v47 = vmul.f32 %v4695_v8, %v6318_v44 }
 0x36a   : > { %v3130_v46 = vpop.eup %3129  ;;  %2887 = vst.msk [vmem:[%s4736_s25 + $0x80] sm:$0xff] %vm2870_vm0, %v3128_v48  ;;  %v2643_v23 = vadd.f32 %v2515_v36, %v1874_v42  ;;  %v2638_v58 = vadd.f32 %v2510_v43, %v1869_v3  ;;  %v980_v37 = vmul.f32 %v4695_v8, %v6317_v56  ;;  %v1742_v43 = vmul.f32 %v4697_v14, %v4416_v16  ;;  %v3413_v16 = vld [vmem:[%s3520_s18 + $0x240] sm:$0xff] }
 0x36b   : > { %v3132_v54 = vpop.eup %3131  ;;  %2897 = vst.msk [vmem:[%s4736_s25 + $0xd0] sm:$0xff] %vm2870_vm0, %v3130_v46  ;;  %3133 = vtanh.f32 %v2633_v0  ;;  %v1752_v48 = vmul.f32 %v4697_v14, %v4418_v21  ;;  %v1101_v0 = vadd.f32 %v4704_v17, %v970_v39  ;;  %v3412_v46 = vld [vmem:[%s3520_s18 + $0x220] sm:$0xff]  ;;  %v1106_v53 = vadd.f32 %v4704_v17, %v975_v47 }
 0x36c   : > { %2892 = vst.msk [vmem:[%s4736_s25 + $0xa8] sm:$0xff] %vm2870_vm0, %v3132_v54  ;;  %3135 = vtanh.f32 %v2643_v23  ;;  %2230 = vperm.xlu1 %3085, %v3408_v59   ;;  %v1111_v31 = vadd.f32 %v4704_v17, %v980_v37  ;;  %v6319_v59 = vld [vmem:[#allocation50_spill] sm:$0xff]  ;;  %v1114_v39 = vadd.f32 %v4704_v17, %v983_v51 }
 0x36d   : > { %3137 = vtanh.f32 %v2638_v58  ;;  %2234 = vperm.xlu2 %3083, %v3409_v41   ;;  %2250 = vperm.xlu0 %3084, %v3410_v19   ;;  %v1870_v52 = vadd.f32 %v1742_v43, %v1101_v0  ;;  %v1875_v54 = vadd.f32 %v1747_v25, %v1106_v53  ;;  %v973_v20 = vmul.f32 %v4695_v8, %v6319_v59  ;;  %v6322_v43 = vld [vmem:[#allocation56_spill] sm:$0xff]  ;;  %v6323_v0 = vld [vmem:[#allocation55_spill] sm:$0xff] }
 0x36e   : > { %v2063_v24 = vpop.permute.xlu1 %2062  ;;  %v1880_v58 = vadd.f32 %v1752_v48, %v1111_v31  ;;  %v976_v48 = vmul.f32 %v4695_v8, %v6322_v43 }
 0x36f   : > { %v2508_v57 = vmul.f32 %v4709_v62, %v2063_v24  ;;  %v2103_v2 = vpop.permute.xlu2 %2102  ;;  %v2083_v49 = vpop.permute.xlu0 %2082  ;;  %v6321_v24 = vld [vmem:[#allocation63_spill] sm:$0xff] }
 0x370   : > { %v2518_v61 = vmul.f32 %v4709_v62, %v2103_v2  ;;  %v2513_v50 = vmul.f32 %v4709_v62, %v2083_v49 }
 0x371   : > { %v3134_v38 = vpop.eup %3133  ;;  %v2636_v45 = vadd.f32 %v2508_v57, %v1867_v35  ;;  %v978_v35 = vmul.f32 %v4695_v8, %v6321_v24 }
 0x372   : > { %v3136_v27 = vpop.eup %3135  ;;  %2890 = vst.msk [vmem:[%s4736_s25 + $0x98] sm:$0xff] %vm2870_vm0, %v3134_v38  ;;  %v2646_v42 = vadd.f32 %v2518_v61, %v1877_v1  ;;  %v2641_v3 = vadd.f32 %v2513_v50, %v1872_v29  ;;  %v1745_v1 = vmul.f32 %v4697_v14, %v4425_v13  ;;  %v1755_v29 = vmul.f32 %v4697_v14, %v4427_v18  ;;  %v3414_v50 = vld [vmem:[%s3520_s18 + $0x230] sm:$0xff]  ;;  %v3416_v13 = vld [vmem:[%s3520_s18 + $0x258] sm:$0xff] }
 0x373   : > { %v3138_v36 = vpop.eup %3137  ;;  %2900 = vst.msk [vmem:[%s4736_s25 + $0xe8] sm:$0xff] %vm2870_vm0, %v3136_v27  ;;  %3139 = vtanh.f32 %v2636_v45  ;;  %v1750_v61 = vmul.f32 %v4697_v14, %v4438_v28  ;;  %v1104_v38 = vadd.f32 %v4704_v17, %v973_v20  ;;  %v1109_v45 = vadd.f32 %v4704_v17, %v978_v35 }
 0x374   : > { %2895 = vst.msk [vmem:[%s4736_s25 + $0xc0] sm:$0xff] %vm2870_vm0, %v3138_v36  ;;  %3141 = vtanh.f32 %v2646_v42  ;;  %2242 = vperm.xlu1 %3085, %v3411_v63   ;;  %v1883_v44 = vadd.f32 %v1755_v29, %v1114_v39  ;;  %v6326_v29 = vld [vmem:[#allocation61_spill] sm:$0xff] }
 0x375   : > { %3143 = vtanh.f32 %v2641_v3  ;;  %2246 = vperm.xlu2 %3083, %v3412_v46   ;;  %2262 = vperm.xlu0 %3084, %v3413_v16   ;;  %v1873_v27 = vadd.f32 %v1745_v1, %v1104_v38  ;;  %v1878_v47 = vadd.f32 %v1750_v61, %v1109_v45  ;;  %v986_v46 = vmul.f32 %v4695_v8, %v6323_v0  ;;  %v6324_v16 = vld [vmem:[#allocation69_spill] sm:$0xff] }
 0x376   : > { %v2075_v21 = vpop.permute.xlu1 %2074  ;;  %v981_v31 = vmul.f32 %v4695_v8, %v6324_v16  ;;  %v989_v61 = vmul.f32 %v4695_v8, %v6326_v29  ;;  %v1751_v45 = vmul.f32 %v4697_v14, %v4443_v7  ;;  %v3422_v7 = vld [vmem:[%s3520_s18 + $0x288] sm:$0xff] }
 0x377   : > { %v2511_v34 = vmul.f32 %v4709_v62, %v2075_v21  ;;  %v2115_v40 = vpop.permute.xlu2 %2114  ;;  %v2095_v23 = vpop.permute.xlu0 %2094 }
 0x378   : > { %v2521_v60 = vmul.f32 %v4709_v62, %v2115_v40  ;;  %v2516_v11 = vmul.f32 %v4709_v62, %v2095_v23  ;;  %v1758_v40 = vmul.f32 %v4697_v14, %v4436_v15  ;;  %v1753_v23 = vmul.f32 %v4697_v14, %v4447_v33 }
 0x379   : > { %v3140_v55 = vpop.eup %3139  ;;  %v2639_v41 = vadd.f32 %v2511_v34, %v1870_v52  ;;  %v1748_v34 = vmul.f32 %v4697_v14, %v4434_v10  ;;  %v3419_v10 = vld [vmem:[%s3520_s18 + $0x270] sm:$0xff] }
 0x37a   : > { %v3142_v19 = vpop.eup %3141  ;;  %2893 = vst.msk [vmem:[%s4736_s25 + $0xb0] sm:$0xff] %vm2870_vm0, %v3140_v55  ;;  %v2649_v57 = vadd.f32 %v2521_v60, %v1880_v58  ;;  %v2644_v2 = vadd.f32 %v2516_v11, %v1875_v54  ;;  %v3417_v58 = vld [vmem:[%s3520_s18 + $0x248] sm:$0xff]  ;;  %v1107_v54 = vadd.f32 %v4704_v17, %v976_v48  ;;  %v3418_v60 = vld [vmem:[%s3520_s18 + $0x250] sm:$0xff]  ;;  %v1117_v11 = vadd.f32 %v4704_v17, %v986_v46 }
 0x37b   : > { %v3144_v49 = vpop.eup %3143  ;;  %2903 = vst.msk [vmem:[%s4736_s25 + $0x100] sm:$0xff] %vm2870_vm0, %v3142_v19  ;;  %3145 = vtanh.f32 %v2639_v41  ;;  %v1112_v55 = vadd.f32 %v4704_v17, %v981_v31  ;;  %v6328_v46 = vld [vmem:[#allocation68_spill] sm:$0xff] }
 0x37c   : > { %2898 = vst.msk [vmem:[%s4736_s25 + $0xd8] sm:$0xff] %vm2870_vm0, %v3144_v49  ;;  %3147 = vtanh.f32 %v2649_v57  ;;  %2254 = vperm.xlu1 %3085, %v3414_v50   ;;  %v1876_v59 = vadd.f32 %v1748_v34, %v1107_v54  ;;  %v1886_v19 = vadd.f32 %v1758_v40, %v1117_v11  ;;  %v6325_v57 = vld [vmem:[#allocation62_spill] sm:$0xff]  ;;  %v6327_v50 = vld [vmem:[#allocation75_spill] sm:$0xff]  ;;  %v982_v16 = vmul.f32 %v4695_v8, %v6328_v46  ;;  %v6330_v34 = vld [vmem:[#allocation81_spill] sm:$0xff] }
 0x37d   : > { %3149 = vtanh.f32 %v2644_v2  ;;  %2258 = vperm.xlu2 %3083, %v3415_v22   ;;  %2274 = vperm.xlu0 %3084, %v3416_v13   ;;  %v1881_v32 = vadd.f32 %v1753_v23, %v1112_v55  ;;  %v979_v2 = vmul.f32 %v4695_v8, %v6325_v57  ;;  %v984_v38 = vmul.f32 %v4695_v8, %v6327_v50  ;;  %v3423_v55 = vld [vmem:[%s3520_s18 + $0x278] sm:$0xff] }
 0x37e   : > { %v2087_v18 = vpop.permute.xlu1 %2086  ;;  %v987_v40 = vmul.f32 %v4695_v8, %v6330_v34  ;;  %v1759_v11 = vmul.f32 %v4697_v14, %v4465_v26  ;;  %v6332_v50 = vld [vmem:[#allocation73_spill] sm:$0xff] }
 0x37f   : > { %v2514_v28 = vmul.f32 %v4709_v62, %v2087_v18  ;;  %v2127_v56 = vpop.permute.xlu2 %2126  ;;  %v2107_v37 = vpop.permute.xlu0 %2106  ;;  %v1761_v18 = vmul.f32 %v4697_v14, %v4445_v12  ;;  %v6337_v34 = vld [vmem:[#allocation93_spill] sm:$0xff] }
 0x380   : > { %v2524_v42 = vmul.f32 %v4709_v62, %v2127_v56  ;;  %v2519_v3 = vmul.f32 %v4709_v62, %v2107_v37  ;;  %v1110_v56 = vadd.f32 %v4704_v17, %v979_v2  ;;  %v3421_v37 = vld [vmem:[%s3520_s18 + $0x268] sm:$0xff] }
 0x381   : > { %v3146_v36 = vpop.eup %3145  ;;  %v2642_v25 = vadd.f32 %v2514_v28, %v1873_v27  ;;  %v1756_v27 = vmul.f32 %v4697_v14, %v4456_v30  ;;  %v3420_v28 = vld [vmem:[%s3520_s18 + $0x260] sm:$0xff] }
 0x382   : > { %v3148_v63 = vpop.eup %3147  ;;  %2896 = vst.msk [vmem:[%s4736_s25 + $0xc8] sm:$0xff] %vm2870_vm0, %v3146_v36  ;;  %v2652_v53 = vadd.f32 %v2524_v42, %v1883_v44  ;;  %v2647_v21 = vadd.f32 %v2519_v3, %v1878_v47  ;;  %v1120_v44 = vadd.f32 %v4704_v17, %v989_v61  ;;  %v1115_v47 = vadd.f32 %v4704_v17, %v984_v38 }
 0x383   : > { %v3150_v52 = vpop.eup %3149  ;;  %2906 = vst.msk [vmem:[%s4736_s25 + $0x118] sm:$0xff] %vm2870_vm0, %v3148_v63  ;;  %3151 = vtanh.f32 %v2642_v25  ;;  %v1879_v42 = vadd.f32 %v1751_v45, %v1110_v56  ;;  %v995_v38 = vmul.f32 %v4695_v8, %v6332_v50  ;;  %v6334_v56 = vld [vmem:[#allocation24_spill] sm:$0xff]  ;;  %v6341_v50 = vld [vmem:[#allocation86_spill] sm:$0xff] }
 0x384   : > { %2901 = vst.msk [vmem:[%s4736_s25 + $0xf0] sm:$0xff] %vm2870_vm0, %v3150_v52  ;;  %3153 = vtanh.f32 %v2652_v53  ;;  %2266 = vperm.xlu1 %3085, %v3417_v58   ;;  %v1889_v43 = vadd.f32 %v1761_v18, %v1120_v44  ;;  %v1884_v48 = vadd.f32 %v1756_v27, %v1115_v47  ;;  %v1757_v27 = vmul.f32 %v4697_v14, %v4461_v5  ;;  %v3427_v47 = vld [vmem:[%s3520_s18 + $0x298] sm:$0xff] }
 0x385   : > { %3155 = vtanh.f32 %v2647_v21  ;;  %2270 = vperm.xlu2 %3083, %v3418_v60   ;;  %2286 = vperm.xlu0 %3084, %v3419_v10   ;;  %v6329_v21 = vld [vmem:[#allocation67_spill] sm:$0xff]  ;;  %v1754_v60 = vmul.f32 %v4697_v14, %v4452_v4  ;;  %v1764_v10 = vmul.f32 %v4697_v14, %v4454_v9  ;;  %v3425_v4 = vld [vmem:[%s3520_s18 + $0x2a0] sm:$0xff]  ;;  %v3428_v5 = vld [vmem:[%s3520_s18 + $0x2b8] sm:$0xff] }
 0x386   : > { %v2099_v15 = vpop.permute.xlu1 %2098  ;;  %v992_v52 = vmul.f32 %v4695_v8, %v6329_v21  ;;  %v6336_v21 = vld [vmem:[#allocation79_spill] sm:$0xff] }
 0x387   : > { %v2517_v33 = vmul.f32 %v4709_v62, %v2099_v15  ;;  %v2139_v20 = vpop.permute.xlu2 %2138  ;;  %v2119_v41 = vpop.permute.xlu0 %2118  ;;  %v1113_v15 = vadd.f32 %v4704_v17, %v982_v16  ;;  %v6335_v16 = vld [vmem:[#allocation80_spill] sm:$0xff] }
 0x388   : > { %v2527_v51 = vmul.f32 %v4709_v62, %v2139_v20  ;;  %v2522_v24 = vmul.f32 %v4709_v62, %v2119_v41  ;;  %v1118_v20 = vadd.f32 %v4704_v17, %v987_v40  ;;  %v993_v40 = vmul.f32 %v4695_v8, %v6337_v34  ;;  %v6347_v34 = vld [vmem:[#allocation92_spill] sm:$0xff] }
 0x389   : > { %v3152_v35 = vpop.eup %3151  ;;  %v2645_v49 = vadd.f32 %v2517_v33, %v1876_v59  ;;  %v3424_v59 = vld [vmem:[%s3520_s18 + $0x280] sm:$0xff]  ;;  %v1123_v33 = vadd.f32 %v4704_v17, %v992_v52  ;;  %v1882_v41 = vadd.f32 %v1754_v60, %v1113_v15  ;;  %v998_v52 = vmul.f32 %v4695_v8, %v6336_v21 }
 0x38a   : > { %v3154_v1 = vpop.eup %3153  ;;  %2899 = vst.msk [vmem:[%s4736_s25 + $0xe0] sm:$0xff] %vm2870_vm0, %v3152_v35  ;;  %v2655_v22 = vadd.f32 %v2527_v51, %v1886_v19  ;;  %v2650_v13 = vadd.f32 %v2522_v24, %v1881_v32  ;;  %v1887_v24 = vadd.f32 %v1759_v11, %v1118_v20  ;;  %v6338_v60 = vld [vmem:[#allocation18_spill] sm:$0xff]  ;;  %v6339_v11 = vld [vmem:[#allocation17_spill] sm:$0xff] }
 0x38b   : > { %v3156_v39 = vpop.eup %3155  ;;  %2909 = vst.msk [vmem:[%s4736_s25 + $0x130] sm:$0xff] %vm2870_vm0, %v3154_v1  ;;  %3157 = vtanh.f32 %v2645_v49  ;;  %v1892_v51 = vadd.f32 %v1764_v10, %v1123_v33  ;;  %v6331_v49 = vld [vmem:[#allocation74_spill] sm:$0xff]  ;;  %v1760_v10 = vmul.f32 %v4697_v14, %v6338_v60 }
 0x38c   : > { %2904 = vst.msk [vmem:[%s4736_s25 + $0x108] sm:$0xff] %vm2870_vm0, %v3156_v39  ;;  %3159 = vtanh.f32 %v2655_v22  ;;  %2278 = vperm.xlu1 %3085, %v3420_v28   ;;  %v985_v1 = vmul.f32 %v4695_v8, %v6331_v49  ;;  %v6333_v22 = vld [vmem:[#allocation87_spill] sm:$0xff]  ;;  %v1767_v28 = vmul.f32 %v4697_v14, %v4463_v6  ;;  %v6340_v15 = vld [vmem:[#allocation30_spill] sm:$0xff] }
 0x38d   : > { %3161 = vtanh.f32 %v2650_v13  ;;  %2282 = vperm.xlu2 %3083, %v3421_v37   ;;  %2298 = vperm.xlu0 %3084, %v3422_v7   ;;  %v990_v13 = vmul.f32 %v4695_v8, %v6333_v22  ;;  %v1762_v37 = vmul.f32 %v4697_v14, %v6334_v56  ;;  %v3426_v7 = vld [vmem:[%s3520_s18 + $0x290] sm:$0xff]  ;;  %v5167_v33 = vld [vmem:[%s5862_s2] ss:$0 sm:$0xff] }
 0x38e   : > { %v2111_v12 = vpop.permute.xlu1 %2110  ;;  %v1116_v44 = vadd.f32 %v4704_v17, %v985_v1 }
 0x38f   : > { %v2520_v30 = vmul.f32 %v4709_v62, %v2111_v12  ;;  %v2151_v3 = vpop.permute.xlu2 %2150  ;;  %v2131_v36 = vpop.permute.xlu0 %2130  ;;  %v1126_v12 = vadd.f32 %v4704_v17, %v995_v38  ;;  %v991_v38 = vmul.f32 %v4695_v8, %v6341_v50 }
 0x390   : > { %v2530_v25 = vmul.f32 %v4709_v62, %v2151_v3  ;;  %v2525_v63 = vmul.f32 %v4709_v62, %v2131_v36 }
 0x391   : > { %v3158_v0 = vpop.eup %3157  ;;  %v2648_v31 = vadd.f32 %v2520_v30, %v1879_v42  ;;  %v1121_v42 = vadd.f32 %v4704_v17, %v990_v13  ;;  %v1885_v30 = vadd.f32 %v1757_v27, %v1116_v44 }
 0x392   : > { %v3160_v53 = vpop.eup %3159  ;;  %2902 = vst.msk [vmem:[%s4736_s25 + $0xf8] sm:$0xff] %vm2870_vm0, %v3158_v0  ;;  %v2658_v23 = vadd.f32 %v2530_v25, %v1889_v43  ;;  %v2653_v58 = vadd.f32 %v2525_v63, %v1884_v48  ;;  %v1895_v48 = vadd.f32 %v1767_v28, %v1126_v12  ;;  %v6346_v12 = vld [vmem:[#allocation36_spill] sm:$0xff] }
 0x393   : > { %v3162_v54 = vpop.eup %3161  ;;  %2912 = vst.msk [vmem:[%s4736_s25 + $0x148] sm:$0xff] %vm2870_vm0, %v3160_v53  ;;  %3163 = vtanh.f32 %v2648_v31  ;;  %v1890_v25 = vadd.f32 %v1762_v37, %v1121_v42  ;;  %v988_v31 = vmul.f32 %v4695_v8, %v6335_v16  ;;  %v1768_v42 = vmul.f32 %v4697_v14, %v6346_v12 }
 0x394   : > { %2907 = vst.msk [vmem:[%s4736_s25 + $0x120] sm:$0xff] %vm2870_vm0, %v3162_v54  ;;  %3165 = vtanh.f32 %v2658_v23  ;;  %2290 = vperm.xlu1 %3085, %v3423_v55   ;;  %v1770_v55 = vmul.f32 %v4697_v14, %v6339_v11 }
 0x395   : > { %3167 = vtanh.f32 %v2653_v58  ;;  %2294 = vperm.xlu2 %3083, %v3424_v59   ;;  %2310 = vperm.xlu0 %3084, %v3425_v4   ;;  %v1765_v59 = vmul.f32 %v4697_v14, %v6340_v15  ;;  %v3429_v4 = vld [vmem:[%s3520_s18 + $0x2a8] sm:$0xff]  ;;  %v1119_v20 = vadd.f32 %v5167_v33, %v988_v31 }
 0x396   : > { %v2123_v9 = vpop.permute.xlu1 %2122 }
 0x397   : > { %v2523_v26 = vmul.f32 %v4709_v62, %v2123_v9  ;;  %v2163_v19 = vpop.permute.xlu2 %2162  ;;  %v2143_v32 = vpop.permute.xlu0 %2142  ;;  %v3431_v9 = vld [vmem:[%s3520_s18 + $0x2b0] sm:$0xff] }
 0x398   : > { %v2533_v35 = vmul.f32 %v4709_v62, %v2163_v19  ;;  %v2528_v57 = vmul.f32 %v4709_v62, %v2143_v32  ;;  %v1124_v19 = vadd.f32 %v5167_v33, %v993_v40  ;;  %v994_v40 = vmul.f32 %v4695_v8, %v6347_v34 }
 0x399   : > { %v3164_v2 = vpop.eup %3163  ;;  %v2651_v29 = vadd.f32 %v2523_v26, %v1882_v41  ;;  %v3432_v41 = vld [vmem:[%s3520_s18 + $0x2d0] sm:$0xff]  ;;  %v1129_v26 = vadd.f32 %v5167_v33, %v998_v52 }
 0x39a   : > { %v3166_v61 = vpop.eup %3165  ;;  %2905 = vst.msk [vmem:[%s4736_s25 + $0x110] sm:$0xff] %vm2870_vm0, %v3164_v2  ;;  %v2661_v39 = vadd.f32 %v2533_v35, %v1892_v51  ;;  %v2656_v45 = vadd.f32 %v2528_v57, %v1887_v24  ;;  %v1888_v51 = vadd.f32 %v1760_v10, %v1119_v20  ;;  %v1893_v49 = vadd.f32 %v1765_v59, %v1124_v19  ;;  %v6349_v10 = vld [vmem:[#allocation105_spill] sm:$0xff] }
 0x39b   : > { %v3168_v18 = vpop.eup %3167  ;;  %2915 = vst.msk [vmem:[%s4736_s25 + $0x160] sm:$0xff] %vm2870_vm0, %v3166_v61  ;;  %3169 = vtanh.f32 %v2651_v29  ;;  %v1898_v2 = vadd.f32 %v1770_v55, %v1129_v26  ;;  %v999_v11 = vmul.f32 %v4695_v8, %v6349_v10  ;;  %v6352_v26 = vld [vmem:[#allocation42_spill] sm:$0xff]  ;;  %v6359_v10 = vld [vmem:[#allocation104_spill] sm:$0xff] }
 0x39c   : > { %2910 = vst.msk [vmem:[%s4736_s25 + $0x138] sm:$0xff] %vm2870_vm0, %v3168_v18  ;;  %3171 = vtanh.f32 %v2661_v39  ;;  %2302 = vperm.xlu1 %3085, %v3426_v7   ;;  %v6342_v39 = vld [vmem:[#allocation85_spill] sm:$0xff]  ;;  %v6343_v18 = vld [vmem:[#allocation99_spill] sm:$0xff]  ;;  %v1771_v19 = vmul.f32 %v4697_v14, %v6352_v26 }
 0x39d   : > { %3173 = vtanh.f32 %v2656_v45  ;;  %2306 = vperm.xlu2 %3083, %v3427_v47   ;;  %2322 = vperm.xlu0 %3084, %v3428_v5   ;;  %v1001_v45 = vmul.f32 %v4695_v8, %v6342_v39  ;;  %v996_v27 = vmul.f32 %v4695_v8, %v6343_v18  ;;  %v6344_v7 = vld [vmem:[#allocation23_spill] sm:$0xff]  ;;  %v6345_v47 = vld [vmem:[#allocation22_spill] sm:$0xff] }
 0x39e   : > { %v2135_v6 = vpop.permute.xlu1 %2134  ;;  %v1763_v44 = vmul.f32 %v4697_v14, %v6344_v7  ;;  %v1773_v5 = vmul.f32 %v4697_v14, %v6345_v47  ;;  %v6353_v18 = vld [vmem:[#allocation98_spill] sm:$0xff] }
 0x39f   : > { %v2526_v3 = vmul.f32 %v4709_v62, %v2135_v6  ;;  %v2175_v36 = vpop.permute.xlu2 %2174  ;;  %v2155_v43 = vpop.permute.xlu0 %2154  ;;  %v3433_v6 = vld [vmem:[%s3520_s18 + $0x2c0] sm:$0xff] }
 0x3a0   : > { %v2536_v63 = vmul.f32 %v4709_v62, %v2175_v36  ;;  %v2531_v0 = vmul.f32 %v4709_v62, %v2155_v43  ;;  %v3435_v36 = vld [vmem:[%s3520_s18 + $0x2e8] sm:$0xff]  ;;  %v1132_v43 = vadd.f32 %v5167_v33, %v1001_v45 }
 0x3a1   : > { %v3170_v46 = vpop.eup %3169  ;;  %v2654_v17 = vadd.f32 %v2526_v3, %v1885_v30  ;;  %v1122_v30 = vadd.f32 %v5167_v33, %v991_v38  ;;  %v3434_v3 = vld [vmem:[%s3520_s18 + $0x2c8] sm:$0xff] }
 0x3a2   : > { %v3172_v53 = vpop.eup %3171  ;;  %2908 = vst.msk [vmem:[%s4736_s25 + $0x128] sm:$0xff] %vm2870_vm0, %v3170_v46  ;;  %v2664_v23 = vadd.f32 %v2536_v63, %v1895_v48  ;;  %v2659_v58 = vadd.f32 %v2531_v0, %v1890_v25  ;;  %v1127_v48 = vadd.f32 %v5167_v33, %v996_v27  ;;  %v1901_v31 = vadd.f32 %v1773_v5, %v1132_v43  ;;  %v6358_v43 = vld [vmem:[#allocation48_spill] sm:$0xff] }
 0x3a3   : > { %v3174_v54 = vpop.eup %3173  ;;  %2918 = vst.msk [vmem:[%s4736_s25 + $0x178] sm:$0xff] %vm2870_vm0, %v3172_v53  ;;  %3175 = vtanh.f32 %v2654_v17  ;;  %v1891_v63 = vadd.f32 %v1763_v44, %v1122_v30  ;;  %v997_v27 = vmul.f32 %v4695_v8, %v6353_v18  ;;  %v6355_v44 = vld [vmem:[#allocation111_spill] sm:$0xff] }
 0x3a4   : > { %2913 = vst.msk [vmem:[%s4736_s25 + $0x150] sm:$0xff] %vm2870_vm0, %v3174_v54  ;;  %3177 = vtanh.f32 %v2664_v23  ;;  %2314 = vperm.xlu1 %3085, %v3429_v4   ;;  %v1896_v17 = vadd.f32 %v1768_v42, %v1127_v48  ;;  %v6348_v54 = vld [vmem:[#allocation91_spill] sm:$0xff]  ;;  %v6350_v4 = vld [vmem:[#allocation29_spill] sm:$0xff]  ;;  %v1002_v47 = vmul.f32 %v4695_v8, %v6355_v44  ;;  %v1774_v48 = vmul.f32 %v4697_v14, %v6358_v43  ;;  %v6365_v44 = vld [vmem:[#allocation110_spill] sm:$0xff] }
 0x3a5   : > { %3179 = vtanh.f32 %v2659_v58  ;;  %2318 = vperm.xlu2 %3083, %v3431_v9   ;;  %2334 = vperm.xlu0 %3084, %v3432_v41   ;;  %v1004_v60 = vmul.f32 %v4695_v8, %v6348_v54  ;;  %v1766_v20 = vmul.f32 %v4697_v14, %v6350_v4  ;;  %v6351_v9 = vld [vmem:[#allocation28_spill] sm:$0xff] }
 0x3a6   : > { %v2147_v32 = vpop.permute.xlu1 %2146  ;;  %v1776_v41 = vmul.f32 %v4697_v14, %v6351_v9 }
 0x3a7   : > { %v2529_v24 = vmul.f32 %v4709_v62, %v2147_v32  ;;  %v2187_v35 = vpop.permute.xlu2 %2186  ;;  %v2167_v57 = vpop.permute.xlu0 %2166  ;;  %v3436_v32 = vld [vmem:[%s3520_s18 + $0x2d8] sm:$0xff] }
 0x3a8   : > { %v2539_v1 = vmul.f32 %v4709_v62, %v2187_v35  ;;  %v2534_v29 = vmul.f32 %v4709_v62, %v2167_v57  ;;  %v3438_v35 = vld [vmem:[%s3520_s18 + $0x300] sm:$0xff]  ;;  %v1135_v57 = vadd.f32 %v5167_v33, %v1004_v60 }
 0x3a9   : > { %v3176_v61 = vpop.eup %3175  ;;  %v2657_v22 = vadd.f32 %v2529_v24, %v1888_v51  ;;  %v1125_v51 = vadd.f32 %v5167_v33, %v994_v40  ;;  %v3437_v24 = vld [vmem:[%s3520_s18 + $0x2e0] sm:$0xff] }
 0x3aa   : > { %v3178_v13 = vpop.eup %3177  ;;  %2911 = vst.msk [vmem:[%s4736_s25 + $0x140] sm:$0xff] %vm2870_vm0, %v3176_v61  ;;  %v2667_v28 = vadd.f32 %v2539_v1, %v1898_v2  ;;  %v2662_v56 = vadd.f32 %v2534_v29, %v1893_v49  ;;  %v1130_v2 = vadd.f32 %v5167_v33, %v999_v11  ;;  %v1904_v38 = vadd.f32 %v1776_v41, %v1135_v57  ;;  %v6364_v57 = vld [vmem:[#allocation54_spill] sm:$0xff] }
 0x3ab   : > { %v3180_v37 = vpop.eup %3179  ;;  %2921 = vst.msk [vmem:[%s4736_s25 + $0x190] sm:$0xff] %vm2870_vm0, %v3178_v13  ;;  %3181 = vtanh.f32 %v2657_v22  ;;  %v1894_v1 = vadd.f32 %v1766_v20, %v1125_v51  ;;  %v1000_v11 = vmul.f32 %v4695_v8, %v6359_v10  ;;  %v6361_v20 = vld [vmem:[#allocation117_spill] sm:$0xff] }
 0x3ac   : > { %2916 = vst.msk [vmem:[%s4736_s25 + $0x168] sm:$0xff] %vm2870_vm0, %v3180_v37  ;;  %3183 = vtanh.f32 %v2667_v28  ;;  %2326 = vperm.xlu1 %3085, %v3433_v6   ;;  %v1899_v22 = vadd.f32 %v1771_v19, %v1130_v2  ;;  %v6354_v37 = vld [vmem:[#allocation97_spill] sm:$0xff]  ;;  %v6356_v6 = vld [vmem:[#allocation35_spill] sm:$0xff]  ;;  %v1005_v9 = vmul.f32 %v4695_v8, %v6361_v20  ;;  %v1777_v2 = vmul.f32 %v4697_v14, %v6364_v57  ;;  %v6371_v20 = vld [vmem:[#allocation116_spill] sm:$0xff] }
 0x3ad   : > { %3185 = vtanh.f32 %v2662_v56  ;;  %2330 = vperm.xlu2 %3083, %v3434_v3   ;;  %2346 = vperm.xlu0 %3084, %v3435_v36   ;;  %v1007_v7 = vmul.f32 %v4695_v8, %v6354_v37  ;;  %v1769_v30 = vmul.f32 %v4697_v14, %v6356_v6  ;;  %v6357_v3 = vld [vmem:[#allocation34_spill] sm:$0xff] }
 0x3ae   : > { %v2159_v25 = vpop.permute.xlu1 %2158  ;;  %v1779_v36 = vmul.f32 %v4697_v14, %v6357_v3 }
 0x3af   : > { %v2532_v0 = vmul.f32 %v4709_v62, %v2159_v25  ;;  %v2199_v46 = vpop.permute.xlu2 %2198  ;;  %v2179_v16 = vpop.permute.xlu0 %2178  ;;  %v3439_v25 = vld [vmem:[%s3520_s18 + $0x2f0] sm:$0xff] }
 0x3b0   : > { %v2542_v53 = vmul.f32 %v4709_v62, %v2199_v46  ;;  %v2537_v21 = vmul.f32 %v4709_v62, %v2179_v16  ;;  %v3441_v46 = vld [vmem:[%s3520_s18 + $0x318] sm:$0xff]  ;;  %v1138_v16 = vadd.f32 %v5167_v33, %v1007_v7 }
 0x3b1   : > { %v3182_v52 = vpop.eup %3181  ;;  %v2660_v23 = vadd.f32 %v2532_v0, %v1891_v63  ;;  %v1128_v63 = vadd.f32 %v5167_v33, %v997_v27  ;;  %v3440_v0 = vld [vmem:[%s3520_s18 + $0x2f8] sm:$0xff] }
 0x3b2   : > { %v3184_v58 = vpop.eup %3183  ;;  %2914 = vst.msk [vmem:[%s4736_s25 + $0x158] sm:$0xff] %vm2870_vm0, %v3182_v52  ;;  %v2670_v55 = vadd.f32 %v2542_v53, %v1901_v31  ;;  %v2665_v15 = vadd.f32 %v2537_v21, %v1896_v17  ;;  %v1133_v31 = vadd.f32 %v5167_v33, %v1002_v47  ;;  %v1907_v40 = vadd.f32 %v1779_v36, %v1138_v16  ;;  %v6370_v16 = vld [vmem:[#allocation60_spill] sm:$0xff] }
 0x3b3   : > { %v3186_v59 = vpop.eup %3185  ;;  %2924 = vst.msk [vmem:[%s4736_s25 + $0x1a8] sm:$0xff] %vm2870_vm0, %v3184_v58  ;;  %3187 = vtanh.f32 %v2660_v23  ;;  %v1897_v53 = vadd.f32 %v1769_v30, %v1128_v63  ;;  %v1003_v47 = vmul.f32 %v4695_v8, %v6365_v44  ;;  %v6367_v30 = vld [vmem:[#allocation123_spill] sm:$0xff] }
 0x3b4   : > { %2919 = vst.msk [vmem:[%s4736_s25 + $0x180] sm:$0xff] %vm2870_vm0, %v3186_v59  ;;  %3189 = vtanh.f32 %v2670_v55  ;;  %2338 = vperm.xlu1 %3085, %v3436_v32   ;;  %v1902_v23 = vadd.f32 %v1774_v48, %v1133_v31  ;;  %v6360_v59 = vld [vmem:[#allocation103_spill] sm:$0xff]  ;;  %v6362_v32 = vld [vmem:[#allocation41_spill] sm:$0xff]  ;;  %v1008_v3 = vmul.f32 %v4695_v8, %v6367_v30  ;;  %v1780_v31 = vmul.f32 %v4697_v14, %v6370_v16  ;;  %v6377_v30 = vld [vmem:[#allocation122_spill] sm:$0xff] }
 0x3b5   : > { %3191 = vtanh.f32 %v2665_v15  ;;  %2342 = vperm.xlu2 %3083, %v3437_v24   ;;  %2358 = vperm.xlu0 %3084, %v3438_v35   ;;  %v1010_v4 = vmul.f32 %v4695_v8, %v6360_v59  ;;  %v1772_v51 = vmul.f32 %v4697_v14, %v6362_v32  ;;  %v6363_v24 = vld [vmem:[#allocation40_spill] sm:$0xff] }
 0x3b6   : > { %v2171_v49 = vpop.permute.xlu1 %2170  ;;  %v1782_v35 = vmul.f32 %v4697_v14, %v6363_v24 }
 0x3b7   : > { %v2535_v29 = vmul.f32 %v4709_v62, %v2171_v49  ;;  %v2211_v61 = vpop.permute.xlu2 %2210  ;;  %v2191_v50 = vpop.permute.xlu0 %2190  ;;  %v3442_v49 = vld [vmem:[%s3520_s18 + $0x308] sm:$0xff] }
 0x3b8   : > { %v2545_v13 = vmul.f32 %v4709_v62, %v2211_v61  ;;  %v2540_v39 = vmul.f32 %v4709_v62, %v2191_v50  ;;  %v3444_v61 = vld [vmem:[%s3520_s18 + $0x330] sm:$0xff]  ;;  %v1141_v50 = vadd.f32 %v5167_v33, %v1010_v4 }
 0x3b9   : > { %v3188_v45 = vpop.eup %3187  ;;  %v2663_v28 = vadd.f32 %v2535_v29, %v1894_v1  ;;  %v1131_v1 = vadd.f32 %v5167_v33, %v1000_v11  ;;  %v3443_v29 = vld [vmem:[%s3520_s18 + $0x310] sm:$0xff] }
 0x3ba   : > { %v3190_v56 = vpop.eup %3189  ;;  %2917 = vst.msk [vmem:[%s4736_s25 + $0x170] sm:$0xff] %vm2870_vm0, %v3188_v45  ;;  %v2673_v5 = vadd.f32 %v2545_v13, %v1904_v38  ;;  %v2668_v12 = vadd.f32 %v2540_v39, %v1899_v22  ;;  %v1136_v38 = vadd.f32 %v5167_v33, %v1005_v9  ;;  %v1910_v27 = vadd.f32 %v1782_v35, %v1141_v50  ;;  %v6376_v50 = vld [vmem:[#allocation66_spill] sm:$0xff] }
 0x3bb   : > { %v3192_v42 = vpop.eup %3191  ;;  %2927 = vst.msk [vmem:[%s4736_s25 + $0x1c0] sm:$0xff] %vm2870_vm0, %v3190_v56  ;;  %3193 = vtanh.f32 %v2663_v28  ;;  %v1900_v13 = vadd.f32 %v1772_v51, %v1131_v1  ;;  %v1006_v9 = vmul.f32 %v4695_v8, %v6371_v20  ;;  %v6373_v51 = vld [vmem:[#allocation129_spill] sm:$0xff] }
 0x3bc   : > { %2922 = vst.msk [vmem:[%s4736_s25 + $0x198] sm:$0xff] %vm2870_vm0, %v3192_v42  ;;  %3195 = vtanh.f32 %v2673_v5  ;;  %2350 = vperm.xlu1 %3085, %v3439_v25   ;;  %v1905_v28 = vadd.f32 %v1777_v2, %v1136_v38  ;;  %v6366_v42 = vld [vmem:[#allocation109_spill] sm:$0xff]  ;;  %v6368_v25 = vld [vmem:[#allocation47_spill] sm:$0xff]  ;;  %v1011_v24 = vmul.f32 %v4695_v8, %v6373_v51  ;;  %v1783_v38 = vmul.f32 %v4697_v14, %v6376_v50  ;;  %v6383_v51 = vld [vmem:[#allocation128_spill] sm:$0xff] }
 0x3bd   : > { %3197 = vtanh.f32 %v2668_v12  ;;  %2354 = vperm.xlu2 %3083, %v3440_v0   ;;  %2370 = vperm.xlu0 %3084, %v3441_v46   ;;  %v1013_v6 = vmul.f32 %v4695_v8, %v6366_v42  ;;  %v1775_v63 = vmul.f32 %v4697_v14, %v6368_v25  ;;  %v6369_v0 = vld [vmem:[#allocation46_spill] sm:$0xff] }
 0x3be   : > { %v2183_v17 = vpop.permute.xlu1 %2182  ;;  %v1785_v46 = vmul.f32 %v4697_v14, %v6369_v0 }
 0x3bf   : > { %v2538_v21 = vmul.f32 %v4709_v62, %v2183_v17  ;;  %v2223_v52 = vpop.permute.xlu2 %2222  ;;  %v2203_v34 = vpop.permute.xlu0 %2202  ;;  %v3445_v17 = vld [vmem:[%s3520_s18 + $0x320] sm:$0xff] }
 0x3c0   : > { %v2548_v58 = vmul.f32 %v4709_v62, %v2223_v52  ;;  %v2543_v54 = vmul.f32 %v4709_v62, %v2203_v34  ;;  %v3447_v52 = vld [vmem:[%s3520_s18 + $0x348] sm:$0xff]  ;;  %v1144_v34 = vadd.f32 %v5167_v33, %v1013_v6 }
 0x3c1   : > { %v3194_v60 = vpop.eup %3193  ;;  %v2666_v55 = vadd.f32 %v2538_v21, %v1897_v53  ;;  %v1134_v53 = vadd.f32 %v5167_v33, %v1003_v47  ;;  %v3446_v21 = vld [vmem:[%s3520_s18 + $0x328] sm:$0xff] }
 0x3c2   : > { %v3196_v15 = vpop.eup %3195  ;;  %2920 = vst.msk [vmem:[%s4736_s25 + $0x188] sm:$0xff] %vm2870_vm0, %v3194_v60  ;;  %v2676_v41 = vadd.f32 %v2548_v58, %v1907_v40  ;;  %v2671_v26 = vadd.f32 %v2543_v54, %v1902_v23  ;;  %v1139_v40 = vadd.f32 %v5167_v33, %v1008_v3  ;;  %v1913_v11 = vadd.f32 %v1785_v46, %v1144_v34  ;;  %v6382_v34 = vld [vmem:[#allocation72_spill] sm:$0xff] }
 0x3c3   : > { %v3198_v19 = vpop.eup %3197  ;;  %2930 = vst.msk [vmem:[%s4736_s25 + $0x1d8] sm:$0xff] %vm2870_vm0, %v3196_v15  ;;  %3199 = vtanh.f32 %v2666_v55  ;;  %v1903_v58 = vadd.f32 %v1775_v63, %v1134_v53  ;;  %v1009_v3 = vmul.f32 %v4695_v8, %v6377_v30  ;;  %v6379_v63 = vld [vmem:[#allocation135_spill] sm:$0xff] }
 0x3c4   : > { %2925 = vst.msk [vmem:[%s4736_s25 + $0x1b0] sm:$0xff] %vm2870_vm0, %v3198_v19  ;;  %3201 = vtanh.f32 %v2676_v41  ;;  %2362 = vperm.xlu1 %3085, %v3442_v49   ;;  %v1908_v55 = vadd.f32 %v1780_v31, %v1139_v40  ;;  %v6372_v19 = vld [vmem:[#allocation115_spill] sm:$0xff]  ;;  %v6374_v49 = vld [vmem:[#allocation53_spill] sm:$0xff]  ;;  %v1014_v0 = vmul.f32 %v4695_v8, %v6379_v63  ;;  %v1786_v40 = vmul.f32 %v4697_v14, %v6382_v34  ;;  %v6389_v63 = vld [vmem:[#allocation134_spill] sm:$0xff] }
 0x3c5   : > { %3203 = vtanh.f32 %v2671_v26  ;;  %2366 = vperm.xlu2 %3083, %v3443_v29   ;;  %2382 = vperm.xlu0 %3084, %v3444_v61   ;;  %v1016_v32 = vmul.f32 %v4695_v8, %v6372_v19  ;;  %v1778_v1 = vmul.f32 %v4697_v14, %v6374_v49  ;;  %v6375_v29 = vld [vmem:[#allocation52_spill] sm:$0xff] }
 0x3c6   : > { %v2195_v22 = vpop.permute.xlu1 %2194  ;;  %v1788_v61 = vmul.f32 %v4697_v14, %v6375_v29 }
 0x3c7   : > { %v2541_v39 = vmul.f32 %v4709_v62, %v2195_v22  ;;  %v2235_v45 = vpop.permute.xlu2 %2234  ;;  %v2215_v18 = vpop.permute.xlu0 %2214  ;;  %v3448_v22 = vld [vmem:[%s3520_s18 + $0x338] sm:$0xff] }
 0x3c8   : > { %v2551_v56 = vmul.f32 %v4709_v62, %v2235_v45  ;;  %v2546_v37 = vmul.f32 %v4709_v62, %v2215_v18  ;;  %v3450_v45 = vld [vmem:[%s3520_s18 + $0x360] sm:$0xff]  ;;  %v1147_v18 = vadd.f32 %v5167_v33, %v1016_v32 }
 0x3c9   : > { %v3200_v7 = vpop.eup %3199  ;;  %v2669_v5 = vadd.f32 %v2541_v39, %v1900_v13  ;;  %v1137_v13 = vadd.f32 %v5167_v33, %v1006_v9  ;;  %v3449_v39 = vld [vmem:[%s3520_s18 + $0x340] sm:$0xff] }
 0x3ca   : > { %v3202_v12 = vpop.eup %3201  ;;  %2923 = vst.msk [vmem:[%s4736_s25 + $0x1a0] sm:$0xff] %vm2870_vm0, %v3200_v7  ;;  %v2679_v36 = vadd.f32 %v2551_v56, %v1910_v27  ;;  %v2674_v43 = vadd.f32 %v2546_v37, %v1905_v28  ;;  %v1142_v27 = vadd.f32 %v5167_v33, %v1011_v24  ;;  %v1916_v47 = vadd.f32 %v1788_v61, %v1147_v18  ;;  %v6388_v18 = vld [vmem:[#allocation78_spill] sm:$0xff] }
 0x3cb   : > { %v3204_v48 = vpop.eup %3203  ;;  %2933 = vst.msk [vmem:[%s4736_s25 + $0x1f0] sm:$0xff] %vm2870_vm0, %v3202_v12  ;;  %3205 = vtanh.f32 %v2669_v5  ;;  %v1906_v56 = vadd.f32 %v1778_v1, %v1137_v13  ;;  %v1012_v24 = vmul.f32 %v4695_v8, %v6383_v51  ;;  %v6385_v1 = vld [vmem:[#allocation141_spill] sm:$0xff] }
 0x3cc   : > { %2928 = vst.msk [vmem:[%s4736_s25 + $0x1c8] sm:$0xff] %vm2870_vm0, %v3204_v48  ;;  %3207 = vtanh.f32 %v2679_v36  ;;  %2374 = vperm.xlu1 %3085, %v3445_v17   ;;  %v1911_v5 = vadd.f32 %v1783_v38, %v1142_v27  ;;  %v6378_v48 = vld [vmem:[#allocation121_spill] sm:$0xff]  ;;  %v6380_v17 = vld [vmem:[#allocation59_spill] sm:$0xff]  ;;  %v1017_v29 = vmul.f32 %v4695_v8, %v6385_v1  ;;  %v1789_v27 = vmul.f32 %v4697_v14, %v6388_v18  ;;  %v6395_v1 = vld [vmem:[#allocation140_spill] sm:$0xff] }
 0x3cd   : > { %3209 = vtanh.f32 %v2674_v43  ;;  %2378 = vperm.xlu2 %3083, %v3446_v21   ;;  %2394 = vperm.xlu0 %3084, %v3447_v52   ;;  %v1019_v25 = vmul.f32 %v4695_v8, %v6378_v48  ;;  %v1781_v53 = vmul.f32 %v4697_v14, %v6380_v17  ;;  %v6381_v21 = vld [vmem:[#allocation58_spill] sm:$0xff] }
 0x3ce   : > { %v2207_v23 = vpop.permute.xlu1 %2206  ;;  %v1791_v52 = vmul.f32 %v4697_v14, %v6381_v21 }
 0x3cf   : > { %v2544_v54 = vmul.f32 %v4709_v62, %v2207_v23  ;;  %v2247_v60 = vpop.permute.xlu2 %2246  ;;  %v2227_v10 = vpop.permute.xlu0 %2226  ;;  %v3451_v23 = vld [vmem:[%s3520_s18 + $0x350] sm:$0xff] }
 0x3d0   : > { %v2554_v15 = vmul.f32 %v4709_v62, %v2247_v60  ;;  %v2549_v59 = vmul.f32 %v4709_v62, %v2227_v10  ;;  %v3453_v60 = vld [vmem:[%s3520_s18 + $0x378] sm:$0xff]  ;;  %v1150_v10 = vadd.f32 %v5167_v33, %v1019_v25 }
 0x3d1   : > { %v3206_v4 = vpop.eup %3205  ;;  %v2672_v41 = vadd.f32 %v2544_v54, %v1903_v58  ;;  %v1140_v58 = vadd.f32 %v5167_v33, %v1009_v3  ;;  %v3452_v54 = vld [vmem:[%s3520_s18 + $0x358] sm:$0xff] }
 0x3d2   : > { %v3208_v26 = vpop.eup %3207  ;;  %2926 = vst.msk [vmem:[%s4736_s25 + $0x1b8] sm:$0xff] %vm2870_vm0, %v3206_v4  ;;  %v2682_v35 = vadd.f32 %v2554_v15, %v1913_v11  ;;  %v2677_v57 = vadd.f32 %v2549_v59, %v1908_v55  ;;  %v1145_v11 = vadd.f32 %v5167_v33, %v1014_v0  ;;  %v1919_v9 = vadd.f32 %v1791_v52, %v1150_v10  ;;  %v6394_v10 = vld [vmem:[#allocation84_spill] sm:$0xff] }
 0x3d3   : > { %v3210_v2 = vpop.eup %3209  ;;  %2936 = vst.msk [vmem:[%s4736_s25 + $0x208] sm:$0xff] %vm2870_vm0, %v3208_v26  ;;  %3211 = vtanh.f32 %v2672_v41  ;;  %v1909_v15 = vadd.f32 %v1781_v53, %v1140_v58  ;;  %v1015_v0 = vmul.f32 %v4695_v8, %v6389_v63  ;;  %v6391_v53 = vld [vmem:[#allocation147_spill] sm:$0xff] }
 0x3d4   : > { %2931 = vst.msk [vmem:[%s4736_s25 + $0x1e0] sm:$0xff] %vm2870_vm0, %v3210_v2  ;;  %3213 = vtanh.f32 %v2682_v35  ;;  %2386 = vperm.xlu1 %3085, %v3448_v22   ;;  %v1914_v41 = vadd.f32 %v1786_v40, %v1145_v11  ;;  %v6384_v2 = vld [vmem:[#allocation127_spill] sm:$0xff]  ;;  %v6386_v22 = vld [vmem:[#allocation65_spill] sm:$0xff]  ;;  %v1020_v21 = vmul.f32 %v4695_v8, %v6391_v53  ;;  %v1792_v11 = vmul.f32 %v4697_v14, %v6394_v10  ;;  %v6401_v53 = vld [vmem:[#allocation146_spill] sm:$0xff] }
 0x3d5   : > { %3215 = vtanh.f32 %v2677_v57  ;;  %2390 = vperm.xlu2 %3083, %v3449_v39   ;;  %2406 = vperm.xlu0 %3084, %v3450_v45   ;;  %v1022_v49 = vmul.f32 %v4695_v8, %v6384_v2  ;;  %v1784_v13 = vmul.f32 %v4697_v14, %v6386_v22  ;;  %v6387_v39 = vld [vmem:[#allocation64_spill] sm:$0xff] }
 0x3d6   : > { %v2219_v28 = vpop.permute.xlu1 %2218  ;;  %v1794_v45 = vmul.f32 %v4697_v14, %v6387_v39 }
 0x3d7   : > { %v2547_v37 = vmul.f32 %v4709_v62, %v2219_v28  ;;  %v2259_v7 = vpop.permute.xlu2 %2258  ;;  %v2239_v44 = vpop.permute.xlu0 %2238  ;;  %v3454_v28 = vld [vmem:[%s3520_s18 + $0x368] sm:$0xff] }
 0x3d8   : > { %v2557_v12 = vmul.f32 %v4709_v62, %v2259_v7  ;;  %v2552_v42 = vmul.f32 %v4709_v62, %v2239_v44  ;;  %v3456_v7 = vld [vmem:[%s3520_s18 + $0x390] sm:$0xff]  ;;  %v1153_v44 = vadd.f32 %v5167_v33, %v1022_v49 }
 0x3d9   : > { %v3212_v6 = vpop.eup %3211  ;;  %v2675_v36 = vadd.f32 %v2547_v37, %v1906_v56  ;;  %v1143_v56 = vadd.f32 %v5167_v33, %v1012_v24  ;;  %v3455_v37 = vld [vmem:[%s3520_s18 + $0x370] sm:$0xff] }
 0x3da   : > { %v3214_v43 = vpop.eup %3213  ;;  %2929 = vst.msk [vmem:[%s4736_s25 + $0x1d0] sm:$0xff] %vm2870_vm0, %v3212_v6  ;;  %v2685_v46 = vadd.f32 %v2557_v12, %v1916_v47  ;;  %v2680_v16 = vadd.f32 %v2552_v42, %v1911_v5  ;;  %v1148_v47 = vadd.f32 %v5167_v33, %v1017_v29  ;;  %v1922_v3 = vadd.f32 %v1794_v45, %v1153_v44  ;;  %v6400_v44 = vld [vmem:[#allocation90_spill] sm:$0xff] }
 0x3db   : > { %v3216_v31 = vpop.eup %3215  ;;  %2939 = vst.msk [vmem:[%s4736_s25 + $0x220] sm:$0xff] %vm2870_vm0, %v3214_v43  ;;  %3217 = vtanh.f32 %v2675_v36  ;;  %v1912_v12 = vadd.f32 %v1784_v13, %v1143_v56  ;;  %v1018_v29 = vmul.f32 %v4695_v8, %v6395_v1  ;;  %v6397_v13 = vld [vmem:[#allocation153_spill] sm:$0xff] }
 0x3dc   : > { %2934 = vst.msk [vmem:[%s4736_s25 + $0x1f8] sm:$0xff] %vm2870_vm0, %v3216_v31  ;;  %3219 = vtanh.f32 %v2685_v46  ;;  %2398 = vperm.xlu1 %3085, %v3451_v23   ;;  %v1917_v36 = vadd.f32 %v1789_v27, %v1148_v47  ;;  %v6390_v31 = vld [vmem:[#allocation133_spill] sm:$0xff]  ;;  %v6392_v23 = vld [vmem:[#allocation71_spill] sm:$0xff]  ;;  %v1023_v39 = vmul.f32 %v4695_v8, %v6397_v13  ;;  %v1795_v47 = vmul.f32 %v4697_v14, %v6400_v44  ;;  %v6407_v13 = vld [vmem:[#allocation152_spill] sm:$0xff] }
 0x3dd   : > { %3221 = vtanh.f32 %v2680_v16  ;;  %2402 = vperm.xlu2 %3083, %v3452_v54   ;;  %2418 = vperm.xlu0 %3084, %v3453_v60   ;;  %v1025_v17 = vmul.f32 %v4695_v8, %v6390_v31  ;;  %v1787_v58 = vmul.f32 %v4697_v14, %v6392_v23  ;;  %v6393_v54 = vld [vmem:[#allocation70_spill] sm:$0xff] }
 0x3de   : > { %v2231_v55 = vpop.permute.xlu1 %2230  ;;  %v1797_v60 = vmul.f32 %v4697_v14, %v6393_v54 }
 0x3df   : > { %v2550_v59 = vmul.f32 %v4709_v62, %v2231_v55  ;;  %v2271_v4 = vpop.permute.xlu2 %2270  ;;  %v2251_v20 = vpop.permute.xlu0 %2250  ;;  %v3457_v55 = vld [vmem:[%s3520_s18 + $0x380] sm:$0xff] }
 0x3e0   : > { %v2560_v26 = vmul.f32 %v4709_v62, %v2271_v4  ;;  %v2555_v19 = vmul.f32 %v4709_v62, %v2251_v20  ;;  %v3459_v4 = vld [vmem:[%s3520_s18 + $0x3a8] sm:$0xff]  ;;  %v1156_v20 = vadd.f32 %v5167_v33, %v1025_v17 }
 0x3e1   : > { %v3218_v32 = vpop.eup %3217  ;;  %v2678_v35 = vadd.f32 %v2550_v59, %v1909_v15  ;;  %v1146_v15 = vadd.f32 %v5167_v33, %v1015_v0  ;;  %v3458_v59 = vld [vmem:[%s3520_s18 + $0x388] sm:$0xff] }
 0x3e2   : > { %v3220_v57 = vpop.eup %3219  ;;  %2932 = vst.msk [vmem:[%s4736_s25 + $0x1e8] sm:$0xff] %vm2870_vm0, %v3218_v32  ;;  %v2688_v61 = vadd.f32 %v2560_v26, %v1919_v9  ;;  %v2683_v50 = vadd.f32 %v2555_v19, %v1914_v41  ;;  %v1151_v9 = vadd.f32 %v5167_v33, %v1020_v21  ;;  %v1925_v24 = vadd.f32 %v1797_v60, %v1156_v20  ;;  %v6406_v20 = vld [vmem:[#allocation96_spill] sm:$0xff] }
 0x3e3   : > { %v3222_v38 = vpop.eup %3221  ;;  %2942 = vst.msk [vmem:[%s4736_s25 + $0x238] sm:$0xff] %vm2870_vm0, %v3220_v57  ;;  %3223 = vtanh.f32 %v2678_v35  ;;  %v1915_v26 = vadd.f32 %v1787_v58, %v1146_v15  ;;  %v1021_v21 = vmul.f32 %v4695_v8, %v6401_v53  ;;  %v6403_v58 = vld [vmem:[#allocation158_spill] sm:$0xff] }
 0x3e4   : > { %2937 = vst.msk [vmem:[%s4736_s25 + $0x210] sm:$0xff] %vm2870_vm0, %v3222_v38  ;;  %3225 = vtanh.f32 %v2688_v61  ;;  %2410 = vperm.xlu1 %3085, %v3454_v28   ;;  %v1920_v35 = vadd.f32 %v1792_v11, %v1151_v9  ;;  %v6396_v38 = vld [vmem:[#allocation139_spill] sm:$0xff]  ;;  %v6398_v28 = vld [vmem:[#allocation77_spill] sm:$0xff]  ;;  %v1026_v54 = vmul.f32 %v4695_v8, %v6403_v58  ;;  %v1798_v9 = vmul.f32 %v4697_v14, %v6406_v20 }
 0x3e5   : > { %3227 = vtanh.f32 %v2683_v50  ;;  %2414 = vperm.xlu2 %3083, %v3455_v37   ;;  %2430 = vperm.xlu0 %3084, %v3456_v7   ;;  %v1028_v22 = vmul.f32 %v4695_v8, %v6396_v38  ;;  %v1790_v56 = vmul.f32 %v4697_v14, %v6398_v28  ;;  %v6399_v37 = vld [vmem:[#allocation76_spill] sm:$0xff]  ;;  %v6413_v58 = vld [vmem:[#allocation157_spill] sm:$0xff] }
 0x3e6   : > { %v2243_v5 = vpop.permute.xlu1 %2242  ;;  %v1800_v7 = vmul.f32 %v4697_v14, %v6399_v37 }
 0x3e7   : > { %v2553_v42 = vmul.f32 %v4709_v62, %v2243_v5  ;;  %v2283_v6 = vpop.permute.xlu2 %2282  ;;  %v2263_v30 = vpop.permute.xlu0 %2262  ;;  %v3460_v5 = vld [vmem:[%s3520_s18 + $0x398] sm:$0xff] }
 0x3e8   : > { %v2563_v43 = vmul.f32 %v4709_v62, %v2283_v6  ;;  %v2558_v48 = vmul.f32 %v4709_v62, %v2263_v30  ;;  %v3462_v6 = vld [vmem:[%s3520_s18 + $0x3c0] sm:$0xff]  ;;  %v1159_v30 = vadd.f32 %v5167_v33, %v1028_v22 }
 0x3e9   : > { %v3224_v25 = vpop.eup %3223  ;;  %v2681_v46 = vadd.f32 %v2553_v42, %v1912_v12  ;;  %v1149_v12 = vadd.f32 %v5167_v33, %v1018_v29  ;;  %v3461_v42 = vld [vmem:[%s3520_s18 + $0x3a0] sm:$0xff] }
 0x3ea   : > { %v3226_v16 = vpop.eup %3225  ;;  %2935 = vst.msk [vmem:[%s4736_s25 + $0x200] sm:$0xff] %vm2870_vm0, %v3224_v25  ;;  %v2691_v52 = vadd.f32 %v2563_v43, %v1922_v3  ;;  %v2686_v34 = vadd.f32 %v2558_v48, %v1917_v36  ;;  %v1154_v3 = vadd.f32 %v5167_v33, %v1023_v39  ;;  %v1928_v0 = vadd.f32 %v1800_v7, %v1159_v30  ;;  %v6412_v30 = vld [vmem:[#allocation102_spill] sm:$0xff] }
 0x3eb   : > { %v3228_v40 = vpop.eup %3227  ;;  %2945 = vst.msk [vmem:[%s4736_s25 + $0x250] sm:$0xff] %vm2870_vm0, %v3226_v16  ;;  %3229 = vtanh.f32 %v2681_v46  ;;  %v1918_v43 = vadd.f32 %v1790_v56, %v1149_v12  ;;  %v1024_v39 = vmul.f32 %v4695_v8, %v6407_v13  ;;  %v6409_v56 = vld [vmem:[#allocation162_spill] sm:$0xff] }
 0x3ec   : > { %2940 = vst.msk [vmem:[%s4736_s25 + $0x228] sm:$0xff] %vm2870_vm0, %v3228_v40  ;;  %3231 = vtanh.f32 %v2691_v52  ;;  %2422 = vperm.xlu1 %3085, %v3457_v55   ;;  %v1923_v46 = vadd.f32 %v1795_v47, %v1154_v3  ;;  %v6402_v40 = vld [vmem:[#allocation145_spill] sm:$0xff]  ;;  %v6404_v55 = vld [vmem:[#allocation83_spill] sm:$0xff]  ;;  %v1029_v37 = vmul.f32 %v4695_v8, %v6409_v56  ;;  %v1801_v3 = vmul.f32 %v4697_v14, %v6412_v30 }
 0x3ed   : > { %3233 = vtanh.f32 %v2686_v34  ;;  %2426 = vperm.xlu2 %3083, %v3458_v59   ;;  %2442 = vperm.xlu0 %3084, %v3459_v4   ;;  %v1031_v23 = vmul.f32 %v4695_v8, %v6402_v40  ;;  %v1793_v15 = vmul.f32 %v4697_v14, %v6404_v55  ;;  %v6405_v59 = vld [vmem:[#allocation82_spill] sm:$0xff] }
 0x3ee   : > { %v2255_v41 = vpop.permute.xlu1 %2254  ;;  %v1803_v4 = vmul.f32 %v4697_v14, %v6405_v59 }
 0x3ef   : > { %v2556_v19 = vmul.f32 %v4709_v62, %v2255_v41  ;;  %v2295_v32 = vpop.permute.xlu2 %2294  ;;  %v2275_v51 = vpop.permute.xlu0 %2274  ;;  %v3463_v41 = vld [vmem:[%s3520_s18 + $0x3b0] sm:$0xff] }
 0x3f0   : > { %v2566_v57 = vmul.f32 %v4709_v62, %v2295_v32  ;;  %v2561_v2 = vmul.f32 %v4709_v62, %v2275_v51  ;;  %v3465_v32 = vld [vmem:[%s3520_s18 + $0x3d8] sm:$0xff]  ;;  %v1162_v51 = vadd.f32 %v5167_v33, %v1031_v23 }
 0x3f1   : > { %v3230_v49 = vpop.eup %3229  ;;  %v2684_v61 = vadd.f32 %v2556_v19, %v1915_v26  ;;  %v1152_v26 = vadd.f32 %v5167_v33, %v1021_v21  ;;  %v3464_v19 = vld [vmem:[%s3520_s18 + $0x3b8] sm:$0xff] }
 0x3f2   : > { %v3232_v50 = vpop.eup %3231  ;;  %2938 = vst.msk [vmem:[%s4736_s25 + $0x218] sm:$0xff] %vm2870_vm0, %v3230_v49  ;;  %v2694_v45 = vadd.f32 %v2566_v57, %v1925_v24  ;;  %v2689_v18 = vadd.f32 %v2561_v2, %v1920_v35  ;;  %v1157_v24 = vadd.f32 %v5167_v33, %v1026_v54  ;;  %v1931_v29 = vadd.f32 %v1803_v4, %v1162_v51  ;;  %v6418_v51 = vld [vmem:[#allocation108_spill] sm:$0xff] }
 0x3f3   : > { %v3234_v27 = vpop.eup %3233  ;;  %2948 = vst.msk [vmem:[%s4736_s25 + $0x268] sm:$0xff] %vm2870_vm0, %v3232_v50  ;;  %3235 = vtanh.f32 %v2684_v61  ;;  %v1921_v57 = vadd.f32 %v1793_v15, %v1152_v26  ;;  %v1027_v54 = vmul.f32 %v4695_v8, %v6413_v58  ;;  %v6415_v15 = vld [vmem:[#allocation165_spill] sm:$0xff] }
 0x3f4   : > { %2943 = vst.msk [vmem:[%s4736_s25 + $0x240] sm:$0xff] %vm2870_vm0, %v3234_v27  ;;  %3237 = vtanh.f32 %v2694_v45  ;;  %2434 = vperm.xlu1 %3085, %v3460_v5   ;;  %v1926_v61 = vadd.f32 %v1798_v9, %v1157_v24  ;;  %v6408_v27 = vld [vmem:[#allocation151_spill] sm:$0xff]  ;;  %v6410_v5 = vld [vmem:[#allocation89_spill] sm:$0xff]  ;;  %v1032_v59 = vmul.f32 %v4695_v8, %v6415_v15  ;;  %v1804_v24 = vmul.f32 %v4697_v14, %v6418_v51 }
 0x3f5   : > { %3239 = vtanh.f32 %v2689_v18  ;;  %2438 = vperm.xlu2 %3083, %v3461_v42   ;;  %2454 = vperm.xlu0 %3084, %v3462_v6   ;;  %v1034_v28 = vmul.f32 %v4695_v8, %v6408_v27  ;;  %v1796_v12 = vmul.f32 %v4697_v14, %v6410_v5  ;;  %v6411_v42 = vld [vmem:[#allocation88_spill] sm:$0xff] }
 0x3f6   : > { %v2267_v36 = vpop.permute.xlu1 %2266  ;;  %v1806_v6 = vmul.f32 %v4697_v14, %v6411_v42  ;;  %v6421_v5 = vld [vmem:[#allocation168_spill] sm:$0xff] }
 0x3f7   : > { %v2559_v48 = vmul.f32 %v4709_v62, %v2267_v36  ;;  %v2307_v25 = vpop.permute.xlu2 %2306  ;;  %v2287_v63 = vpop.permute.xlu0 %2286  ;;  %v3466_v36 = vld [vmem:[%s3520_s18 + $0x3c8] sm:$0xff] }
 0x3f8   : > { %v2569_v16 = vmul.f32 %v4709_v62, %v2307_v25  ;;  %v2564_v31 = vmul.f32 %v4709_v62, %v2287_v63  ;;  %v3468_v25 = vld [vmem:[%s3520_s18 + $0x3f0] sm:$0xff]  ;;  %v1165_v63 = vadd.f32 %v5167_v33, %v1034_v28  ;;  %v6419_v28 = vld [vmem:[#allocation161_spill] sm:$0xff] }
 0x3f9   : > { %v3236_v17 = vpop.eup %3235  ;;  %v2687_v52 = vadd.f32 %v2559_v48, %v1918_v43  ;;  %v1155_v43 = vadd.f32 %v5167_v33, %v1024_v39  ;;  %v3467_v48 = vld [vmem:[%s3520_s18 + $0x3d0] sm:$0xff]  ;;  %v1030_v56 = vmul.f32 %v4695_v8, %v6419_v28 }
 0x3fa   : > { %v3238_v34 = vpop.eup %3237  ;;  %2941 = vst.msk [vmem:[%s4736_s25 + $0x230] sm:$0xff] %vm2870_vm0, %v3236_v17  ;;  %v2697_v60 = vadd.f32 %v2569_v16, %v1928_v0  ;;  %v2692_v10 = vadd.f32 %v2564_v31, %v1923_v46  ;;  %v1160_v0 = vadd.f32 %v5167_v33, %v1029_v37  ;;  %v1934_v21 = vadd.f32 %v1806_v6, %v1165_v63 }
 0x3fb   : > { %v3240_v11 = vpop.eup %3239  ;;  %2951 = vst.msk [vmem:[%s4736_s25 + $0x280] sm:$0xff] %vm2870_vm0, %v3238_v34  ;;  %3241 = vtanh.f32 %v2687_v52  ;;  %v1924_v16 = vadd.f32 %v1796_v12, %v1155_v43  ;;  %v1035_v12 = vmul.f32 %v4695_v8, %v6421_v5  ;;  %v6423_v43 = vld [vmem:[#allocation100_spill] sm:$0xff]  ;;  %v6433_v5 = vld [vmem:[#allocation174_spill] sm:$0xff] }
 0x3fc   : > { %2946 = vst.msk [vmem:[%s4736_s25 + $0x258] sm:$0xff] %vm2870_vm0, %v3240_v11  ;;  %3243 = vtanh.f32 %v2697_v60  ;;  %2446 = vperm.xlu1 %3085, %v3463_v41   ;;  %v1929_v52 = vadd.f32 %v1801_v3, %v1160_v0  ;;  %v6414_v11 = vld [vmem:[#allocation156_spill] sm:$0xff]  ;;  %v6416_v41 = vld [vmem:[#allocation95_spill] sm:$0xff]  ;;  %v6422_v3 = vld [vmem:[#allocation101_spill] sm:$0xff] }
 0x3fd   : > { %3245 = vtanh.f32 %v2692_v10  ;;  %2450 = vperm.xlu2 %3083, %v3464_v19   ;;  %2466 = vperm.xlu0 %3084, %v3465_v32   ;;  %v1037_v55 = vmul.f32 %v4695_v8, %v6414_v11  ;;  %v1799_v26 = vmul.f32 %v4697_v14, %v6416_v41  ;;  %v6417_v19 = vld [vmem:[#allocation94_spill] sm:$0xff]  ;;  %v3471_v0 = vld [vmem:[%s3520_s18 + $0x3f8] sm:$0xff] }
 0x3fe   : > { %v2279_v35 = vpop.permute.xlu1 %2278  ;;  %v1809_v32 = vmul.f32 %v4697_v14, %v6417_v19 }
 0x3ff   : > { %v2562_v2 = vmul.f32 %v4709_v62, %v2279_v35  ;;  %v2319_v49 = vpop.permute.xlu2 %2318  ;;  %v2299_v1 = vpop.permute.xlu0 %2298  ;;  %v3469_v35 = vld [vmem:[%s3520_s18 + $0x3e0] sm:$0xff] }
 0x400   : > { %v2572_v50 = vmul.f32 %v4709_v62, %v2319_v49  ;;  %v2567_v38 = vmul.f32 %v4709_v62, %v2299_v1  ;;  %v1168_v49 = vadd.f32 %v5167_v33, %v1037_v55  ;;  %v1163_v1 = vadd.f32 %v5167_v33, %v1032_v59  ;;  %v6426_v59 = vld [vmem:[#allocation163_spill] sm:$0xff] }
 0x401   : > { %v3242_v22 = vpop.eup %3241  ;;  %v2690_v45 = vadd.f32 %v2562_v2, %v1921_v57  ;;  %v1158_v57 = vadd.f32 %v5167_v33, %v1027_v54  ;;  %v3470_v2 = vld [vmem:[%s3520_s18 + $0x3e8] sm:$0xff] }
 0x402   : > { %v3244_v18 = vpop.eup %3243  ;;  %2944 = vst.msk [vmem:[%s4736_s25 + $0x248] sm:$0xff] %vm2870_vm0, %v3242_v22  ;;  %v2700_v7 = vadd.f32 %v2572_v50, %v1931_v29  ;;  %v2695_v44 = vadd.f32 %v2567_v38, %v1926_v61  ;;  %v1937_v13 = vadd.f32 %v1809_v32, %v1168_v49  ;;  %v1932_v39 = vadd.f32 %v1804_v24, %v1163_v1  ;;  %v6428_v32 = vld [vmem:[#allocation107_spill] sm:$0xff]  ;;  %v6429_v24 = vld [vmem:[#allocation106_spill] sm:$0xff] }
 0x403   : > { %v3246_v47 = vpop.eup %3245  ;;  %2954 = vst.msk [vmem:[%s4736_s25 + $0x298] sm:$0xff] %vm2870_vm0, %v3244_v18  ;;  %3247 = vtanh.f32 %v2690_v45  ;;  %v1927_v61 = vadd.f32 %v1799_v26, %v1158_v57  ;;  %v1805_v51 = vmul.f32 %v4697_v14, %v6428_v32  ;;  %v6430_v57 = vld [vmem:[#allocation120_spill] sm:$0xff]  ;;  %v6440_v32 = vld [vmem:[#allocation119_spill] sm:$0xff] }
 0x404   : > { %2949 = vst.msk [vmem:[%s4736_s25 + $0x270] sm:$0xff] %vm2870_vm0, %v3246_v47  ;;  %3249 = vtanh.f32 %v2700_v7  ;;  %2458 = vperm.xlu1 %3085, %v3466_v36   ;;  %v1802_v36 = vmul.f32 %v4697_v14, %v6422_v3  ;;  %v6434_v3 = vld [vmem:[#allocation113_spill] sm:$0xff] }
 0x405   : > { %3251 = vtanh.f32 %v2695_v44  ;;  %2462 = vperm.xlu2 %3083, %v3467_v48   ;;  %2478 = vperm.xlu0 %3084, %v3468_v25   ;;  %v6420_v44 = vld [vmem:[#allocation160_spill] sm:$0xff]  ;;  %v1812_v48 = vmul.f32 %v4697_v14, %v6423_v43  ;;  %v6424_v25 = vld [vmem:[#allocation114_spill] sm:$0xff] }
 0x406   : > { %v2291_v46 = vpop.permute.xlu1 %2290  ;;  %v1040_v47 = vmul.f32 %v4695_v8, %v6420_v44  ;;  %v1807_v63 = vmul.f32 %v4697_v14, %v6424_v25  ;;  %v6432_v44 = vld [vmem:[#allocation166_spill] sm:$0xff]  ;;  %v6435_v43 = vld [vmem:[#allocation112_spill] sm:$0xff] }
 0x407   : > { %v2565_v31 = vmul.f32 %v4709_v62, %v2291_v46  ;;  %v2331_v17 = vpop.permute.xlu2 %2330  ;;  %v2311_v53 = vpop.permute.xlu0 %2310  ;;  %v1161_v46 = vadd.f32 %v5167_v33, %v1030_v56  ;;  %v6431_v56 = vld [vmem:[#allocation167_spill] sm:$0xff]  ;;  %v6436_v25 = vld [vmem:[#allocation126_spill] sm:$0xff] }
 0x408   : > { %v2575_v34 = vmul.f32 %v4709_v62, %v2331_v17  ;;  %v2570_v40 = vmul.f32 %v4709_v62, %v2311_v53 }
 0x409   : > { %v3248_v23 = vpop.eup %3247  ;;  %v2693_v60 = vadd.f32 %v2565_v31, %v1924_v16  ;;  %v1171_v16 = vadd.f32 %v5167_v33, %v1040_v47  ;;  %v1166_v31 = vadd.f32 %v5167_v33, %v1035_v12  ;;  %v1930_v53 = vadd.f32 %v1802_v36, %v1161_v46 }
 0x40a   : > { %v3250_v10 = vpop.eup %3249  ;;  %2947 = vst.msk [vmem:[%s4736_s25 + $0x260] sm:$0xff] %vm2870_vm0, %v3248_v23  ;;  %v2703_v4 = vadd.f32 %v2575_v34, %v1934_v21  ;;  %v2698_v20 = vadd.f32 %v2570_v40, %v1929_v52  ;;  %v1046_v47 = vmul.f32 %v4695_v8, %v6432_v44  ;;  %v1041_v12 = vmul.f32 %v4695_v8, %v6433_v5  ;;  %v6444_v44 = vld [vmem:[#allocation172_spill] sm:$0xff] }
 0x40b   : > { %v3252_v9 = vpop.eup %3251  ;;  %2957 = vst.msk [vmem:[%s4736_s25 + $0x2b0] sm:$0xff] %vm2870_vm0, %v3250_v10  ;;  %3253 = vtanh.f32 %v2693_v60  ;;  %v1940_v40 = vadd.f32 %v1812_v48, %v1171_v16  ;;  %v1935_v23 = vadd.f32 %v1807_v63, %v1166_v31  ;;  %v6425_v10 = vld [vmem:[#allocation164_spill] sm:$0xff]  ;;  %v1808_v36 = vmul.f32 %v4697_v14, %v6434_v3  ;;  %v6446_v3 = vld [vmem:[#allocation125_spill] sm:$0xff] }
 0x40c   : > { %2952 = vst.msk [vmem:[%s4736_s25 + $0x288] sm:$0xff] %vm2870_vm0, %v3252_v9  ;;  %3255 = vtanh.f32 %v2703_v4  ;;  %2470 = vperm.xlu1 %3085, %v3469_v35   ;;  %v1033_v11 = vmul.f32 %v4695_v8, %v6425_v10  ;;  %v1043_v4 = vmul.f32 %v4695_v8, %v6426_v59  ;;  %v1815_v35 = vmul.f32 %v4697_v14, %v6429_v24  ;;  %v6437_v10 = vld [vmem:[#allocation170_spill] sm:$0xff]  ;;  %v6438_v59 = vld [vmem:[#allocation169_spill] sm:$0xff]  ;;  %v6445_v5 = vld [vmem:[#allocation180_spill] sm:$0xff] }
 0x40d   : > { %3257 = vtanh.f32 %v2698_v20  ;;  %2474 = vperm.xlu2 %3083, %v3470_v2   ;;  %v6427_v20 = vld [vmem:[#allocation171_spill] sm:$0xff]  ;;  %v1810_v2 = vmul.f32 %v4697_v14, %v6430_v57  ;;  %v1818_v48 = vmul.f32 %v4697_v14, %v6435_v43  ;;  %v1813_v63 = vmul.f32 %v4697_v14, %v6436_v25  ;;  %v6441_v24 = vld [vmem:[#allocation118_spill] sm:$0xff]  ;;  %v6442_v57 = vld [vmem:[#allocation132_spill] sm:$0xff] }
 0x40e   : > { %v2303_v29 = vpop.permute.xlu1 %2302  ;;  %v1038_v9 = vmul.f32 %v4695_v8, %v6427_v20  ;;  %v1164_v49 = vadd.f32 %v5167_v33, %v1033_v11  ;;  %v1174_v1 = vadd.f32 %v5167_v33, %v1043_v4  ;;  %v1039_v11 = vmul.f32 %v4695_v8, %v6437_v10  ;;  %v6439_v20 = vld [vmem:[#allocation177_spill] sm:$0xff]  ;;  %v6447_v43 = vld [vmem:[#allocation124_spill] sm:$0xff]  ;;  %v6448_v25 = vld [vmem:[#allocation138_spill] sm:$0xff] }
 0x40f   : > { %v2568_v50 = vmul.f32 %v4709_v62, %v2303_v29  ;;  %v2343_v38 = vpop.permute.xlu2 %2342  ;;  %v2323_v22 = vpop.permute.xlu0 %2322  ;;  %v1049_v4 = vmul.f32 %v4695_v8, %v6438_v59  ;;  %v6449_v10 = vld [vmem:[#allocation176_spill] sm:$0xff]  ;;  %v6450_v59 = vld [vmem:[#allocation175_spill] sm:$0xff] }
 0x410   : > { %v2578_v45 = vmul.f32 %v4709_v62, %v2343_v38  ;;  %v2573_v18 = vmul.f32 %v4709_v62, %v2323_v22  ;;  %v1169_v29 = vadd.f32 %v5167_v33, %v1038_v9  ;;  %v1044_v9 = vmul.f32 %v4695_v8, %v6439_v20  ;;  %v6451_v20 = vld [vmem:[#allocation183_spill] sm:$0xff] }
 0x411   : > { %v3254_v27 = vpop.eup %3253  ;;  %v2696_v37 = vadd.f32 %v2568_v50, %v1927_v61  ;;  %v1933_v50 = vadd.f32 %v1805_v51, %v1164_v49  ;;  %v1811_v51 = vmul.f32 %v4697_v14, %v6440_v32  ;;  %v6452_v32 = vld [vmem:[#allocation131_spill] sm:$0xff] }
 0x412   : > { %v3256_v7 = vpop.eup %3255  ;;  %2950 = vst.msk [vmem:[%s4736_s25 + $0x278] sm:$0xff] %vm2870_vm0, %v3254_v27  ;;  %v2706_v42 = vadd.f32 %v2578_v45, %v1937_v13  ;;  %v2701_v6 = vadd.f32 %v2573_v18, %v1932_v39  ;;  %v1943_v39 = vadd.f32 %v1815_v35, %v1174_v1  ;;  %v1938_v45 = vadd.f32 %v1810_v2, %v1169_v29 }
 0x413   : > { %v3258_v30 = vpop.eup %3257  ;;  %2960 = vst.msk [vmem:[%s4736_s25 + $0x2c8] sm:$0xff] %vm2870_vm0, %v3256_v7  ;;  %3259 = vtanh.f32 %v2696_v37  ;;  %v1036_v37 = vmul.f32 %v4695_v8, %v6431_v56  ;;  %v1821_v35 = vmul.f32 %v4697_v14, %v6441_v24  ;;  %v1816_v2 = vmul.f32 %v4697_v14, %v6442_v57  ;;  %v6443_v56 = vld [vmem:[#allocation173_spill] sm:$0xff]  ;;  %v6453_v24 = vld [vmem:[#allocation130_spill] sm:$0xff]  ;;  %v6454_v57 = vld [vmem:[#allocation144_spill] sm:$0xff] }
 0x414   : > { %2955 = vst.msk [vmem:[%s4736_s25 + $0x2a0] sm:$0xff] %vm2870_vm0, %v3258_v30  ;;  %3261 = vtanh.f32 %v2706_v42  ;;  %2482 = vperm.xlu1 %3085, %v3471_v0   ;;  %v5597_v0 = vld [vmem:[%s5862_s2] ss:$0 sm:$0xff] }
 0x415   : > { %3263 = vtanh.f32 %v2701_v6  ;;  %v1167_v46 = vadd.f32 %v5597_v0, %v1036_v37  ;;  %v1177_v16 = vadd.f32 %v5597_v0, %v1046_v47  ;;  %v1172_v31 = vadd.f32 %v5597_v0, %v1041_v12 }
 0x416   : > { %v2315_v17 = vpop.permute.xlu1 %2314  ;;  %v1170_v49 = vadd.f32 %v5597_v0, %v1039_v11  ;;  %v1180_v1 = vadd.f32 %v5597_v0, %v1049_v4  ;;  %v1175_v29 = vadd.f32 %v5597_v0, %v1044_v9  ;;  %v1042_v37 = vmul.f32 %v4695_v8, %v6443_v56  ;;  %v6455_v56 = vld [vmem:[#allocation179_spill] sm:$0xff] }
 0x417   : > { %v2571_v21 = vmul.f32 %v4709_v62, %v2315_v17  ;;  %v2355_v52 = vpop.permute.xlu2 %2354  ;;  %v2335_v34 = vpop.permute.xlu0 %2334  ;;  %v1052_v47 = vmul.f32 %v4695_v8, %v6444_v44  ;;  %v1047_v12 = vmul.f32 %v4695_v8, %v6445_v5  ;;  %v1045_v11 = vmul.f32 %v4695_v8, %v6449_v10  ;;  %v6456_v44 = vld [vmem:[#allocation178_spill] sm:$0xff] }
 0x418   : > { %v2581_v58 = vmul.f32 %v4709_v62, %v2355_v52  ;;  %v2576_v54 = vmul.f32 %v4709_v62, %v2335_v34  ;;  %v1055_v4 = vmul.f32 %v4695_v8, %v6450_v59  ;;  %v1050_v9 = vmul.f32 %v4695_v8, %v6451_v20  ;;  %v6457_v5 = vld [vmem:[#allocation186_spill] sm:$0xff]  ;;  %v6462_v59 = vld [vmem:[#allocation181_spill] sm:$0xff] }
 0x419   : > { %v3260_v60 = vpop.eup %3259  ;;  %v2699_v55 = vadd.f32 %v2571_v21, %v1930_v53  ;;  %v1936_v53 = vadd.f32 %v1808_v36, %v1167_v46  ;;  %v1814_v36 = vmul.f32 %v4697_v14, %v6446_v3  ;;  %v1173_v46 = vadd.f32 %v5597_v0, %v1042_v37  ;;  %v6458_v3 = vld [vmem:[#allocation137_spill] sm:$0xff]  ;;  %v6461_v10 = vld [vmem:[#allocation182_spill] sm:$0xff] }
 0x41a   : > { %v3262_v15 = vpop.eup %3261  ;;  %2953 = vst.msk [vmem:[%s4736_s25 + $0x290] sm:$0xff] %vm2870_vm0, %v3260_v60  ;;  %v2709_v41 = vadd.f32 %v2581_v58, %v1940_v40  ;;  %v2704_v26 = vadd.f32 %v2576_v54, %v1935_v23  ;;  %v1946_v40 = vadd.f32 %v1818_v48, %v1177_v16  ;;  %v1941_v23 = vadd.f32 %v1813_v63, %v1172_v31  ;;  %v6463_v20 = vld [vmem:[#allocation189_spill] sm:$0xff] }
 0x41b   : > { %v3264_v19 = vpop.eup %3263  ;;  %2963 = vst.msk [vmem:[%s4736_s25 + $0x2e0] sm:$0xff] %vm2870_vm0, %v3262_v15  ;;  %3265 = vtanh.f32 %v2699_v55  ;;  %v1824_v48 = vmul.f32 %v4697_v14, %v6447_v43  ;;  %v1819_v63 = vmul.f32 %v4697_v14, %v6448_v25  ;;  %v1183_v16 = vadd.f32 %v5597_v0, %v1052_v47  ;;  %v6459_v43 = vld [vmem:[#allocation136_spill] sm:$0xff]  ;;  %v6460_v25 = vld [vmem:[#allocation150_spill] sm:$0xff] }
 0x41c   : > { %2958 = vst.msk [vmem:[%s4736_s25 + $0x2b8] sm:$0xff] %vm2870_vm0, %v3264_v19  ;;  %3267 = vtanh.f32 %v2709_v41  ;;  %v1178_v31 = vadd.f32 %v5597_v0, %v1047_v12  ;;  %v1048_v37 = vmul.f32 %v4695_v8, %v6455_v56  ;;  %v1058_v47 = vmul.f32 %v4695_v8, %v6456_v44  ;;  %v6467_v56 = vld [vmem:[#allocation185_spill] sm:$0xff]  ;;  %v6468_v44 = vld [vmem:[#allocation184_spill] sm:$0xff] }
 0x41d   : > { %3269 = vtanh.f32 %v2704_v26  ;;  %v1053_v12 = vmul.f32 %v4695_v8, %v6457_v5  ;;  %v6469_v5 = vld [vmem:[#allocation192_spill] sm:$0xff] }
 0x41e   : > { %v2327_v61 = vpop.permute.xlu1 %2326 }
 0x41f   : > { %v2574_v38 = vmul.f32 %v4709_v62, %v2327_v61  ;;  %v2367_v22 = vpop.permute.xlu2 %2366  ;;  %v2347_v13 = vpop.permute.xlu0 %2346 }
 0x420   : > { %v2584_v18 = vmul.f32 %v4709_v62, %v2367_v22  ;;  %v2579_v27 = vmul.f32 %v4709_v62, %v2347_v13 }
 0x421   : > { %v3266_v28 = vpop.eup %3265  ;;  %v2702_v33 = vadd.f32 %v2574_v38, %v1933_v50  ;;  %v1939_v50 = vadd.f32 %v1811_v51, %v1170_v49  ;;  %v1817_v51 = vmul.f32 %v4697_v14, %v6452_v32  ;;  %v1176_v49 = vadd.f32 %v5597_v0, %v1045_v11  ;;  %v6464_v32 = vld [vmem:[#allocation143_spill] sm:$0xff] }
 0x422   : > { %v3268_v7 = vpop.eup %3267  ;;  %2956 = vst.msk [vmem:[%s4736_s25 + $0x2a8] sm:$0xff] %vm2870_vm0, %v3266_v28  ;;  %v2712_v42 = vadd.f32 %v2584_v18, %v1943_v39  ;;  %v2707_v6 = vadd.f32 %v2579_v27, %v1938_v45  ;;  %v1949_v39 = vadd.f32 %v1821_v35, %v1180_v1  ;;  %v1944_v45 = vadd.f32 %v1816_v2, %v1175_v29 }
 0x423   : > { %v3270_v30 = vpop.eup %3269  ;;  %2966 = vst.msk [vmem:[%s4736_s25 + $0x2f8] sm:$0xff] %vm2870_vm0, %v3268_v7  ;;  %3271 = vtanh.f32 %v2702_v33  ;;  %v1827_v35 = vmul.f32 %v4697_v14, %v6453_v24  ;;  %v1822_v2 = vmul.f32 %v4697_v14, %v6454_v57  ;;  %v1186_v1 = vadd.f32 %v5597_v0, %v1055_v4  ;;  %v6465_v24 = vld [vmem:[#allocation142_spill] sm:$0xff]  ;;  %v6466_v57 = vld [vmem:[#allocation155_spill] sm:$0xff] }
 0x424   : > { %2961 = vst.msk [vmem:[%s4736_s25 + $0x2d0] sm:$0xff] %vm2870_vm0, %v3270_v30  ;;  %3273 = vtanh.f32 %v2712_v42  ;;  %v1181_v29 = vadd.f32 %v5597_v0, %v1050_v9  ;;  %v1051_v11 = vmul.f32 %v4695_v8, %v6461_v10  ;;  %v1061_v4 = vmul.f32 %v4695_v8, %v6462_v59  ;;  %v6473_v10 = vld [vmem:[#allocation188_spill] sm:$0xff]  ;;  %v6474_v59 = vld [vmem:[#allocation187_spill] sm:$0xff] }
 0x425   : > { %3275 = vtanh.f32 %v2707_v6  ;;  %v1056_v9 = vmul.f32 %v4695_v8, %v6463_v20  ;;  %v6475_v20 = vld [vmem:[#allocation194_spill] sm:$0xff] }
 0x426   : > { %v2339_v17 = vpop.permute.xlu1 %2338 }
 0x427   : > { %v2577_v21 = vmul.f32 %v4709_v62, %v2339_v17  ;;  %v2379_v52 = vpop.permute.xlu2 %2378  ;;  %v2359_v34 = vpop.permute.xlu0 %2358 }
 0x428   : > { %v2587_v58 = vmul.f32 %v4709_v62, %v2379_v52  ;;  %v2582_v54 = vmul.f32 %v4709_v62, %v2359_v34 }
 0x429   : > { %v3272_v60 = vpop.eup %3271  ;;  %v2705_v55 = vadd.f32 %v2577_v21, %v1936_v53  ;;  %v1942_v53 = vadd.f32 %v1814_v36, %v1173_v46  ;;  %v1820_v36 = vmul.f32 %v4697_v14, %v6458_v3  ;;  %v1179_v46 = vadd.f32 %v5597_v0, %v1048_v37  ;;  %v6470_v3 = vld [vmem:[#allocation149_spill] sm:$0xff] }
 0x42a   : > { %v3274_v15 = vpop.eup %3273  ;;  %2959 = vst.msk [vmem:[%s4736_s25 + $0x2c0] sm:$0xff] %vm2870_vm0, %v3272_v60  ;;  %v2715_v41 = vadd.f32 %v2587_v58, %v1946_v40  ;;  %v2710_v26 = vadd.f32 %v2582_v54, %v1941_v23  ;;  %v1952_v40 = vadd.f32 %v1824_v48, %v1183_v16  ;;  %v1947_v23 = vadd.f32 %v1819_v63, %v1178_v31 }
 0x42b   : > { %v3276_v19 = vpop.eup %3275  ;;  %2969 = vst.msk [vmem:[%s4736_s25 + $0x310] sm:$0xff] %vm2870_vm0, %v3274_v15  ;;  %3277 = vtanh.f32 %v2705_v55  ;;  %v1830_v48 = vmul.f32 %v4697_v14, %v6459_v43  ;;  %v1825_v63 = vmul.f32 %v4697_v14, %v6460_v25  ;;  %v1189_v16 = vadd.f32 %v5597_v0, %v1058_v47  ;;  %v6471_v43 = vld [vmem:[#allocation148_spill] sm:$0xff]  ;;  %v6472_v25 = vld [vmem:[#allocation201_spill] sm:$0xff] }
 0x42c   : > { %2964 = vst.msk [vmem:[%s4736_s25 + $0x2e8] sm:$0xff] %vm2870_vm0, %v3276_v19  ;;  %3279 = vtanh.f32 %v2715_v41  ;;  %v1184_v31 = vadd.f32 %v5597_v0, %v1053_v12  ;;  %v1054_v37 = vmul.f32 %v4695_v8, %v6467_v56  ;;  %v1064_v47 = vmul.f32 %v4695_v8, %v6468_v44  ;;  %v6479_v56 = vld [vmem:[#allocation191_spill] sm:$0xff]  ;;  %v6480_v44 = vld [vmem:[#allocation190_spill] sm:$0xff] }
 0x42d   : > { %3281 = vtanh.f32 %v2710_v26  ;;  %v1059_v12 = vmul.f32 %v4695_v8, %v6469_v5  ;;  %v6481_v5 = vld [vmem:[#allocation196_spill] sm:$0xff] }
 0x42e   : > { %v2351_v61 = vpop.permute.xlu1 %2350 }
 0x42f   : > { %v2580_v38 = vmul.f32 %v4709_v62, %v2351_v61  ;;  %v2391_v22 = vpop.permute.xlu2 %2390  ;;  %v2371_v13 = vpop.permute.xlu0 %2370 }
 0x430   : > { %v2590_v18 = vmul.f32 %v4709_v62, %v2391_v22  ;;  %v2585_v27 = vmul.f32 %v4709_v62, %v2371_v13 }
 0x431   : > { %v3278_v28 = vpop.eup %3277  ;;  %v2708_v33 = vadd.f32 %v2580_v38, %v1939_v50  ;;  %v1945_v50 = vadd.f32 %v1817_v51, %v1176_v49  ;;  %v1823_v51 = vmul.f32 %v4697_v14, %v6464_v32  ;;  %v1182_v49 = vadd.f32 %v5597_v0, %v1051_v11  ;;  %v6476_v32 = vld [vmem:[#allocation154_spill] sm:$0xff] }
 0x432   : > { %v3280_v7 = vpop.eup %3279  ;;  %2962 = vst.msk [vmem:[%s4736_s25 + $0x2d8] sm:$0xff] %vm2870_vm0, %v3278_v28  ;;  %v2718_v42 = vadd.f32 %v2590_v18, %v1949_v39  ;;  %v2713_v6 = vadd.f32 %v2585_v27, %v1944_v45  ;;  %v1955_v39 = vadd.f32 %v1827_v35, %v1186_v1  ;;  %v1950_v45 = vadd.f32 %v1822_v2, %v1181_v29 }
 0x433   : > { %v3282_v30 = vpop.eup %3281  ;;  %2972 = vst.msk [vmem:[%s4736_s25 + $0x328] sm:$0xff] %vm2870_vm0, %v3280_v7  ;;  %3283 = vtanh.f32 %v2708_v33  ;;  %v1833_v35 = vmul.f32 %v4697_v14, %v6465_v24  ;;  %v1828_v2 = vmul.f32 %v4697_v14, %v6466_v57  ;;  %v1192_v1 = vadd.f32 %v5597_v0, %v1061_v4  ;;  %v6477_v24 = vld [vmem:[#allocation159_spill] sm:$0xff]  ;;  %v6478_v57 = vld [vmem:[#allocation204_spill] sm:$0xff] }
 0x434   : > { %2967 = vst.msk [vmem:[%s4736_s25 + $0x300] sm:$0xff] %vm2870_vm0, %v3282_v30  ;;  %3285 = vtanh.f32 %v2718_v42  ;;  %v1187_v29 = vadd.f32 %v5597_v0, %v1056_v9  ;;  %v1057_v11 = vmul.f32 %v4695_v8, %v6473_v10  ;;  %v1067_v4 = vmul.f32 %v4695_v8, %v6474_v59  ;;  %v6485_v10 = vld [vmem:[#allocation193_spill] sm:$0xff]  ;;  %v6486_v59 = vld [vmem:[#allocation198_spill] sm:$0xff] }
 0x435   : > { %3287 = vtanh.f32 %v2713_v6  ;;  %v1062_v9 = vmul.f32 %v4695_v8, %v6475_v20 }
 0x436   : > { %v2363_v17 = vpop.permute.xlu1 %2362 }
 0x437   : > { %v2583_v21 = vmul.f32 %v4709_v62, %v2363_v17  ;;  %v2403_v52 = vpop.permute.xlu2 %2402  ;;  %v2383_v34 = vpop.permute.xlu0 %2382 }
 0x438   : > { %v2593_v58 = vmul.f32 %v4709_v62, %v2403_v52  ;;  %v2588_v54 = vmul.f32 %v4709_v62, %v2383_v34 }
 0x439   : > { %v3284_v60 = vpop.eup %3283  ;;  %v2711_v55 = vadd.f32 %v2583_v21, %v1942_v53  ;;  %v1948_v53 = vadd.f32 %v1820_v36, %v1179_v46  ;;  %v1826_v36 = vmul.f32 %v4697_v14, %v6470_v3  ;;  %v1185_v46 = vadd.f32 %v5597_v0, %v1054_v37  ;;  %v6482_v3 = vld [vmem:[#allocation202_spill] sm:$0xff] }
 0x43a   : > { %v3286_v15 = vpop.eup %3285  ;;  %2965 = vst.msk [vmem:[%s4736_s25 + $0x2f0] sm:$0xff] %vm2870_vm0, %v3284_v60  ;;  %v2721_v41 = vadd.f32 %v2593_v58, %v1952_v40  ;;  %v2716_v26 = vadd.f32 %v2588_v54, %v1947_v23  ;;  %v1958_v40 = vadd.f32 %v1830_v48, %v1189_v16  ;;  %v1953_v23 = vadd.f32 %v1825_v63, %v1184_v31 }
 0x43b   : > { %v3288_v19 = vpop.eup %3287  ;;  %2975 = vst.msk [vmem:[%s4736_s25 + $0x340] sm:$0xff] %vm2870_vm0, %v3286_v15  ;;  %3289 = vtanh.f32 %v2711_v55  ;;  %v1836_v48 = vmul.f32 %v4697_v14, %v6471_v43  ;;  %v1831_v63 = vmul.f32 %v4697_v14, %v6472_v25  ;;  %v1195_v16 = vadd.f32 %v5597_v0, %v1064_v47  ;;  %v6483_v43 = vld [vmem:[#allocation203_spill] sm:$0xff]  ;;  %v6484_v25 = vld [vmem:[#allocation205_spill] sm:$0xff] }
 0x43c   : > { %2970 = vst.msk [vmem:[%s4736_s25 + $0x318] sm:$0xff] %vm2870_vm0, %v3288_v19  ;;  %3291 = vtanh.f32 %v2721_v41  ;;  %v1190_v31 = vadd.f32 %v5597_v0, %v1059_v12  ;;  %v1060_v37 = vmul.f32 %v4695_v8, %v6479_v56  ;;  %v1070_v47 = vmul.f32 %v4695_v8, %v6480_v44  ;;  %v6491_v56 = vld [vmem:[#allocation9_spill] sm:$0xff] }
 0x43d   : > { %3293 = vtanh.f32 %v2716_v26  ;;  %v1065_v12 = vmul.f32 %v4695_v8, %v6481_v5 }
 0x43e   : > { %v2375_v61 = vpop.permute.xlu1 %2374 }
 0x43f   : > { %v2586_v38 = vmul.f32 %v4709_v62, %v2375_v61  ;;  %v2415_v22 = vpop.permute.xlu2 %2414  ;;  %v2395_v13 = vpop.permute.xlu0 %2394 }
 0x440   : > { %v2596_v18 = vmul.f32 %v4709_v62, %v2415_v22  ;;  %v2591_v27 = vmul.f32 %v4709_v62, %v2395_v13 }
 0x441   : > { %v3290_v28 = vpop.eup %3289  ;;  %v2714_v33 = vadd.f32 %v2586_v38, %v1945_v50  ;;  %v1951_v50 = vadd.f32 %v1823_v51, %v1182_v49  ;;  %v1829_v51 = vmul.f32 %v4697_v14, %v6476_v32  ;;  %v1188_v49 = vadd.f32 %v5597_v0, %v1057_v11  ;;  %v6488_v32 = vld [vmem:[#allocation206_spill] sm:$0xff] }
 0x442   : > { %v3292_v7 = vpop.eup %3291  ;;  %2968 = vst.msk [vmem:[%s4736_s25 + $0x308] sm:$0xff] %vm2870_vm0, %v3290_v28  ;;  %v2724_v42 = vadd.f32 %v2596_v18, %v1955_v39  ;;  %v2719_v6 = vadd.f32 %v2591_v27, %v1950_v45  ;;  %v1961_v39 = vadd.f32 %v1833_v35, %v1192_v1  ;;  %v1956_v45 = vadd.f32 %v1828_v2, %v1187_v29 }
 0x443   : > { %v3294_v30 = vpop.eup %3293  ;;  %2978 = vst.msk [vmem:[%s4736_s25 + $0x358] sm:$0xff] %vm2870_vm0, %v3292_v7  ;;  %3295 = vtanh.f32 %v2714_v33  ;;  %v1839_v35 = vmul.f32 %v4697_v14, %v6477_v24  ;;  %v1834_v2 = vmul.f32 %v4697_v14, %v6478_v57  ;;  %v1198_v1 = vadd.f32 %v5597_v0, %v1067_v4 }
 0x444   : > { %2973 = vst.msk [vmem:[%s4736_s25 + $0x330] sm:$0xff] %vm2870_vm0, %v3294_v30  ;;  %3297 = vtanh.f32 %v2724_v42  ;;  %v1193_v29 = vadd.f32 %v5597_v0, %v1062_v9  ;;  %v1063_v11 = vmul.f32 %v4695_v8, %v6485_v10  ;;  %v1068_v4 = vmul.f32 %v4695_v8, %v6486_v59 }
 0x445   : > { %3299 = vtanh.f32 %v2719_v6 }
 0x446   : > { %v2387_v17 = vpop.permute.xlu1 %2386  ;;  %v1194_v24 = vadd.f32 %v5597_v0, %v1063_v11 }
 0x447   : > { %v2589_v21 = vmul.f32 %v4709_v62, %v2387_v17  ;;  %v2427_v52 = vpop.permute.xlu2 %2426  ;;  %v2407_v34 = vpop.permute.xlu0 %2406 }
 0x448   : > { %v2599_v58 = vmul.f32 %v4709_v62, %v2427_v52  ;;  %v2594_v54 = vmul.f32 %v4709_v62, %v2407_v34 }
 0x449   : > { %v3296_v60 = vpop.eup %3295  ;;  %v2717_v55 = vadd.f32 %v2589_v21, %v1948_v53  ;;  %v1954_v53 = vadd.f32 %v1826_v36, %v1185_v46  ;;  %v1832_v36 = vmul.f32 %v4697_v14, %v6482_v3  ;;  %v1191_v46 = vadd.f32 %v5597_v0, %v1060_v37 }
 0x44a   : > { %v3298_v15 = vpop.eup %3297  ;;  %2971 = vst.msk [vmem:[%s4736_s25 + $0x320] sm:$0xff] %vm2870_vm0, %v3296_v60  ;;  %v2727_v41 = vadd.f32 %v2599_v58, %v1958_v40  ;;  %v2722_v26 = vadd.f32 %v2594_v54, %v1953_v23  ;;  %v1964_v40 = vadd.f32 %v1836_v48, %v1195_v16  ;;  %v1959_v23 = vadd.f32 %v1831_v63, %v1190_v31 }
 0x44b   : > { %v3300_v19 = vpop.eup %3299  ;;  %2981 = vst.msk [vmem:[%s4736_s25 + $0x370] sm:$0xff] %vm2870_vm0, %v3298_v15  ;;  %3301 = vtanh.f32 %v2717_v55  ;;  %v1842_v48 = vmul.f32 %v4697_v14, %v6483_v43  ;;  %v1837_v63 = vmul.f32 %v4697_v14, %v6484_v25  ;;  %v1201_v16 = vadd.f32 %v5597_v0, %v1070_v47  ;;  %v6493_v43 = vld [vmem:[#allocation197_spill] sm:$0xff] }
 0x44c   : > { %2976 = vst.msk [vmem:[%s4736_s25 + $0x348] sm:$0xff] %vm2870_vm0, %v3300_v19  ;;  %3303 = vtanh.f32 %v2727_v41  ;;  %v1196_v31 = vadd.f32 %v5597_v0, %v1065_v12  ;;  %v1838_v37 = vmul.f32 %v4697_v14, %v6491_v56 }
 0x44d   : > { %3305 = vtanh.f32 %v2722_v26 }
 0x44e   : > { %v2399_v61 = vpop.permute.xlu1 %2398 }
 0x44f   : > { %v2592_v38 = vmul.f32 %v4709_v62, %v2399_v61  ;;  %v2439_v22 = vpop.permute.xlu2 %2438  ;;  %v2419_v13 = vpop.permute.xlu0 %2418 }
 0x450   : > { %v2602_v18 = vmul.f32 %v4709_v62, %v2439_v22  ;;  %v2597_v27 = vmul.f32 %v4709_v62, %v2419_v13 }
 0x451   : > { %v3302_v28 = vpop.eup %3301  ;;  %v2720_v33 = vadd.f32 %v2592_v38, %v1951_v50  ;;  %v1957_v50 = vadd.f32 %v1829_v51, %v1188_v49  ;;  %v1840_v51 = vmul.f32 %v4697_v14, %v6488_v32 }
 0x452   : > { %v3304_v7 = vpop.eup %3303  ;;  %2974 = vst.msk [vmem:[%s4736_s25 + $0x338] sm:$0xff] %vm2870_vm0, %v3302_v28  ;;  %v2730_v42 = vadd.f32 %v2602_v18, %v1961_v39  ;;  %v2725_v6 = vadd.f32 %v2597_v27, %v1956_v45  ;;  %v1967_v39 = vadd.f32 %v1839_v35, %v1198_v1  ;;  %v1962_v45 = vadd.f32 %v1834_v2, %v1193_v29 }
 0x453   : > { %v3306_v30 = vpop.eup %3305  ;;  %2984 = vst.msk [vmem:[%s4736_s25 + $0x388] sm:$0xff] %vm2870_vm0, %v3304_v7  ;;  %3307 = vtanh.f32 %v2720_v33  ;;  %v1199_v35 = vadd.f32 %v5597_v0, %v1068_v4 }
 0x454   : > { %2979 = vst.msk [vmem:[%s4736_s25 + $0x360] sm:$0xff] %vm2870_vm0, %v3306_v30  ;;  %3309 = vtanh.f32 %v2730_v42 }
 0x455   : > { %3311 = vtanh.f32 %v2725_v6  ;;  %v1968_v29 = vadd.f32 %v1840_v51, %v1199_v35 }
 0x456   : > { %v2411_v17 = vpop.permute.xlu1 %2410 }
 0x457   : > { %v2595_v21 = vmul.f32 %v4709_v62, %v2411_v17  ;;  %v2451_v52 = vpop.permute.xlu2 %2450  ;;  %v2431_v34 = vpop.permute.xlu0 %2430 }
 0x458   : > { %v2605_v58 = vmul.f32 %v4709_v62, %v2451_v52  ;;  %v2600_v54 = vmul.f32 %v4709_v62, %v2431_v34 }
 0x459   : > { %v3308_v60 = vpop.eup %3307  ;;  %v2723_v55 = vadd.f32 %v2595_v21, %v1954_v53  ;;  %v1960_v53 = vadd.f32 %v1832_v36, %v1191_v46 }
 0x45a   : > { %v3310_v15 = vpop.eup %3309  ;;  %2977 = vst.msk [vmem:[%s4736_s25 + $0x350] sm:$0xff] %vm2870_vm0, %v3308_v60  ;;  %v2733_v41 = vadd.f32 %v2605_v58, %v1964_v40  ;;  %v2728_v26 = vadd.f32 %v2600_v54, %v1959_v23  ;;  %v1970_v40 = vadd.f32 %v1842_v48, %v1201_v16  ;;  %v1965_v23 = vadd.f32 %v1837_v63, %v1196_v31  ;;  %v6494_v16 = vld [vmem:[#allocation3_spill] sm:$0xff] }
 0x45b   : > { %v3312_v19 = vpop.eup %3311  ;;  %2987 = vst.msk [vmem:[%s4736_s25 + $0x3a0] sm:$0xff] %vm2870_vm0, %v3310_v15  ;;  %3313 = vtanh.f32 %v2723_v55  ;;  %v1069_v48 = vmul.f32 %v4695_v8, %v6493_v43  ;;  %v1841_v31 = vmul.f32 %v4697_v14, %v6494_v16 }
 0x45c   : > { %2982 = vst.msk [vmem:[%s4736_s25 + $0x378] sm:$0xff] %vm2870_vm0, %v3312_v19  ;;  %3315 = vtanh.f32 %v2733_v41 }
 0x45d   : > { %3317 = vtanh.f32 %v2728_v26  ;;  %v6487_v26 = vld [vmem:[#allocation7_spill] sm:$0xff] }
 0x45e   : > { %v2423_v61 = vpop.permute.xlu1 %2422  ;;  %v1835_v19 = vmul.f32 %v4697_v14, %v6487_v26 }
 0x45f   : > { %v2598_v38 = vmul.f32 %v4709_v62, %v2423_v61  ;;  %v2463_v22 = vpop.permute.xlu2 %2462  ;;  %v2443_v13 = vpop.permute.xlu0 %2442 }
 0x460   : > { %v2608_v18 = vmul.f32 %v4709_v62, %v2463_v22  ;;  %v2603_v27 = vmul.f32 %v4709_v62, %v2443_v13  ;;  %v1963_v2 = vadd.f32 %v1835_v19, %v1194_v24 }
 0x461   : > { %v3314_v28 = vpop.eup %3313  ;;  %v2726_v33 = vadd.f32 %v2598_v38, %v1957_v50  ;;  %v6489_v38 = vld [vmem:[#allocation195_spill] sm:$0xff] }
 0x462   : > { %v3316_v7 = vpop.eup %3315  ;;  %2980 = vst.msk [vmem:[%s4736_s25 + $0x368] sm:$0xff] %vm2870_vm0, %v3314_v28  ;;  %v2736_v42 = vadd.f32 %v2608_v18, %v1967_v39  ;;  %v2731_v6 = vadd.f32 %v2603_v27, %v1962_v45  ;;  %v1066_v22 = vmul.f32 %v4695_v8, %v6489_v38  ;;  %v6490_v45 = vld [vmem:[#allocation200_spill] sm:$0xff] }
 0x463   : > { %v3318_v30 = vpop.eup %3317  ;;  %2990 = vst.msk [vmem:[%s4736_s25 + $0x3b8] sm:$0xff] %vm2870_vm0, %v3316_v7  ;;  %3319 = vtanh.f32 %v2726_v33  ;;  %v1071_v18 = vmul.f32 %v4695_v8, %v6490_v45  ;;  %v6492_v33 = vld [vmem:[#allocation207_spill] sm:$0xff] }
 0x464   : > { %2985 = vst.msk [vmem:[%s4736_s25 + $0x390] sm:$0xff] %vm2870_vm0, %v3318_v30  ;;  %3321 = vtanh.f32 %v2736_v42  ;;  %v1843_v7 = vmul.f32 %v4697_v14, %v6492_v33  ;;  %v1197_v44 = vadd.f32 %v5597_v0, %v1066_v22 }
 0x465   : > { %3323 = vtanh.f32 %v2731_v6  ;;  %v1202_v47 = vadd.f32 %v5597_v0, %v1071_v18 }
 0x466   : > { %v2435_v17 = vpop.permute.xlu1 %2434  ;;  %v1966_v12 = vadd.f32 %v1838_v37, %v1197_v44 }
 0x467   : > { %v2601_v21 = vmul.f32 %v4709_v62, %v2435_v17  ;;  %v2475_v52 = vpop.permute.xlu2 %2474  ;;  %v2455_v34 = vpop.permute.xlu0 %2454  ;;  %v1971_v30 = vadd.f32 %v1843_v7, %v1202_v47  ;;  %v1200_v17 = vadd.f32 %v5597_v0, %v1069_v48 }
 0x468   : > { %v2611_v58 = vmul.f32 %v4709_v62, %v2475_v52  ;;  %v2606_v54 = vmul.f32 %v4709_v62, %v2455_v34 }
 0x469   : > { %v3320_v60 = vpop.eup %3319  ;;  %v2729_v55 = vadd.f32 %v2601_v21, %v1960_v53  ;;  %v1969_v21 = vadd.f32 %v1841_v31, %v1200_v17 }
 0x46a   : > { %v3322_v15 = vpop.eup %3321  ;;  %2983 = vst.msk [vmem:[%s4736_s25 + $0x380] sm:$0xff] %vm2870_vm0, %v3320_v60  ;;  %v2739_v20 = vadd.f32 %v2611_v58, %v1970_v40  ;;  %v2734_v9 = vadd.f32 %v2606_v54, %v1965_v23  ;;  %v6495_v40 = vld [vmem:[#allocation199_spill] sm:$0xff]  ;;  %v6496_v60 = vld [vmem:[#allocation4_spill] sm:$0xff] }
 0x46b   : > { %v3324_v41 = vpop.eup %3323  ;;  %2993 = vst.msk [vmem:[%s4736_s25 + $0x3d0] sm:$0xff] %vm2870_vm0, %v3322_v15  ;;  %3325 = vtanh.f32 %v2729_v55  ;;  %v1072_v23 = vmul.f32 %v4695_v8, %v6495_v40  ;;  %v1844_v10 = vmul.f32 %v4697_v14, %v6496_v60 }
 0x46c   : > { %2988 = vst.msk [vmem:[%s4736_s25 + $0x3a8] sm:$0xff] %vm2870_vm0, %v3324_v41  ;;  %3327 = vtanh.f32 %v2739_v20 }
 0x46d   : > { %3329 = vtanh.f32 %v2734_v9  ;;  %v1203_v11 = vadd.f32 %v5597_v0, %v1072_v23 }
 0x46e   : > { %v2447_v57 = vpop.permute.xlu1 %2446 }
 0x46f   : > { %v2604_v49 = vmul.f32 %v4709_v62, %v2447_v57  ;;  %v2467_v1 = vpop.permute.xlu0 %2466  ;;  %v1972_v15 = vadd.f32 %v1844_v10, %v1203_v11 }
 0x470   : > { %v2609_v61 = vmul.f32 %v4709_v62, %v2467_v1 }
 0x471   : > { %v3326_v50 = vpop.eup %3325  ;;  %v2732_v13 = vadd.f32 %v2604_v49, %v1963_v2 }
 0x472   : > { %v3328_v39 = vpop.eup %3327  ;;  %2986 = vst.msk [vmem:[%s4736_s25 + $0x398] sm:$0xff] %vm2870_vm0, %v3326_v50  ;;  %v2737_v27 = vadd.f32 %v2609_v61, %v1968_v29 }
 0x473   : > { %v3330_v28 = vpop.eup %3329  ;;  %2996 = vst.msk [vmem:[%s4736_s25 + $0x3e8] sm:$0xff] %vm2870_vm0, %v3328_v39  ;;  %3331 = vtanh.f32 %v2732_v13 }
 0x474   : > { %2991 = vst.msk [vmem:[%s4736_s25 + $0x3c0] sm:$0xff] %vm2870_vm0, %v3330_v28  ;;  %3333 = vtanh.f32 %v2737_v27 }
 0x476   : > { %v2459_v5 = vpop.permute.xlu1 %2458 }
 0x477   : > { %v2607_v42 = vmul.f32 %v4709_v62, %v2459_v5  ;;  %v2479_v6 = vpop.permute.xlu0 %2478 }
 0x478   : > { %v2612_v3 = vmul.f32 %v4709_v62, %v2479_v6 }
 0x479   : > { %v3332_v36 = vpop.eup %3331  ;;  %v2735_v25 = vadd.f32 %v2607_v42, %v1966_v12 }
 0x47a   : > { %v3334_v63 = vpop.eup %3333  ;;  %2989 = vst.msk [vmem:[%s4736_s25 + $0x3b0] sm:$0xff] %vm2870_vm0, %v3332_v36  ;;  %v2740_v46 = vadd.f32 %v2612_v3, %v1971_v30 }
 0x47b   : > { %2994 = vst.msk [vmem:[%s4736_s25 + $0x3d8] sm:$0xff] %vm2870_vm0, %v3334_v63  ;;  %3335 = vtanh.f32 %v2735_v25 }
 0x47c   : > { %3337 = vtanh.f32 %v2740_v46 }
 0x47e   : > { %v2471_v53 = vpop.permute.xlu1 %2470 }
 0x47f   : > { %v2610_v52 = vmul.f32 %v4709_v62, %v2471_v53 }
 0x481   : > { %v3336_v34 = vpop.eup %3335  ;;  %v2738_v58 = vadd.f32 %v2610_v52, %v1969_v21 }
 0x482   : > { %v3338_v54 = vpop.eup %3337  ;;  %2992 = vst.msk [vmem:[%s4736_s25 + $0x3c8] sm:$0xff] %vm2870_vm0, %v3336_v34 }
 0x483   : > { %2997 = vst.msk [vmem:[%s4736_s25 + $0x3f0] sm:$0xff] %vm2870_vm0, %v3338_v54  ;;  %3339 = vtanh.f32 %v2738_v58 }
 0x486   : > { %v2483_v55 = vpop.permute.xlu1 %2482 }
 0x487   : > { %v2613_v59 = vmul.f32 %v4709_v62, %v2483_v55 }
 0x489   : > { %v3340_v4 = vpop.eup %3339  ;;  %v2741_v20 = vadd.f32 %v2613_v59, %v1972_v15 }
 0x48a   : > { %2995 = vst.msk [vmem:[%s4736_s25 + $0x3e0] sm:$0xff] %vm2870_vm0, %v3340_v4 }
 0x48b   : > { %3341 = vtanh.f32 %v2741_v20 }
 0x491   : > { %v3342_v8 = vpop.eup %3341 }
 0x492   : > { %2998 = vst.msk [vmem:[%s4736_s25 + $0x3f8] sm:$0xff] %vm2870_vm0, %v3342_v8 }
 0x493 PF: > { %s13_s12 = sadd.s32 1, %s3479_s12  }
 0x494   : > { %p10_p4 = scmp.ge.s32.totalorder %s13_s12, 6  }
 0x496   :  { %12 = sbr.rel (!%p10_p4) target bundleno = 1 (0x1), region = 62 }

</bundles_post_ra>
